<compile_context>
chip_gen: v6e
topology: v6e:2x2x1
jax: 0.10.0
libtpu: 0.0.40
codegen_flags: <defaults>
</compile_context>

<pallas_src>
import functools

import jax
import jax.numpy as jnp
import numpy as np
from jax import lax
from jax.experimental import pallas as pl
from jax.experimental.pallas import tpu as pltpu


_VMEM = pl.BlockSpec(memory_space=pltpu.MemorySpace.VMEM)


# ----------------------------------------------------------------------------
# LSTM cells (input projection precomputed; full-vreg nonlinearities)
# ----------------------------------------------------------------------------
def _lstm_step_uni(gin_t, h, c, whh, H):
    """One unidirectional LSTM step.  gin_t = x_t @ Wih + b (hoisted).
    PyTorch gate order i,f,g,o.  sigmoid/tanh evaluated once on the full
    (Bp, 4H) gates array; gate lanes selected afterwards."""
    gates = gin_t + jnp.dot(h, whh, preferred_element_type=jnp.float32)
    sg = jax.nn.sigmoid(gates)
    tg = jnp.tanh(gates)
    i = sg[:, 0:H]
    f = sg[:, H:2 * H]
    g = tg[:, 2 * H:3 * H]
    o = sg[:, 3 * H:4 * H]
    c_new = f * c + i * g
    h_new = o * jnp.tanh(c_new)
    return h_new, c_new


def _lstm_step_bi(gin_t, hc, cc, whh_blk, H):
    """One fused forward+backward LSTM step.

    hc = [h_fwd | h_bwd] (Bp, 2H), cc likewise.  whh_blk is the (2H, 8H)
    block-diagonal recurrent weight with gate columns interleaved as
    [i_f, i_r, f_f, f_r, g_f, g_r, o_f, o_r], so one MXU push covers both
    directions and every elementwise operand is a contiguous 2H lane block."""
    gates = gin_t + jnp.dot(hc, whh_blk, preferred_element_type=jnp.float32)
    sg = jax.nn.sigmoid(gates)
    tg = jnp.tanh(gates)
    i = sg[:, 0:2 * H]
    f = sg[:, 2 * H:4 * H]
    g = tg[:, 4 * H:6 * H]
    o = sg[:, 6 * H:8 * H]
    cc_new = f * cc + i * g
    hc_new = o * jnp.tanh(cc_new)
    return hc_new, cc_new


# ----------------------------------------------------------------------------
# Single fused kernel: encoder LSTM stack + inter classifier + bidirectional
# decoder + (convs folded into) final classifier
# ----------------------------------------------------------------------------
def _fused_kernel(xh_ref, yh_ref, xp_ref,
                  ew_ref, eb_ref,
                  wih0_ref, whh0_ref, b0_ref,
                  wih1_ref, whh1_ref, b1_ref,
                  iw_ref, ib_ref,
                  wih0f_ref, wih0r_ref, whh0b_ref, b0d_ref,
                  wih1f_ref, wih1r_ref, whh1b_ref, b1d_ref,
                  wd_ref, beff_ref,
                  yhist_ref, out_ref,
                  *, Th, Tp, Bp, H, C):
    f32 = jnp.float32

    ew = ew_ref[...]
    eb = eb_ref[...]

    # ---------------- encoder: linear_encoder + tanh (one matmul) ----------------
    feat_h = jnp.tanh(jnp.dot(xh_ref[...], ew, preferred_element_type=f32) + eb)

    # ---------------- encoder LSTM layer 0 (y column folded as rank-1 term) ------
    gin0 = (jnp.dot(feat_h, wih0_ref[0:C, :], preferred_element_type=f32)
            + yh_ref[...] * wih0_ref[C:C + 1, :] + b0_ref[...])
    whh0 = whh0_ref[...]
    h = jnp.zeros((Bp, H), f32)
    c = jnp.zeros((Bp, H), f32)
    hs0 = []
    for s in range(Th):                           # static unrolled; h/c in vregs
        h, c = _lstm_step_uni(gin0[s * Bp:(s + 1) * Bp, :], h, c, whh0, H)
        hs0.append(h)
    h0T, c0T = h, c
    HS0 = jnp.concatenate(hs0, axis=0)            # one stack, no per-step stores

    # ---------------- encoder LSTM layer 1 ----------------
    gin1 = jnp.dot(HS0, wih1_ref[...], preferred_element_type=f32) + b1_ref[...]
    whh1 = whh1_ref[...]
    h = jnp.zeros((Bp, H), f32)
    c = jnp.zeros((Bp, H), f32)
    hs1 = []
    for s in range(Th):
        h, c = _lstm_step_uni(gin1[s * Bp:(s + 1) * Bp, :], h, c, whh1, H)
        hs1.append(h)
    h1T, c1T = h, c

    # inter classifier on hiddens[:, :-1, :]
    HS1 = jnp.concatenate(hs1[:Th - 1], axis=0)
    yhist_ref[...] = (jnp.dot(HS1, iw_ref[...], preferred_element_type=f32)
                      + ib_ref[...])

    # ---------------- decoder: linear_encoder + tanh ----------------
    feat_p = jnp.tanh(jnp.dot(xp_ref[...], ew, preferred_element_type=f32) + eb)

    # ---------------- decoder layer 0 (bidirectional, fused fwd+bwd) ----------------
    gin0f = (jnp.dot(feat_p, wih0f_ref[...], preferred_element_type=f32)
             + b0d_ref[...])
    gin0r = jnp.dot(feat_p, wih0r_ref[...], preferred_element_type=f32)
    whh0b = whh0b_ref[...]
    hc = jnp.concatenate([h0T, h1T], axis=1)      # fwd seeded by enc layer-0 final,
    cc = jnp.concatenate([c0T, c1T], axis=1)      # bwd seeded by enc layer-1 final
    l0f = [None] * Tp
    l0r = [None] * Tp
    for s in range(Tp):                           # bwd time reversal done by index
        rs = Tp - 1 - s
        gin_t = gin0f[s * Bp:(s + 1) * Bp, :] + gin0r[rs * Bp:(rs + 1) * Bp, :]
        hc, cc = _lstm_step_bi(gin_t, hc, cc, whh0b, H)
        l0f[s] = hc[:, 0:H]
        l0r[rs] = hc[:, H:2 * H]
    L0 = jnp.concatenate([jnp.concatenate(l0f, axis=0),
                          jnp.concatenate(l0r, axis=0)], axis=1)   # (Tp*Bp, 2H)

    # ---------------- decoder layer 1 (bidirectional, fused fwd+bwd) ----------------
    gin1f = jnp.dot(L0, wih1f_ref[...], preferred_element_type=f32) + b1d_ref[...]
    gin1r = jnp.dot(L0, wih1r_ref[...], preferred_element_type=f32)
    whh1b = whh1b_ref[...]
    hc = jnp.zeros((Bp, 2 * H), f32)
    cc = jnp.zeros((Bp, 2 * H), f32)
    h1f = [None] * Tp
    h1r = [None] * Tp
    for s in range(Tp):
        rs = Tp - 1 - s
        gin_t = gin1f[s * Bp:(s + 1) * Bp, :] + gin1r[rs * Bp:(rs + 1) * Bp, :]
        hc, cc = _lstm_step_bi(gin_t, hc, cc, whh1b, H)
        h1f[s] = hc[:, 0:H]
        h1r[rs] = hc[:, H:2 * H]
    HO = jnp.concatenate([jnp.concatenate(h1f, axis=0),
                          jnp.concatenate(h1r, axis=0)], axis=1)   # (Tp*Bp, 2H)

    # ---------------- convs (k=3,5,7, 'same') folded into the final classifier ----
    # result[t] = sum_{d=-3..3} HO[t+d] @ W_d + b_eff  (W_d precomputed in wrapper)
    zpad = jnp.zeros((3 * Bp, 2 * H), f32)
    HOp = jnp.concatenate([zpad, HO, zpad], axis=0)   # ((Tp+6)*Bp, 2H), zero 'same' pad
    acc = jnp.dot(HOp[0:Tp * Bp, :], wd_ref[0:2 * H, :],
                  preferred_element_type=f32)
    for k in range(1, 7):
        acc = acc + jnp.dot(HOp[k * Bp:(k + Tp) * Bp, :],
                            wd_ref[k * 2 * H:(k + 1) * 2 * H, :],
                            preferred_element_type=f32)
    out_ref[...] = acc + beff_ref[...]


# ----------------------------------------------------------------------------
# Wrapper-side weight preparation (parameter-only, tiny)
# ----------------------------------------------------------------------------
def _spread_gates(w4, H, odd):
    """(R, 4H) -> (R, 8H): gate block g placed at column block 2*g + odd."""
    R = w4.shape[0]
    z = jnp.zeros((R, H), w4.dtype)
    cols = []
    for g in range(4):
        blk = w4[:, g * H:(g + 1) * H]
        cols += ([z, blk] if odd else [blk, z])
    return jnp.concatenate(cols, axis=1)


def _bidir_weights(pf, pr, H):
    """Build interleaved-gate, block-diagonal weights for a fused bi-LSTM layer."""
    wih_f = _spread_gates(pf["wih"], H, odd=False)
    wih_r = _spread_gates(pr["wih"], H, odd=True)
    whh_blk = jnp.concatenate([_spread_gates(pf["whh"], H, odd=False),
                               _spread_gates(pr["whh"], H, odd=True)], axis=0)
    b_sp = (_spread_gates(pf["b"].reshape(1, 4 * H), H, odd=False)
            + _spread_gates(pr["b"].reshape(1, 4 * H), H, odd=True))
    return wih_f, wih_r, whh_blk, b_sp


def _fold_convs_into_classifier(params, H, Q):
    """W_d = sum_j conv_w_j[tap(d)] * final_w_block_j  for d = -3..3, plus bias."""
    fw = params["final_w"]
    Wf = [fw[0:2 * H], fw[2 * H:4 * H], fw[4 * H:6 * H]]
    ws = [params["conv_w3"], params["conv_w5"], params["conv_w7"]]
    pads = [1, 2, 3]
    blocks = []
    for d in range(-3, 4):
        Wd = jnp.zeros((2 * H, Q), jnp.float32)
        for j in range(3):
            if abs(d) <= pads[j]:
                Wd = Wd + ws[j][pads[j] + d] * Wf[j]
        blocks.append(Wd)
    wd_stack = jnp.concatenate(blocks, axis=0)          # (7*2H, Q)
    b_eff = params["final_b"]
    for j in range(3):
        b_eff = b_eff + params["conv_b"][j] * jnp.sum(Wf[j], axis=0)
    return wd_stack, b_eff.reshape(1, Q)


# ----------------------------------------------------------------------------
# Parameter construction (deterministic, shapes per the PyTorch __init__)
# ----------------------------------------------------------------------------
def init_params(key, input_dim, hidden_size, context_size, num_quantiles):
    H = hidden_size
    C = context_size
    Q = num_quantiles
    ks = list(jax.random.split(key, 32))

    def nrm(shape, std=0.02):
        return std * jax.random.normal(ks.pop(), shape, jnp.float32)

    def lstm_w(din):
        # wih: (din, 4H), whh: (H, 4H), b = b_ih + b_hh: (4H,)
        s = 1.0 / np.sqrt(H)
        wih = s * jax.random.normal(ks.pop(), (din, 4 * H), jnp.float32)
        whh = s * jax.random.normal(ks.pop(), (H, 4 * H), jnp.float32)
        b = s * jax.random.normal(ks.pop(), (4 * H,), jnp.float32)
        return {"wih": wih, "whh": whh, "b": b}

    return {
        "enc_w": nrm((input_dim, C)), "enc_b": jnp.zeros((C,), jnp.float32),
        "lstm0": lstm_w(C + 1), "lstm1": lstm_w(H),
        "dec0_f": lstm_w(C), "dec0_r": lstm_w(C),
        "dec1_f": lstm_w(2 * H), "dec1_r": lstm_w(2 * H),
        "conv_w3": nrm((3,)), "conv_w5": nrm((5,)), "conv_w7": nrm((7,)),
        "conv_b": jnp.zeros((3,), jnp.float32),
        "inter_w": nrm((H, Q)), "inter_b": jnp.zeros((Q,), jnp.float32),
        "final_w": nrm((H * 2 * 3, Q)), "final_b": jnp.zeros((Q,), jnp.float32),
    }


# ----------------------------------------------------------------------------
# Forward pass: one fused pallas_call; only tiny transpose/pad/reshape glue
# ----------------------------------------------------------------------------
def conv_rnn_multi_forward(params, x_seq_hist, y_seq_hist, x_seq_pred,
                           y_seq_pred, *, hidden_size):
    B, Th, Din = x_seq_hist.shape
    Tp = x_seq_pred.shape[1]
    H = hidden_size
    C = params["enc_w"].shape[1]
    Q = params["inter_w"].shape[1]
    f32 = jnp.float32

    # batch padded to a full sublane tile so every per-step slice is aligned
    Bp = max(8, ((B + 7) // 8) * 8)

    def to_time_major(x3):                         # (B, T, D) -> (T*Bp, D)
        xt = jnp.transpose(x3, (1, 0, 2))
        xt = jnp.pad(xt, ((0, 0), (0, Bp - B), (0, 0)))
        return xt.reshape(x3.shape[1] * Bp, x3.shape[2])

    xh = to_time_major(x_seq_hist)
    xp = to_time_major(x_seq_pred)
    yh = to_time_major(y_seq_hist[:, :, None])

    p0, p1 = params["lstm0"], params["lstm1"]
    wih0f, wih0r, whh0b, b0d = _bidir_weights(params["dec0_f"],
                                              params["dec0_r"], H)
    wih1f, wih1r, whh1b, b1d = _bidir_weights(params["dec1_f"],
                                              params["dec1_r"], H)
    wd_stack, b_eff = _fold_convs_into_classifier(params, H, Q)

    yhist2, res2 = pl.pallas_call(
        functools.partial(_fused_kernel, Th=Th, Tp=Tp, Bp=Bp, H=H, C=C),
        out_shape=(jax.ShapeDtypeStruct(((Th - 1) * Bp, Q), f32),
                   jax.ShapeDtypeStruct((Tp * Bp, Q), f32)),
        in_specs=[_VMEM] * 23,
        out_specs=(_VMEM, _VMEM),
    )(xh, yh, xp,
      params["enc_w"], params["enc_b"].reshape(1, C),
      p0["wih"], p0["whh"], p0["b"].reshape(1, 4 * H),
      p1["wih"], p1["whh"], p1["b"].reshape(1, 4 * H),
      params["inter_w"], params["inter_b"].reshape(1, Q),
      wih0f, wih0r, whh0b, b0d,
      wih1f, wih1r, whh1b, b1d,
      wd_stack, b_eff)

    result = jnp.transpose(res2.reshape(Tp, Bp, Q)[:, :B], (1, 0, 2))
    y_seq_hist_pred = jnp.transpose(yhist2.reshape(Th - 1, Bp, Q)[:, :B],
                                    (1, 0, 2))
    y_seq_hist_gt = y_seq_hist[:, 1:]
    return result, y_seq_pred, y_seq_hist_pred, y_seq_hist_gt


# ----------------------------------------------------------------------------
# Pure-JAX reference (for the correctness check of the Pallas path)
# ----------------------------------------------------------------------------
def _lstm_layer_ref(x_tm, wih, whh, b, h0, c0):
    H = h0.shape[1]

    def step(carry, x_t):
        h, c = carry
        g = x_t @ wih + h @ whh + b
        i = jax.nn.sigmoid(g[:, :H])
        f = jax.nn.sigmoid(g[:, H:2 * H])
        gg = jnp.tanh(g[:, 2 * H:3 * H])
        o = jax.nn.sigmoid(g[:, 3 * H:])
        c = f * c + i * gg
        h = o * jnp.tanh(c)
        return (h, c), h

    (hT, cT), hs = lax.scan(step, (h0, c0), x_tm)
    return hs, hT, cT


def _conv_time_ref(x, w, bias):
    K = w.shape[0]
    pad = K // 2
    T = x.shape[1]
    xp = jnp.pad(x, ((0, 0), (pad, pad), (0, 0)))
    out = sum(w[k] * xp[:, k:k + T, :] for k in range(K))
    return out + bias


def forward_ref(params, x_seq_hist, y_seq_hist, x_seq_pred, y_seq_pred, *,
                hidden_size):
    B, Th, _ = x_seq_hist.shape
    Tp = x_seq_pred.shape[1]
    H = hidden_size
    Q = params["inter_w"].shape[1]

    xf_h = jnp.tanh(x_seq_hist @ params["enc_w"] + params["enc_b"])
    xf_p = jnp.tanh(x_seq_pred @ params["enc_w"] + params["enc_b"])
    x_tot_h = jnp.concatenate([xf_h, y_seq_hist[:, :, None]], axis=2)

    z = jnp.zeros((B, H), jnp.float32)
    xe = jnp.transpose(x_tot_h, (1, 0, 2))
    p0, p1 = params["lstm0"], params["lstm1"]
    hs0, h0T, c0T = _lstm_layer_ref(xe, p0["wih"], p0["whh"], p0["b"], z, z)
    hs1, h1T, c1T = _lstm_layer_ref(hs0, p1["wih"], p1["whh"], p1["b"], z, z)
    hiddens = jnp.transpose(hs1, (1, 0, 2))

    xd = jnp.transpose(xf_p, (1, 0, 2))
    pf, pr = params["dec0_f"], params["dec0_r"]
    f0, _, _ = _lstm_layer_ref(xd, pf["wih"], pf["whh"], pf["b"], h0T, c0T)
    r0, _, _ = _lstm_layer_ref(jnp.flip(xd, 0), pr["wih"], pr["whh"], pr["b"],
                               h1T, c1T)
    l0 = jnp.concatenate([f0, jnp.flip(r0, 0)], axis=-1)
    pf, pr = params["dec1_f"], params["dec1_r"]
    f1, _, _ = _lstm_layer_ref(l0, pf["wih"], pf["whh"], pf["b"], z, z)
    r1, _, _ = _lstm_layer_ref(jnp.flip(l0, 0), pr["wih"], pr["whh"], pr["b"],
                               z, z)
    ho = jnp.transpose(jnp.concatenate([f1, jnp.flip(r1, 0)], axis=-1),
                       (1, 0, 2))

    c1 = _conv_time_ref(ho, params["conv_w3"], params["conv_b"][0])
    c2 = _conv_time_ref(ho, params["conv_w5"], params["conv_b"][1])
    c3 = _conv_time_ref(ho, params["conv_w7"], params["conv_b"][2])
    conv_all = jnp.concatenate([c1, c2, c3], axis=-1)

    result = (conv_all @ params["final_w"] + params["final_b"]
              ).reshape(B, Tp, Q)
    y_hist_pred = (hiddens[:, :-1, :] @ params["inter_w"] + params["inter_b"]
                   ).reshape(B, Th - 1, Q)
    return result, y_seq_pred, y_hist_pred, y_seq_hist[:, 1:]


# ----------------------------------------------------------------------------
if __name__ == "__main__":
    # Small, forward-consistent shapes.
    B = 2
    input_dim = 5
    hidden_size = 32
    context_size = 16
    num_quantiles = 3
    pred_long = 8
    hist_long = 10

    key = jax.random.PRNGKey(0)
    kp, kx1, ky1, kx2, ky2 = jax.random.split(key, 5)

    params = init_params(kp, input_dim, hidden_size, context_size,
                         num_quantiles)

    x_seq_hist = jax.random.normal(kx1, (B, hist_long, input_dim), jnp.float32)
    y_seq_hist = jax.random.normal(ky1, (B, hist_long), jnp.float32)
    x_seq_pred = jax.random.normal(kx2, (B, pred_long, input_dim), jnp.float32)
    y_seq_pred = jax.random.normal(ky2, (B, pred_long), jnp.float32)

    fwd = jax.jit(functools.partial(conv_rnn_multi_forward,
                                    hidden_size=hidden_size))
    outs = fwd(params, x_seq_hist, y_seq_hist, x_seq_pred, y_seq_pred)
    outs = jax.block_until_ready(outs)

    refs = forward_ref(params, x_seq_hist, y_seq_hist, x_seq_pred, y_seq_pred,
                       hidden_size=hidden_size)
    refs = jax.block_until_ready(refs)

    names = ["result", "y_seq_pred", "y_seq_hist_pred", "y_seq_hist_gt"]
    for n, a, b in zip(names, outs, refs):
        assert a.shape == b.shape, (n, a.shape, b.shape)
        np.testing.assert_allclose(np.asarray(a), np.asarray(b),
                                   rtol=1e-3, atol=1e-3, err_msg=n)

    print("KERNEL_OK")
</pallas_src>

<mosaic_0001>
module attributes {stable_mosaic.version = 11 : i64} {
  func.func @_fused_kernel(%arg0: memref<80x5xf32, #tpu.memory_space<vmem>>, %arg1: memref<80x1xf32, #tpu.memory_space<vmem>>, %arg2: memref<64x5xf32, #tpu.memory_space<vmem>>, %arg3: memref<5x16xf32, #tpu.memory_space<vmem>>, %arg4: memref<1x16xf32, #tpu.memory_space<vmem>>, %arg5: memref<17x128xf32, #tpu.memory_space<vmem>>, %arg6: memref<32x128xf32, #tpu.memory_space<vmem>>, %arg7: memref<1x128xf32, #tpu.memory_space<vmem>>, %arg8: memref<32x128xf32, #tpu.memory_space<vmem>>, %arg9: memref<32x128xf32, #tpu.memory_space<vmem>>, %arg10: memref<1x128xf32, #tpu.memory_space<vmem>>, %arg11: memref<32x3xf32, #tpu.memory_space<vmem>>, %arg12: memref<1x3xf32, #tpu.memory_space<vmem>>, %arg13: memref<16x256xf32, #tpu.memory_space<vmem>>, %arg14: memref<16x256xf32, #tpu.memory_space<vmem>>, %arg15: memref<64x256xf32, #tpu.memory_space<vmem>>, %arg16: memref<1x256xf32, #tpu.memory_space<vmem>>, %arg17: memref<64x256xf32, #tpu.memory_space<vmem>>, %arg18: memref<64x256xf32, #tpu.memory_space<vmem>>, %arg19: memref<64x256xf32, #tpu.memory_space<vmem>>, %arg20: memref<1x256xf32, #tpu.memory_space<vmem>>, %arg21: memref<448x3xf32, #tpu.memory_space<vmem>>, %arg22: memref<1x3xf32, #tpu.memory_space<vmem>>, %arg23: memref<72x3xf32, #tpu.memory_space<vmem>>, %arg24: memref<64x3xf32, #tpu.memory_space<vmem>>) attributes {dimension_semantics = [], scalar_prefetch = 0 : i64, scratch_operands = 0 : i64, tpu.core_type = #tpu.core_type<tc>} {
    %c0 = arith.constant 0 : index
    %c0_0 = arith.constant 0 : index
    %0 = vector.load %arg3[%c0, %c0_0] : memref<5x16xf32, #tpu.memory_space<vmem>>, vector<5x16xf32>
    %c0_1 = arith.constant 0 : index
    %c0_2 = arith.constant 0 : index
    %1 = vector.load %arg4[%c0_1, %c0_2] : memref<1x16xf32, #tpu.memory_space<vmem>>, vector<1x16xf32>
    %c0_3 = arith.constant 0 : index
    %c0_4 = arith.constant 0 : index
    %2 = vector.load %arg0[%c0_3, %c0_4] : memref<80x5xf32, #tpu.memory_space<vmem>>, vector<80x5xf32>
    %cst = arith.constant dense<0.000000e+00> : vector<80x16xf32>
    %3 = tpu.matmul %2, %0, %cst {dimension_numbers = #tpu.dot_dimension_numbers<[1], [0], [0], [1], [0, 0, 1, 1], [], []>} : vector<80x5xf32>, vector<5x16xf32>, vector<80x16xf32> -> vector<80x16xf32>
    %4 = vector.broadcast %1 : vector<1x16xf32> to vector<80x16xf32>
    %5 = arith.addf %3, %4 : vector<80x16xf32>
    %6 = math.tanh %5 : vector<80x16xf32>
    %c0_5 = arith.constant 0 : index
    %c0_6 = arith.constant 0 : index
    %7 = vector.load %arg5[%c0_5, %c0_6] : memref<17x128xf32, #tpu.memory_space<vmem>>, vector<16x128xf32>
    %cst_7 = arith.constant dense<0.000000e+00> : vector<80x128xf32>
    %8 = tpu.matmul %6, %7, %cst_7 {dimension_numbers = #tpu.dot_dimension_numbers<[1], [0], [0], [1], [0, 0, 1, 1], [], []>} : vector<80x16xf32>, vector<16x128xf32>, vector<80x128xf32> -> vector<80x128xf32>
    %c0_8 = arith.constant 0 : index
    %c0_9 = arith.constant 0 : index
    %9 = vector.load %arg1[%c0_8, %c0_9] : memref<80x1xf32, #tpu.memory_space<vmem>>, vector<80x1xf32>
    %c16 = arith.constant 16 : index
    %c0_10 = arith.constant 0 : index
    %10 = vector.load %arg5[%c16, %c0_10] : memref<17x128xf32, #tpu.memory_space<vmem>>, vector<1x128xf32>
    %11 = vector.broadcast %9 : vector<80x1xf32> to vector<80x128xf32>
    %12 = vector.broadcast %10 : vector<1x128xf32> to vector<80x128xf32>
    %13 = arith.mulf %11, %12 : vector<80x128xf32>
    %14 = arith.addf %8, %13 : vector<80x128xf32>
    %c0_11 = arith.constant 0 : index
    %c0_12 = arith.constant 0 : index
    %15 = vector.load %arg7[%c0_11, %c0_12] : memref<1x128xf32, #tpu.memory_space<vmem>>, vector<1x128xf32>
    %16 = vector.broadcast %15 : vector<1x128xf32> to vector<80x128xf32>
    %17 = arith.addf %14, %16 : vector<80x128xf32>
    %c0_13 = arith.constant 0 : index
    %c0_14 = arith.constant 0 : index
    %18 = vector.load %arg6[%c0_13, %c0_14] : memref<32x128xf32, #tpu.memory_space<vmem>>, vector<32x128xf32>
    %cst_15 = arith.constant 0.000000e+00 : f32
    %19 = vector.broadcast %cst_15 : f32 to vector<8x32xf32>
    %cst_16 = arith.constant 0.000000e+00 : f32
    %20 = vector.broadcast %cst_16 : f32 to vector<8x32xf32>
    %21 = vector.extract_strided_slice %17 {offsets = [0, 0], sizes = [8, 128], strides = [1, 1]} : vector<80x128xf32> to vector<8x128xf32>
    %cst_17 = arith.constant dense<0.000000e+00> : vector<8x128xf32>
    %22 = tpu.matmul %19, %18, %cst_17 {dimension_numbers = #tpu.dot_dimension_numbers<[1], [0], [0], [1], [0, 0, 1, 1], [], []>} : vector<8x32xf32>, vector<32x128xf32>, vector<8x128xf32> -> vector<8x128xf32>
    %23 = arith.addf %21, %22 : vector<8x128xf32>
    %24 = arith.negf %23 : vector<8x128xf32>
    %25 = math.exp %24 : vector<8x128xf32>
    %cst_18 = arith.constant 1.000000e+00 : f32
    %26 = vector.broadcast %cst_18 : f32 to vector<8x128xf32>
    %27 = arith.addf %26, %25 : vector<8x128xf32>
    %28 = arith.divf %26, %27 : vector<8x128xf32>
    %29 = math.tanh %23 : vector<8x128xf32>
    %30 = vector.extract_strided_slice %28 {offsets = [0, 0], sizes = [8, 32], strides = [1, 1]} : vector<8x128xf32> to vector<8x32xf32>
    %31 = vector.extract_strided_slice %28 {offsets = [0, 32], sizes = [8, 32], strides = [1, 1]} : vector<8x128xf32> to vector<8x32xf32>
    %32 = vector.extract_strided_slice %29 {offsets = [0, 64], sizes = [8, 32], strides = [1, 1]} : vector<8x128xf32> to vector<8x32xf32>
    %33 = vector.extract_strided_slice %28 {offsets = [0, 96], sizes = [8, 32], strides = [1, 1]} : vector<8x128xf32> to vector<8x32xf32>
    %34 = arith.mulf %31, %20 : vector<8x32xf32>
    %35 = arith.mulf %30, %32 : vector<8x32xf32>
    %36 = arith.addf %34, %35 : vector<8x32xf32>
    %37 = math.tanh %36 : vector<8x32xf32>
    %38 = arith.mulf %33, %37 : vector<8x32xf32>
    %39 = vector.extract_strided_slice %17 {offsets = [8, 0], sizes = [8, 128], strides = [1, 1]} : vector<80x128xf32> to vector<8x128xf32>
    %cst_19 = arith.constant dense<0.000000e+00> : vector<8x128xf32>
    %40 = tpu.matmul %38, %18, %cst_19 {dimension_numbers = #tpu.dot_dimension_numbers<[1], [0], [0], [1], [0, 0, 1, 1], [], []>} : vector<8x32xf32>, vector<32x128xf32>, vector<8x128xf32> -> vector<8x128xf32>
    %41 = arith.addf %39, %40 : vector<8x128xf32>
    %42 = arith.negf %41 : vector<8x128xf32>
    %43 = math.exp %42 : vector<8x128xf32>
    %cst_20 = arith.constant 1.000000e+00 : f32
    %44 = vector.broadcast %cst_20 : f32 to vector<8x128xf32>
    %45 = arith.addf %44, %43 : vector<8x128xf32>
    %46 = arith.divf %44, %45 : vector<8x128xf32>
    %47 = math.tanh %41 : vector<8x128xf32>
    %48 = vector.extract_strided_slice %46 {offsets = [0, 0], sizes = [8, 32], strides = [1, 1]} : vector<8x128xf32> to vector<8x32xf32>
    %49 = vector.extract_strided_slice %46 {offsets = [0, 32], sizes = [8, 32], strides = [1, 1]} : vector<8x128xf32> to vector<8x32xf32>
    %50 = vector.extract_strided_slice %47 {offsets = [0, 64], sizes = [8, 32], strides = [1, 1]} : vector<8x128xf32> to vector<8x32xf32>
    %51 = vector.extract_strided_slice %46 {offsets = [0, 96], sizes = [8, 32], strides = [1, 1]} : vector<8x128xf32> to vector<8x32xf32>
    %52 = arith.mulf %49, %36 : vector<8x32xf32>
    %53 = arith.mulf %48, %50 : vector<8x32xf32>
    %54 = arith.addf %52, %53 : vector<8x32xf32>
    %55 = math.tanh %54 : vector<8x32xf32>
    %56 = arith.mulf %51, %55 : vector<8x32xf32>
    %57 = vector.extract_strided_slice %17 {offsets = [16, 0], sizes = [8, 128], strides = [1, 1]} : vector<80x128xf32> to vector<8x128xf32>
    %cst_21 = arith.constant dense<0.000000e+00> : vector<8x128xf32>
    %58 = tpu.matmul %56, %18, %cst_21 {dimension_numbers = #tpu.dot_dimension_numbers<[1], [0], [0], [1], [0, 0, 1, 1], [], []>} : vector<8x32xf32>, vector<32x128xf32>, vector<8x128xf32> -> vector<8x128xf32>
    %59 = arith.addf %57, %58 : vector<8x128xf32>
    %60 = arith.negf %59 : vector<8x128xf32>
    %61 = math.exp %60 : vector<8x128xf32>
    %cst_22 = arith.constant 1.000000e+00 : f32
    %62 = vector.broadcast %cst_22 : f32 to vector<8x128xf32>
    %63 = arith.addf %62, %61 : vector<8x128xf32>
    %64 = arith.divf %62, %63 : vector<8x128xf32>
    %65 = math.tanh %59 : vector<8x128xf32>
    %66 = vector.extract_strided_slice %64 {offsets = [0, 0], sizes = [8, 32], strides = [1, 1]} : vector<8x128xf32> to vector<8x32xf32>
    %67 = vector.extract_strided_slice %64 {offsets = [0, 32], sizes = [8, 32], strides = [1, 1]} : vector<8x128xf32> to vector<8x32xf32>
    %68 = vector.extract_strided_slice %65 {offsets = [0, 64], sizes = [8, 32], strides = [1, 1]} : vector<8x128xf32> to vector<8x32xf32>
    %69 = vector.extract_strided_slice %64 {offsets = [0, 96], sizes = [8, 32], strides = [1, 1]} : vector<8x128xf32> to vector<8x32xf32>
    %70 = arith.mulf %67, %54 : vector<8x32xf32>
    %71 = arith.mulf %66, %68 : vector<8x32xf32>
    %72 = arith.addf %70, %71 : vector<8x32xf32>
    %73 = math.tanh %72 : vector<8x32xf32>
    %74 = arith.mulf %69, %73 : vector<8x32xf32>
    %75 = vector.extract_strided_slice %17 {offsets = [24, 0], sizes = [8, 128], strides = [1, 1]} : vector<80x128xf32> to vector<8x128xf32>
    %cst_23 = arith.constant dense<0.000000e+00> : vector<8x128xf32>
    %76 = tpu.matmul %74, %18, %cst_23 {dimension_numbers = #tpu.dot_dimension_numbers<[1], [0], [0], [1], [0, 0, 1, 1], [], []>} : vector<8x32xf32>, vector<32x128xf32>, vector<8x128xf32> -> vector<8x128xf32>
    %77 = arith.addf %75, %76 : vector<8x128xf32>
    %78 = arith.negf %77 : vector<8x128xf32>
    %79 = math.exp %78 : vector<8x128xf32>
    %cst_24 = arith.constant 1.000000e+00 : f32
    %80 = vector.broadcast %cst_24 : f32 to vector<8x128xf32>
    %81 = arith.addf %80, %79 : vector<8x128xf32>
    %82 = arith.divf %80, %81 : vector<8x128xf32>
    %83 = math.tanh %77 : vector<8x128xf32>
    %84 = vector.extract_strided_slice %82 {offsets = [0, 0], sizes = [8, 32], strides = [1, 1]} : vector<8x128xf32> to vector<8x32xf32>
    %85 = vector.extract_strided_slice %82 {offsets = [0, 32], sizes = [8, 32], strides = [1, 1]} : vector<8x128xf32> to vector<8x32xf32>
    %86 = vector.extract_strided_slice %83 {offsets = [0, 64], sizes = [8, 32], strides = [1, 1]} : vector<8x128xf32> to vector<8x32xf32>
    %87 = vector.extract_strided_slice %82 {offsets = [0, 96], sizes = [8, 32], strides = [1, 1]} : vector<8x128xf32> to vector<8x32xf32>
    %88 = arith.mulf %85, %72 : vector<8x32xf32>
    %89 = arith.mulf %84, %86 : vector<8x32xf32>
    %90 = arith.addf %88, %89 : vector<8x32xf32>
    %91 = math.tanh %90 : vector<8x32xf32>
    %92 = arith.mulf %87, %91 : vector<8x32xf32>
    %93 = vector.extract_strided_slice %17 {offsets = [32, 0], sizes = [8, 128], strides = [1, 1]} : vector<80x128xf32> to vector<8x128xf32>
    %cst_25 = arith.constant dense<0.000000e+00> : vector<8x128xf32>
    %94 = tpu.matmul %92, %18, %cst_25 {dimension_numbers = #tpu.dot_dimension_numbers<[1], [0], [0], [1], [0, 0, 1, 1], [], []>} : vector<8x32xf32>, vector<32x128xf32>, vector<8x128xf32> -> vector<8x128xf32>
    %95 = arith.addf %93, %94 : vector<8x128xf32>
    %96 = arith.negf %95 : vector<8x128xf32>
    %97 = math.exp %96 : vector<8x128xf32>
    %cst_26 = arith.constant 1.000000e+00 : f32
    %98 = vector.broadcast %cst_26 : f32 to vector<8x128xf32>
    %99 = arith.addf %98, %97 : vector<8x128xf32>
    %100 = arith.divf %98, %99 : vector<8x128xf32>
    %101 = math.tanh %95 : vector<8x128xf32>
    %102 = vector.extract_strided_slice %100 {offsets = [0, 0], sizes = [8, 32], strides = [1, 1]} : vector<8x128xf32> to vector<8x32xf32>
    %103 = vector.extract_strided_slice %100 {offsets = [0, 32], sizes = [8, 32], strides = [1, 1]} : vector<8x128xf32> to vector<8x32xf32>
    %104 = vector.extract_strided_slice %101 {offsets = [0, 64], sizes = [8, 32], strides = [1, 1]} : vector<8x128xf32> to vector<8x32xf32>
    %105 = vector.extract_strided_slice %100 {offsets = [0, 96], sizes = [8, 32], strides = [1, 1]} : vector<8x128xf32> to vector<8x32xf32>
    %106 = arith.mulf %103, %90 : vector<8x32xf32>
    %107 = arith.mulf %102, %104 : vector<8x32xf32>
    %108 = arith.addf %106, %107 : vector<8x32xf32>
    %109 = math.tanh %108 : vector<8x32xf32>
    %110 = arith.mulf %105, %109 : vector<8x32xf32>
    %111 = vector.extract_strided_slice %17 {offsets = [40, 0], sizes = [8, 128], strides = [1, 1]} : vector<80x128xf32> to vector<8x128xf32>
    %cst_27 = arith.constant dense<0.000000e+00> : vector<8x128xf32>
    %112 = tpu.matmul %110, %18, %cst_27 {dimension_numbers = #tpu.dot_dimension_numbers<[1], [0], [0], [1], [0, 0, 1, 1], [], []>} : vector<8x32xf32>, vector<32x128xf32>, vector<8x128xf32> -> vector<8x128xf32>
    %113 = arith.addf %111, %112 : vector<8x128xf32>
    %114 = arith.negf %113 : vector<8x128xf32>
    %115 = math.exp %114 : vector<8x128xf32>
    %cst_28 = arith.constant 1.000000e+00 : f32
    %116 = vector.broadcast %cst_28 : f32 to vector<8x128xf32>
    %117 = arith.addf %116, %115 : vector<8x128xf32>
    %118 = arith.divf %116, %117 : vector<8x128xf32>
    %119 = math.tanh %113 : vector<8x128xf32>
    %120 = vector.extract_strided_slice %118 {offsets = [0, 0], sizes = [8, 32], strides = [1, 1]} : vector<8x128xf32> to vector<8x32xf32>
    %121 = vector.extract_strided_slice %118 {offsets = [0, 32], sizes = [8, 32], strides = [1, 1]} : vector<8x128xf32> to vector<8x32xf32>
    %122 = vector.extract_strided_slice %119 {offsets = [0, 64], sizes = [8, 32], strides = [1, 1]} : vector<8x128xf32> to vector<8x32xf32>
    %123 = vector.extract_strided_slice %118 {offsets = [0, 96], sizes = [8, 32], strides = [1, 1]} : vector<8x128xf32> to vector<8x32xf32>
    %124 = arith.mulf %121, %108 : vector<8x32xf32>
    %125 = arith.mulf %120, %122 : vector<8x32xf32>
    %126 = arith.addf %124, %125 : vector<8x32xf32>
    %127 = math.tanh %126 : vector<8x32xf32>
    %128 = arith.mulf %123, %127 : vector<8x32xf32>
    %129 = vector.extract_strided_slice %17 {offsets = [48, 0], sizes = [8, 128], strides = [1, 1]} : vector<80x128xf32> to vector<8x128xf32>
    %cst_29 = arith.constant dense<0.000000e+00> : vector<8x128xf32>
    %130 = tpu.matmul %128, %18, %cst_29 {dimension_numbers = #tpu.dot_dimension_numbers<[1], [0], [0], [1], [0, 0, 1, 1], [], []>} : vector<8x32xf32>, vector<32x128xf32>, vector<8x128xf32> -> vector<8x128xf32>
    %131 = arith.addf %129, %130 : vector<8x128xf32>
    %132 = arith.negf %131 : vector<8x128xf32>
    %133 = math.exp %132 : vector<8x128xf32>
    %cst_30 = arith.constant 1.000000e+00 : f32
    %134 = vector.broadcast %cst_30 : f32 to vector<8x128xf32>
    %135 = arith.addf %134, %133 : vector<8x128xf32>
    %136 = arith.divf %134, %135 : vector<8x128xf32>
    %137 = math.tanh %131 : vector<8x128xf32>
    %138 = vector.extract_strided_slice %136 {offsets = [0, 0], sizes = [8, 32], strides = [1, 1]} : vector<8x128xf32> to vector<8x32xf32>
    %139 = vector.extract_strided_slice %136 {offsets = [0, 32], sizes = [8, 32], strides = [1, 1]} : vector<8x128xf32> to vector<8x32xf32>
    %140 = vector.extract_strided_slice %137 {offsets = [0, 64], sizes = [8, 32], strides = [1, 1]} : vector<8x128xf32> to vector<8x32xf32>
    %141 = vector.extract_strided_slice %136 {offsets = [0, 96], sizes = [8, 32], strides = [1, 1]} : vector<8x128xf32> to vector<8x32xf32>
    %142 = arith.mulf %139, %126 : vector<8x32xf32>
    %143 = arith.mulf %138, %140 : vector<8x32xf32>
    %144 = arith.addf %142, %143 : vector<8x32xf32>
    %145 = math.tanh %144 : vector<8x32xf32>
    %146 = arith.mulf %141, %145 : vector<8x32xf32>
    %147 = vector.extract_strided_slice %17 {offsets = [56, 0], sizes = [8, 128], strides = [1, 1]} : vector<80x128xf32> to vector<8x128xf32>
    %cst_31 = arith.constant dense<0.000000e+00> : vector<8x128xf32>
    %148 = tpu.matmul %146, %18, %cst_31 {dimension_numbers = #tpu.dot_dimension_numbers<[1], [0], [0], [1], [0, 0, 1, 1], [], []>} : vector<8x32xf32>, vector<32x128xf32>, vector<8x128xf32> -> vector<8x128xf32>
    %149 = arith.addf %147, %148 : vector<8x128xf32>
    %150 = arith.negf %149 : vector<8x128xf32>
    %151 = math.exp %150 : vector<8x128xf32>
    %cst_32 = arith.constant 1.000000e+00 : f32
    %152 = vector.broadcast %cst_32 : f32 to vector<8x128xf32>
    %153 = arith.addf %152, %151 : vector<8x128xf32>
    %154 = arith.divf %152, %153 : vector<8x128xf32>
    %155 = math.tanh %149 : vector<8x128xf32>
    %156 = vector.extract_strided_slice %154 {offsets = [0, 0], sizes = [8, 32], strides = [1, 1]} : vector<8x128xf32> to vector<8x32xf32>
    %157 = vector.extract_strided_slice %154 {offsets = [0, 32], sizes = [8, 32], strides = [1, 1]} : vector<8x128xf32> to vector<8x32xf32>
    %158 = vector.extract_strided_slice %155 {offsets = [0, 64], sizes = [8, 32], strides = [1, 1]} : vector<8x128xf32> to vector<8x32xf32>
    %159 = vector.extract_strided_slice %154 {offsets = [0, 96], sizes = [8, 32], strides = [1, 1]} : vector<8x128xf32> to vector<8x32xf32>
    %160 = arith.mulf %157, %144 : vector<8x32xf32>
    %161 = arith.mulf %156, %158 : vector<8x32xf32>
    %162 = arith.addf %160, %161 : vector<8x32xf32>
    %163 = math.tanh %162 : vector<8x32xf32>
    %164 = arith.mulf %159, %163 : vector<8x32xf32>
    %165 = vector.extract_strided_slice %17 {offsets = [64, 0], sizes = [8, 128], strides = [1, 1]} : vector<80x128xf32> to vector<8x128xf32>
    %cst_33 = arith.constant dense<0.000000e+00> : vector<8x128xf32>
    %166 = tpu.matmul %164, %18, %cst_33 {dimension_numbers = #tpu.dot_dimension_numbers<[1], [0], [0], [1], [0, 0, 1, 1], [], []>} : vector<8x32xf32>, vector<32x128xf32>, vector<8x128xf32> -> vector<8x128xf32>
    %167 = arith.addf %165, %166 : vector<8x128xf32>
    %168 = arith.negf %167 : vector<8x128xf32>
    %169 = math.exp %168 : vector<8x128xf32>
    %cst_34 = arith.constant 1.000000e+00 : f32
    %170 = vector.broadcast %cst_34 : f32 to vector<8x128xf32>
    %171 = arith.addf %170, %169 : vector<8x128xf32>
    %172 = arith.divf %170, %171 : vector<8x128xf32>
    %173 = math.tanh %167 : vector<8x128xf32>
    %174 = vector.extract_strided_slice %172 {offsets = [0, 0], sizes = [8, 32], strides = [1, 1]} : vector<8x128xf32> to vector<8x32xf32>
    %175 = vector.extract_strided_slice %172 {offsets = [0, 32], sizes = [8, 32], strides = [1, 1]} : vector<8x128xf32> to vector<8x32xf32>
    %176 = vector.extract_strided_slice %173 {offsets = [0, 64], sizes = [8, 32], strides = [1, 1]} : vector<8x128xf32> to vector<8x32xf32>
    %177 = vector.extract_strided_slice %172 {offsets = [0, 96], sizes = [8, 32], strides = [1, 1]} : vector<8x128xf32> to vector<8x32xf32>
    %178 = arith.mulf %175, %162 : vector<8x32xf32>
    %179 = arith.mulf %174, %176 : vector<8x32xf32>
    %180 = arith.addf %178, %179 : vector<8x32xf32>
    %181 = math.tanh %180 : vector<8x32xf32>
    %182 = arith.mulf %177, %181 : vector<8x32xf32>
    %183 = vector.extract_strided_slice %17 {offsets = [72, 0], sizes = [8, 128], strides = [1, 1]} : vector<80x128xf32> to vector<8x128xf32>
    %cst_35 = arith.constant dense<0.000000e+00> : vector<8x128xf32>
    %184 = tpu.matmul %182, %18, %cst_35 {dimension_numbers = #tpu.dot_dimension_numbers<[1], [0], [0], [1], [0, 0, 1, 1], [], []>} : vector<8x32xf32>, vector<32x128xf32>, vector<8x128xf32> -> vector<8x128xf32>
    %185 = arith.addf %183, %184 : vector<8x128xf32>
    %186 = arith.negf %185 : vector<8x128xf32>
    %187 = math.exp %186 : vector<8x128xf32>
    %cst_36 = arith.constant 1.000000e+00 : f32
    %188 = vector.broadcast %cst_36 : f32 to vector<8x128xf32>
    %189 = arith.addf %188, %187 : vector<8x128xf32>
    %190 = arith.divf %188, %189 : vector<8x128xf32>
    %191 = math.tanh %185 : vector<8x128xf32>
    %192 = vector.extract_strided_slice %190 {offsets = [0, 0], sizes = [8, 32], strides = [1, 1]} : vector<8x128xf32> to vector<8x32xf32>
    %193 = vector.extract_strided_slice %190 {offsets = [0, 32], sizes = [8, 32], strides = [1, 1]} : vector<8x128xf32> to vector<8x32xf32>
    %194 = vector.extract_strided_slice %191 {offsets = [0, 64], sizes = [8, 32], strides = [1, 1]} : vector<8x128xf32> to vector<8x32xf32>
    %195 = vector.extract_strided_slice %190 {offsets = [0, 96], sizes = [8, 32], strides = [1, 1]} : vector<8x128xf32> to vector<8x32xf32>
    %196 = arith.mulf %193, %180 : vector<8x32xf32>
    %197 = arith.mulf %192, %194 : vector<8x32xf32>
    %198 = arith.addf %196, %197 : vector<8x32xf32>
    %199 = math.tanh %198 : vector<8x32xf32>
    %200 = arith.mulf %195, %199 : vector<8x32xf32>
    %201 = tpu.concatenate %38, %56, %74, %92, %110, %128, %146, %164, %182, %200 in 0 : vector<8x32xf32>, vector<8x32xf32>, vector<8x32xf32>, vector<8x32xf32>, vector<8x32xf32>, vector<8x32xf32>, vector<8x32xf32>, vector<8x32xf32>, vector<8x32xf32>, vector<8x32xf32> -> vector<80x32xf32>
    %c0_37 = arith.constant 0 : index
    %c0_38 = arith.constant 0 : index
    %202 = vector.load %arg8[%c0_37, %c0_38] : memref<32x128xf32, #tpu.memory_space<vmem>>, vector<32x128xf32>
    %cst_39 = arith.constant dense<0.000000e+00> : vector<80x128xf32>
    %203 = tpu.matmul %201, %202, %cst_39 {dimension_numbers = #tpu.dot_dimension_numbers<[1], [0], [0], [1], [0, 0, 1, 1], [], []>} : vector<80x32xf32>, vector<32x128xf32>, vector<80x128xf32> -> vector<80x128xf32>
    %c0_40 = arith.constant 0 : index
    %c0_41 = arith.constant 0 : index
    %204 = vector.load %arg10[%c0_40, %c0_41] : memref<1x128xf32, #tpu.memory_space<vmem>>, vector<1x128xf32>
    %205 = vector.broadcast %204 : vector<1x128xf32> to vector<80x128xf32>
    %206 = arith.addf %203, %205 : vector<80x128xf32>
    %c0_42 = arith.constant 0 : index
    %c0_43 = arith.constant 0 : index
    %207 = vector.load %arg9[%c0_42, %c0_43] : memref<32x128xf32, #tpu.memory_space<vmem>>, vector<32x128xf32>
    %cst_44 = arith.constant 0.000000e+00 : f32
    %208 = vector.broadcast %cst_44 : f32 to vector<8x32xf32>
    %cst_45 = arith.constant 0.000000e+00 : f32
    %209 = vector.broadcast %cst_45 : f32 to vector<8x32xf32>
    %210 = vector.extract_strided_slice %206 {offsets = [0, 0], sizes = [8, 128], strides = [1, 1]} : vector<80x128xf32> to vector<8x128xf32>
    %cst_46 = arith.constant dense<0.000000e+00> : vector<8x128xf32>
    %211 = tpu.matmul %208, %207, %cst_46 {dimension_numbers = #tpu.dot_dimension_numbers<[1], [0], [0], [1], [0, 0, 1, 1], [], []>} : vector<8x32xf32>, vector<32x128xf32>, vector<8x128xf32> -> vector<8x128xf32>
    %212 = arith.addf %210, %211 : vector<8x128xf32>
    %213 = arith.negf %212 : vector<8x128xf32>
    %214 = math.exp %213 : vector<8x128xf32>
    %cst_47 = arith.constant 1.000000e+00 : f32
    %215 = vector.broadcast %cst_47 : f32 to vector<8x128xf32>
    %216 = arith.addf %215, %214 : vector<8x128xf32>
    %217 = arith.divf %215, %216 : vector<8x128xf32>
    %218 = math.tanh %212 : vector<8x128xf32>
    %219 = vector.extract_strided_slice %217 {offsets = [0, 0], sizes = [8, 32], strides = [1, 1]} : vector<8x128xf32> to vector<8x32xf32>
    %220 = vector.extract_strided_slice %217 {offsets = [0, 32], sizes = [8, 32], strides = [1, 1]} : vector<8x128xf32> to vector<8x32xf32>
    %221 = vector.extract_strided_slice %218 {offsets = [0, 64], sizes = [8, 32], strides = [1, 1]} : vector<8x128xf32> to vector<8x32xf32>
    %222 = vector.extract_strided_slice %217 {offsets = [0, 96], sizes = [8, 32], strides = [1, 1]} : vector<8x128xf32> to vector<8x32xf32>
    %223 = arith.mulf %220, %209 : vector<8x32xf32>
    %224 = arith.mulf %219, %221 : vector<8x32xf32>
    %225 = arith.addf %223, %224 : vector<8x32xf32>
    %226 = math.tanh %225 : vector<8x32xf32>
    %227 = arith.mulf %222, %226 : vector<8x32xf32>
    %228 = vector.extract_strided_slice %206 {offsets = [8, 0], sizes = [8, 128], strides = [1, 1]} : vector<80x128xf32> to vector<8x128xf32>
    %cst_48 = arith.constant dense<0.000000e+00> : vector<8x128xf32>
    %229 = tpu.matmul %227, %207, %cst_48 {dimension_numbers = #tpu.dot_dimension_numbers<[1], [0], [0], [1], [0, 0, 1, 1], [], []>} : vector<8x32xf32>, vector<32x128xf32>, vector<8x128xf32> -> vector<8x128xf32>
    %230 = arith.addf %228, %229 : vector<8x128xf32>
    %231 = arith.negf %230 : vector<8x128xf32>
    %232 = math.exp %231 : vector<8x128xf32>
    %cst_49 = arith.constant 1.000000e+00 : f32
    %233 = vector.broadcast %cst_49 : f32 to vector<8x128xf32>
    %234 = arith.addf %233, %232 : vector<8x128xf32>
    %235 = arith.divf %233, %234 : vector<8x128xf32>
    %236 = math.tanh %230 : vector<8x128xf32>
    %237 = vector.extract_strided_slice %235 {offsets = [0, 0], sizes = [8, 32], strides = [1, 1]} : vector<8x128xf32> to vector<8x32xf32>
    %238 = vector.extract_strided_slice %235 {offsets = [0, 32], sizes = [8, 32], strides = [1, 1]} : vector<8x128xf32> to vector<8x32xf32>
    %239 = vector.extract_strided_slice %236 {offsets = [0, 64], sizes = [8, 32], strides = [1, 1]} : vector<8x128xf32> to vector<8x32xf32>
    %240 = vector.extract_strided_slice %235 {offsets = [0, 96], sizes = [8, 32], strides = [1, 1]} : vector<8x128xf32> to vector<8x32xf32>
    %241 = arith.mulf %238, %225 : vector<8x32xf32>
    %242 = arith.mulf %237, %239 : vector<8x32xf32>
    %243 = arith.addf %241, %242 : vector<8x32xf32>
    %244 = math.tanh %243 : vector<8x32xf32>
    %245 = arith.mulf %240, %244 : vector<8x32xf32>
    %246 = vector.extract_strided_slice %206 {offsets = [16, 0], sizes = [8, 128], strides = [1, 1]} : vector<80x128xf32> to vector<8x128xf32>
    %cst_50 = arith.constant dense<0.000000e+00> : vector<8x128xf32>
    %247 = tpu.matmul %245, %207, %cst_50 {dimension_numbers = #tpu.dot_dimension_numbers<[1], [0], [0], [1], [0, 0, 1, 1], [], []>} : vector<8x32xf32>, vector<32x128xf32>, vector<8x128xf32> -> vector<8x128xf32>
    %248 = arith.addf %246, %247 : vector<8x128xf32>
    %249 = arith.negf %248 : vector<8x128xf32>
    %250 = math.exp %249 : vector<8x128xf32>
    %cst_51 = arith.constant 1.000000e+00 : f32
    %251 = vector.broadcast %cst_51 : f32 to vector<8x128xf32>
    %252 = arith.addf %251, %250 : vector<8x128xf32>
    %253 = arith.divf %251, %252 : vector<8x128xf32>
    %254 = math.tanh %248 : vector<8x128xf32>
    %255 = vector.extract_strided_slice %253 {offsets = [0, 0], sizes = [8, 32], strides = [1, 1]} : vector<8x128xf32> to vector<8x32xf32>
    %256 = vector.extract_strided_slice %253 {offsets = [0, 32], sizes = [8, 32], strides = [1, 1]} : vector<8x128xf32> to vector<8x32xf32>
    %257 = vector.extract_strided_slice %254 {offsets = [0, 64], sizes = [8, 32], strides = [1, 1]} : vector<8x128xf32> to vector<8x32xf32>
    %258 = vector.extract_strided_slice %253 {offsets = [0, 96], sizes = [8, 32], strides = [1, 1]} : vector<8x128xf32> to vector<8x32xf32>
    %259 = arith.mulf %256, %243 : vector<8x32xf32>
    %260 = arith.mulf %255, %257 : vector<8x32xf32>
    %261 = arith.addf %259, %260 : vector<8x32xf32>
    %262 = math.tanh %261 : vector<8x32xf32>
    %263 = arith.mulf %258, %262 : vector<8x32xf32>
    %264 = vector.extract_strided_slice %206 {offsets = [24, 0], sizes = [8, 128], strides = [1, 1]} : vector<80x128xf32> to vector<8x128xf32>
    %cst_52 = arith.constant dense<0.000000e+00> : vector<8x128xf32>
    %265 = tpu.matmul %263, %207, %cst_52 {dimension_numbers = #tpu.dot_dimension_numbers<[1], [0], [0], [1], [0, 0, 1, 1], [], []>} : vector<8x32xf32>, vector<32x128xf32>, vector<8x128xf32> -> vector<8x128xf32>
    %266 = arith.addf %264, %265 : vector<8x128xf32>
    %267 = arith.negf %266 : vector<8x128xf32>
    %268 = math.exp %267 : vector<8x128xf32>
    %cst_53 = arith.constant 1.000000e+00 : f32
    %269 = vector.broadcast %cst_53 : f32 to vector<8x128xf32>
    %270 = arith.addf %269, %268 : vector<8x128xf32>
    %271 = arith.divf %269, %270 : vector<8x128xf32>
    %272 = math.tanh %266 : vector<8x128xf32>
    %273 = vector.extract_strided_slice %271 {offsets = [0, 0], sizes = [8, 32], strides = [1, 1]} : vector<8x128xf32> to vector<8x32xf32>
    %274 = vector.extract_strided_slice %271 {offsets = [0, 32], sizes = [8, 32], strides = [1, 1]} : vector<8x128xf32> to vector<8x32xf32>
    %275 = vector.extract_strided_slice %272 {offsets = [0, 64], sizes = [8, 32], strides = [1, 1]} : vector<8x128xf32> to vector<8x32xf32>
    %276 = vector.extract_strided_slice %271 {offsets = [0, 96], sizes = [8, 32], strides = [1, 1]} : vector<8x128xf32> to vector<8x32xf32>
    %277 = arith.mulf %274, %261 : vector<8x32xf32>
    %278 = arith.mulf %273, %275 : vector<8x32xf32>
    %279 = arith.addf %277, %278 : vector<8x32xf32>
    %280 = math.tanh %279 : vector<8x32xf32>
    %281 = arith.mulf %276, %280 : vector<8x32xf32>
    %282 = vector.extract_strided_slice %206 {offsets = [32, 0], sizes = [8, 128], strides = [1, 1]} : vector<80x128xf32> to vector<8x128xf32>
    %cst_54 = arith.constant dense<0.000000e+00> : vector<8x128xf32>
    %283 = tpu.matmul %281, %207, %cst_54 {dimension_numbers = #tpu.dot_dimension_numbers<[1], [0], [0], [1], [0, 0, 1, 1], [], []>} : vector<8x32xf32>, vector<32x128xf32>, vector<8x128xf32> -> vector<8x128xf32>
    %284 = arith.addf %282, %283 : vector<8x128xf32>
    %285 = arith.negf %284 : vector<8x128xf32>
    %286 = math.exp %285 : vector<8x128xf32>
    %cst_55 = arith.constant 1.000000e+00 : f32
    %287 = vector.broadcast %cst_55 : f32 to vector<8x128xf32>
    %288 = arith.addf %287, %286 : vector<8x128xf32>
    %289 = arith.divf %287, %288 : vector<8x128xf32>
    %290 = math.tanh %284 : vector<8x128xf32>
    %291 = vector.extract_strided_slice %289 {offsets = [0, 0], sizes = [8, 32], strides = [1, 1]} : vector<8x128xf32> to vector<8x32xf32>
    %292 = vector.extract_strided_slice %289 {offsets = [0, 32], sizes = [8, 32], strides = [1, 1]} : vector<8x128xf32> to vector<8x32xf32>
    %293 = vector.extract_strided_slice %290 {offsets = [0, 64], sizes = [8, 32], strides = [1, 1]} : vector<8x128xf32> to vector<8x32xf32>
    %294 = vector.extract_strided_slice %289 {offsets = [0, 96], sizes = [8, 32], strides = [1, 1]} : vector<8x128xf32> to vector<8x32xf32>
    %295 = arith.mulf %292, %279 : vector<8x32xf32>
    %296 = arith.mulf %291, %293 : vector<8x32xf32>
    %297 = arith.addf %295, %296 : vector<8x32xf32>
    %298 = math.tanh %297 : vector<8x32xf32>
    %299 = arith.mulf %294, %298 : vector<8x32xf32>
    %300 = vector.extract_strided_slice %206 {offsets = [40, 0], sizes = [8, 128], strides = [1, 1]} : vector<80x128xf32> to vector<8x128xf32>
    %cst_56 = arith.constant dense<0.000000e+00> : vector<8x128xf32>
    %301 = tpu.matmul %299, %207, %cst_56 {dimension_numbers = #tpu.dot_dimension_numbers<[1], [0], [0], [1], [0, 0, 1, 1], [], []>} : vector<8x32xf32>, vector<32x128xf32>, vector<8x128xf32> -> vector<8x128xf32>
    %302 = arith.addf %300, %301 : vector<8x128xf32>
    %303 = arith.negf %302 : vector<8x128xf32>
    %304 = math.exp %303 : vector<8x128xf32>
    %cst_57 = arith.constant 1.000000e+00 : f32
    %305 = vector.broadcast %cst_57 : f32 to vector<8x128xf32>
    %306 = arith.addf %305, %304 : vector<8x128xf32>
    %307 = arith.divf %305, %306 : vector<8x128xf32>
    %308 = math.tanh %302 : vector<8x128xf32>
    %309 = vector.extract_strided_slice %307 {offsets = [0, 0], sizes = [8, 32], strides = [1, 1]} : vector<8x128xf32> to vector<8x32xf32>
    %310 = vector.extract_strided_slice %307 {offsets = [0, 32], sizes = [8, 32], strides = [1, 1]} : vector<8x128xf32> to vector<8x32xf32>
    %311 = vector.extract_strided_slice %308 {offsets = [0, 64], sizes = [8, 32], strides = [1, 1]} : vector<8x128xf32> to vector<8x32xf32>
    %312 = vector.extract_strided_slice %307 {offsets = [0, 96], sizes = [8, 32], strides = [1, 1]} : vector<8x128xf32> to vector<8x32xf32>
    %313 = arith.mulf %310, %297 : vector<8x32xf32>
    %314 = arith.mulf %309, %311 : vector<8x32xf32>
    %315 = arith.addf %313, %314 : vector<8x32xf32>
    %316 = math.tanh %315 : vector<8x32xf32>
    %317 = arith.mulf %312, %316 : vector<8x32xf32>
    %318 = vector.extract_strided_slice %206 {offsets = [48, 0], sizes = [8, 128], strides = [1, 1]} : vector<80x128xf32> to vector<8x128xf32>
    %cst_58 = arith.constant dense<0.000000e+00> : vector<8x128xf32>
    %319 = tpu.matmul %317, %207, %cst_58 {dimension_numbers = #tpu.dot_dimension_numbers<[1], [0], [0], [1], [0, 0, 1, 1], [], []>} : vector<8x32xf32>, vector<32x128xf32>, vector<8x128xf32> -> vector<8x128xf32>
    %320 = arith.addf %318, %319 : vector<8x128xf32>
    %321 = arith.negf %320 : vector<8x128xf32>
    %322 = math.exp %321 : vector<8x128xf32>
    %cst_59 = arith.constant 1.000000e+00 : f32
    %323 = vector.broadcast %cst_59 : f32 to vector<8x128xf32>
    %324 = arith.addf %323, %322 : vector<8x128xf32>
    %325 = arith.divf %323, %324 : vector<8x128xf32>
    %326 = math.tanh %320 : vector<8x128xf32>
    %327 = vector.extract_strided_slice %325 {offsets = [0, 0], sizes = [8, 32], strides = [1, 1]} : vector<8x128xf32> to vector<8x32xf32>
    %328 = vector.extract_strided_slice %325 {offsets = [0, 32], sizes = [8, 32], strides = [1, 1]} : vector<8x128xf32> to vector<8x32xf32>
    %329 = vector.extract_strided_slice %326 {offsets = [0, 64], sizes = [8, 32], strides = [1, 1]} : vector<8x128xf32> to vector<8x32xf32>
    %330 = vector.extract_strided_slice %325 {offsets = [0, 96], sizes = [8, 32], strides = [1, 1]} : vector<8x128xf32> to vector<8x32xf32>
    %331 = arith.mulf %328, %315 : vector<8x32xf32>
    %332 = arith.mulf %327, %329 : vector<8x32xf32>
    %333 = arith.addf %331, %332 : vector<8x32xf32>
    %334 = math.tanh %333 : vector<8x32xf32>
    %335 = arith.mulf %330, %334 : vector<8x32xf32>
    %336 = vector.extract_strided_slice %206 {offsets = [56, 0], sizes = [8, 128], strides = [1, 1]} : vector<80x128xf32> to vector<8x128xf32>
    %cst_60 = arith.constant dense<0.000000e+00> : vector<8x128xf32>
    %337 = tpu.matmul %335, %207, %cst_60 {dimension_numbers = #tpu.dot_dimension_numbers<[1], [0], [0], [1], [0, 0, 1, 1], [], []>} : vector<8x32xf32>, vector<32x128xf32>, vector<8x128xf32> -> vector<8x128xf32>
    %338 = arith.addf %336, %337 : vector<8x128xf32>
    %339 = arith.negf %338 : vector<8x128xf32>
    %340 = math.exp %339 : vector<8x128xf32>
    %cst_61 = arith.constant 1.000000e+00 : f32
    %341 = vector.broadcast %cst_61 : f32 to vector<8x128xf32>
    %342 = arith.addf %341, %340 : vector<8x128xf32>
    %343 = arith.divf %341, %342 : vector<8x128xf32>
    %344 = math.tanh %338 : vector<8x128xf32>
    %345 = vector.extract_strided_slice %343 {offsets = [0, 0], sizes = [8, 32], strides = [1, 1]} : vector<8x128xf32> to vector<8x32xf32>
    %346 = vector.extract_strided_slice %343 {offsets = [0, 32], sizes = [8, 32], strides = [1, 1]} : vector<8x128xf32> to vector<8x32xf32>
    %347 = vector.extract_strided_slice %344 {offsets = [0, 64], sizes = [8, 32], strides = [1, 1]} : vector<8x128xf32> to vector<8x32xf32>
    %348 = vector.extract_strided_slice %343 {offsets = [0, 96], sizes = [8, 32], strides = [1, 1]} : vector<8x128xf32> to vector<8x32xf32>
    %349 = arith.mulf %346, %333 : vector<8x32xf32>
    %350 = arith.mulf %345, %347 : vector<8x32xf32>
    %351 = arith.addf %349, %350 : vector<8x32xf32>
    %352 = math.tanh %351 : vector<8x32xf32>
    %353 = arith.mulf %348, %352 : vector<8x32xf32>
    %354 = vector.extract_strided_slice %206 {offsets = [64, 0], sizes = [8, 128], strides = [1, 1]} : vector<80x128xf32> to vector<8x128xf32>
    %cst_62 = arith.constant dense<0.000000e+00> : vector<8x128xf32>
    %355 = tpu.matmul %353, %207, %cst_62 {dimension_numbers = #tpu.dot_dimension_numbers<[1], [0], [0], [1], [0, 0, 1, 1], [], []>} : vector<8x32xf32>, vector<32x128xf32>, vector<8x128xf32> -> vector<8x128xf32>
    %356 = arith.addf %354, %355 : vector<8x128xf32>
    %357 = arith.negf %356 : vector<8x128xf32>
    %358 = math.exp %357 : vector<8x128xf32>
    %cst_63 = arith.constant 1.000000e+00 : f32
    %359 = vector.broadcast %cst_63 : f32 to vector<8x128xf32>
    %360 = arith.addf %359, %358 : vector<8x128xf32>
    %361 = arith.divf %359, %360 : vector<8x128xf32>
    %362 = math.tanh %356 : vector<8x128xf32>
    %363 = vector.extract_strided_slice %361 {offsets = [0, 0], sizes = [8, 32], strides = [1, 1]} : vector<8x128xf32> to vector<8x32xf32>
    %364 = vector.extract_strided_slice %361 {offsets = [0, 32], sizes = [8, 32], strides = [1, 1]} : vector<8x128xf32> to vector<8x32xf32>
    %365 = vector.extract_strided_slice %362 {offsets = [0, 64], sizes = [8, 32], strides = [1, 1]} : vector<8x128xf32> to vector<8x32xf32>
    %366 = vector.extract_strided_slice %361 {offsets = [0, 96], sizes = [8, 32], strides = [1, 1]} : vector<8x128xf32> to vector<8x32xf32>
    %367 = arith.mulf %364, %351 : vector<8x32xf32>
    %368 = arith.mulf %363, %365 : vector<8x32xf32>
    %369 = arith.addf %367, %368 : vector<8x32xf32>
    %370 = math.tanh %369 : vector<8x32xf32>
    %371 = arith.mulf %366, %370 : vector<8x32xf32>
    %372 = vector.extract_strided_slice %206 {offsets = [72, 0], sizes = [8, 128], strides = [1, 1]} : vector<80x128xf32> to vector<8x128xf32>
    %cst_64 = arith.constant dense<0.000000e+00> : vector<8x128xf32>
    %373 = tpu.matmul %371, %207, %cst_64 {dimension_numbers = #tpu.dot_dimension_numbers<[1], [0], [0], [1], [0, 0, 1, 1], [], []>} : vector<8x32xf32>, vector<32x128xf32>, vector<8x128xf32> -> vector<8x128xf32>
    %374 = arith.addf %372, %373 : vector<8x128xf32>
    %375 = arith.negf %374 : vector<8x128xf32>
    %376 = math.exp %375 : vector<8x128xf32>
    %cst_65 = arith.constant 1.000000e+00 : f32
    %377 = vector.broadcast %cst_65 : f32 to vector<8x128xf32>
    %378 = arith.addf %377, %376 : vector<8x128xf32>
    %379 = arith.divf %377, %378 : vector<8x128xf32>
    %380 = math.tanh %374 : vector<8x128xf32>
    %381 = vector.extract_strided_slice %379 {offsets = [0, 0], sizes = [8, 32], strides = [1, 1]} : vector<8x128xf32> to vector<8x32xf32>
    %382 = vector.extract_strided_slice %379 {offsets = [0, 32], sizes = [8, 32], strides = [1, 1]} : vector<8x128xf32> to vector<8x32xf32>
    %383 = vector.extract_strided_slice %380 {offsets = [0, 64], sizes = [8, 32], strides = [1, 1]} : vector<8x128xf32> to vector<8x32xf32>
    %384 = vector.extract_strided_slice %379 {offsets = [0, 96], sizes = [8, 32], strides = [1, 1]} : vector<8x128xf32> to vector<8x32xf32>
    %385 = arith.mulf %382, %369 : vector<8x32xf32>
    %386 = arith.mulf %381, %383 : vector<8x32xf32>
    %387 = arith.addf %385, %386 : vector<8x32xf32>
    %388 = math.tanh %387 : vector<8x32xf32>
    %389 = arith.mulf %384, %388 : vector<8x32xf32>
    %390 = tpu.concatenate %227, %245, %263, %281, %299, %317, %335, %353, %371 in 0 : vector<8x32xf32>, vector<8x32xf32>, vector<8x32xf32>, vector<8x32xf32>, vector<8x32xf32>, vector<8x32xf32>, vector<8x32xf32>, vector<8x32xf32>, vector<8x32xf32> -> vector<72x32xf32>
    %c0_66 = arith.constant 0 : index
    %c0_67 = arith.constant 0 : index
    %391 = vector.load %arg11[%c0_66, %c0_67] : memref<32x3xf32, #tpu.memory_space<vmem>>, vector<32x3xf32>
    %cst_68 = arith.constant dense<0.000000e+00> : vector<72x3xf32>
    %392 = tpu.matmul %390, %391, %cst_68 {dimension_numbers = #tpu.dot_dimension_numbers<[1], [0], [0], [1], [0, 0, 1, 1], [], []>} : vector<72x32xf32>, vector<32x3xf32>, vector<72x3xf32> -> vector<72x3xf32>
    %c0_69 = arith.constant 0 : index
    %c0_70 = arith.constant 0 : index
    %393 = vector.load %arg12[%c0_69, %c0_70] : memref<1x3xf32, #tpu.memory_space<vmem>>, vector<1x3xf32>
    %394 = vector.broadcast %393 : vector<1x3xf32> to vector<72x3xf32>
    %395 = arith.addf %392, %394 : vector<72x3xf32>
    %c0_71 = arith.constant 0 : index
    %c0_72 = arith.constant 0 : index
    %396 = vector.load %arg23[%c0_71, %c0_72] : memref<72x3xf32, #tpu.memory_space<vmem>>, vector<72x3xf32>
    tpu.vector_store %arg23[%c0_71, %c0_72], %395 {strides = array<i32>} : memref<72x3xf32, #tpu.memory_space<vmem>>, vector<72x3xf32>,
    %c0_73 = arith.constant 0 : index
    %c0_74 = arith.constant 0 : index
    %397 = vector.load %arg2[%c0_73, %c0_74] : memref<64x5xf32, #tpu.memory_space<vmem>>, vector<64x5xf32>
    %cst_75 = arith.constant dense<0.000000e+00> : vector<64x16xf32>
    %398 = tpu.matmul %397, %0, %cst_75 {dimension_numbers = #tpu.dot_dimension_numbers<[1], [0], [0], [1], [0, 0, 1, 1], [], []>} : vector<64x5xf32>, vector<5x16xf32>, vector<64x16xf32> -> vector<64x16xf32>
    %399 = vector.broadcast %1 : vector<1x16xf32> to vector<64x16xf32>
    %400 = arith.addf %398, %399 : vector<64x16xf32>
    %401 = math.tanh %400 : vector<64x16xf32>
    %c0_76 = arith.constant 0 : index
    %c0_77 = arith.constant 0 : index
    %402 = vector.load %arg13[%c0_76, %c0_77] : memref<16x256xf32, #tpu.memory_space<vmem>>, vector<16x256xf32>
    %cst_78 = arith.constant dense<0.000000e+00> : vector<64x256xf32>
    %403 = tpu.matmul %401, %402, %cst_78 {dimension_numbers = #tpu.dot_dimension_numbers<[1], [0], [0], [1], [0, 0, 1, 1], [], []>} : vector<64x16xf32>, vector<16x256xf32>, vector<64x256xf32> -> vector<64x256xf32>
    %c0_79 = arith.constant 0 : index
    %c0_80 = arith.constant 0 : index
    %404 = vector.load %arg16[%c0_79, %c0_80] : memref<1x256xf32, #tpu.memory_space<vmem>>, vector<1x256xf32>
    %405 = vector.broadcast %404 : vector<1x256xf32> to vector<64x256xf32>
    %406 = arith.addf %403, %405 : vector<64x256xf32>
    %c0_81 = arith.constant 0 : index
    %c0_82 = arith.constant 0 : index
    %407 = vector.load %arg14[%c0_81, %c0_82] : memref<16x256xf32, #tpu.memory_space<vmem>>, vector<16x256xf32>
    %cst_83 = arith.constant dense<0.000000e+00> : vector<64x256xf32>
    %408 = tpu.matmul %401, %407, %cst_83 {dimension_numbers = #tpu.dot_dimension_numbers<[1], [0], [0], [1], [0, 0, 1, 1], [], []>} : vector<64x16xf32>, vector<16x256xf32>, vector<64x256xf32> -> vector<64x256xf32>
    %c0_84 = arith.constant 0 : index
    %c0_85 = arith.constant 0 : index
    %409 = vector.load %arg15[%c0_84, %c0_85] : memref<64x256xf32, #tpu.memory_space<vmem>>, vector<64x256xf32>
    %410 = tpu.concatenate %200, %389 in 1 : vector<8x32xf32>, vector<8x32xf32> -> vector<8x64xf32>
    %411 = tpu.concatenate %198, %387 in 1 : vector<8x32xf32>, vector<8x32xf32> -> vector<8x64xf32>
    %412 = vector.extract_strided_slice %406 {offsets = [0, 0], sizes = [8, 256], strides = [1, 1]} : vector<64x256xf32> to vector<8x256xf32>
    %413 = vector.extract_strided_slice %408 {offsets = [56, 0], sizes = [8, 256], strides = [1, 1]} : vector<64x256xf32> to vector<8x256xf32>
    %414 = arith.addf %412, %413 : vector<8x256xf32>
    %cst_86 = arith.constant dense<0.000000e+00> : vector<8x256xf32>
    %415 = tpu.matmul %410, %409, %cst_86 {dimension_numbers = #tpu.dot_dimension_numbers<[1], [0], [0], [1], [0, 0, 1, 1], [], []>} : vector<8x64xf32>, vector<64x256xf32>, vector<8x256xf32> -> vector<8x256xf32>
    %416 = arith.addf %414, %415 : vector<8x256xf32>
    %417 = arith.negf %416 : vector<8x256xf32>
    %418 = math.exp %417 : vector<8x256xf32>
    %cst_87 = arith.constant 1.000000e+00 : f32
    %419 = vector.broadcast %cst_87 : f32 to vector<8x256xf32>
    %420 = arith.addf %419, %418 : vector<8x256xf32>
    %421 = arith.divf %419, %420 : vector<8x256xf32>
    %422 = math.tanh %416 : vector<8x256xf32>
    %423 = vector.extract_strided_slice %421 {offsets = [0, 0], sizes = [8, 64], strides = [1, 1]} : vector<8x256xf32> to vector<8x64xf32>
    %424 = vector.extract_strided_slice %421 {offsets = [0, 64], sizes = [8, 64], strides = [1, 1]} : vector<8x256xf32> to vector<8x64xf32>
    %425 = vector.extract_strided_slice %422 {offsets = [0, 128], sizes = [8, 64], strides = [1, 1]} : vector<8x256xf32> to vector<8x64xf32>
    %426 = vector.extract_strided_slice %421 {offsets = [0, 192], sizes = [8, 64], strides = [1, 1]} : vector<8x256xf32> to vector<8x64xf32>
    %427 = arith.mulf %424, %411 : vector<8x64xf32>
    %428 = arith.mulf %423, %425 : vector<8x64xf32>
    %429 = arith.addf %427, %428 : vector<8x64xf32>
    %430 = math.tanh %429 : vector<8x64xf32>
    %431 = arith.mulf %426, %430 : vector<8x64xf32>
    %432 = vector.extract_strided_slice %431 {offsets = [0, 0], sizes = [8, 32], strides = [1, 1]} : vector<8x64xf32> to vector<8x32xf32>
    %433 = vector.extract_strided_slice %431 {offsets = [0, 32], sizes = [8, 32], strides = [1, 1]} : vector<8x64xf32> to vector<8x32xf32>
    %434 = vector.extract_strided_slice %406 {offsets = [8, 0], sizes = [8, 256], strides = [1, 1]} : vector<64x256xf32> to vector<8x256xf32>
    %435 = vector.extract_strided_slice %408 {offsets = [48, 0], sizes = [8, 256], strides = [1, 1]} : vector<64x256xf32> to vector<8x256xf32>
    %436 = arith.addf %434, %435 : vector<8x256xf32>
    %cst_88 = arith.constant dense<0.000000e+00> : vector<8x256xf32>
    %437 = tpu.matmul %431, %409, %cst_88 {dimension_numbers = #tpu.dot_dimension_numbers<[1], [0], [0], [1], [0, 0, 1, 1], [], []>} : vector<8x64xf32>, vector<64x256xf32>, vector<8x256xf32> -> vector<8x256xf32>
    %438 = arith.addf %436, %437 : vector<8x256xf32>
    %439 = arith.negf %438 : vector<8x256xf32>
    %440 = math.exp %439 : vector<8x256xf32>
    %cst_89 = arith.constant 1.000000e+00 : f32
    %441 = vector.broadcast %cst_89 : f32 to vector<8x256xf32>
    %442 = arith.addf %441, %440 : vector<8x256xf32>
    %443 = arith.divf %441, %442 : vector<8x256xf32>
    %444 = math.tanh %438 : vector<8x256xf32>
    %445 = vector.extract_strided_slice %443 {offsets = [0, 0], sizes = [8, 64], strides = [1, 1]} : vector<8x256xf32> to vector<8x64xf32>
    %446 = vector.extract_strided_slice %443 {offsets = [0, 64], sizes = [8, 64], strides = [1, 1]} : vector<8x256xf32> to vector<8x64xf32>
    %447 = vector.extract_strided_slice %444 {offsets = [0, 128], sizes = [8, 64], strides = [1, 1]} : vector<8x256xf32> to vector<8x64xf32>
    %448 = vector.extract_strided_slice %443 {offsets = [0, 192], sizes = [8, 64], strides = [1, 1]} : vector<8x256xf32> to vector<8x64xf32>
    %449 = arith.mulf %446, %429 : vector<8x64xf32>
    %450 = arith.mulf %445, %447 : vector<8x64xf32>
    %451 = arith.addf %449, %450 : vector<8x64xf32>
    %452 = math.tanh %451 : vector<8x64xf32>
    %453 = arith.mulf %448, %452 : vector<8x64xf32>
    %454 = vector.extract_strided_slice %453 {offsets = [0, 0], sizes = [8, 32], strides = [1, 1]} : vector<8x64xf32> to vector<8x32xf32>
    %455 = vector.extract_strided_slice %453 {offsets = [0, 32], sizes = [8, 32], strides = [1, 1]} : vector<8x64xf32> to vector<8x32xf32>
    %456 = vector.extract_strided_slice %406 {offsets = [16, 0], sizes = [8, 256], strides = [1, 1]} : vector<64x256xf32> to vector<8x256xf32>
    %457 = vector.extract_strided_slice %408 {offsets = [40, 0], sizes = [8, 256], strides = [1, 1]} : vector<64x256xf32> to vector<8x256xf32>
    %458 = arith.addf %456, %457 : vector<8x256xf32>
    %cst_90 = arith.constant dense<0.000000e+00> : vector<8x256xf32>
    %459 = tpu.matmul %453, %409, %cst_90 {dimension_numbers = #tpu.dot_dimension_numbers<[1], [0], [0], [1], [0, 0, 1, 1], [], []>} : vector<8x64xf32>, vector<64x256xf32>, vector<8x256xf32> -> vector<8x256xf32>
    %460 = arith.addf %458, %459 : vector<8x256xf32>
    %461 = arith.negf %460 : vector<8x256xf32>
    %462 = math.exp %461 : vector<8x256xf32>
    %cst_91 = arith.constant 1.000000e+00 : f32
    %463 = vector.broadcast %cst_91 : f32 to vector<8x256xf32>
    %464 = arith.addf %463, %462 : vector<8x256xf32>
    %465 = arith.divf %463, %464 : vector<8x256xf32>
    %466 = math.tanh %460 : vector<8x256xf32>
    %467 = vector.extract_strided_slice %465 {offsets = [0, 0], sizes = [8, 64], strides = [1, 1]} : vector<8x256xf32> to vector<8x64xf32>
    %468 = vector.extract_strided_slice %465 {offsets = [0, 64], sizes = [8, 64], strides = [1, 1]} : vector<8x256xf32> to vector<8x64xf32>
    %469 = vector.extract_strided_slice %466 {offsets = [0, 128], sizes = [8, 64], strides = [1, 1]} : vector<8x256xf32> to vector<8x64xf32>
    %470 = vector.extract_strided_slice %465 {offsets = [0, 192], sizes = [8, 64], strides = [1, 1]} : vector<8x256xf32> to vector<8x64xf32>
    %471 = arith.mulf %468, %451 : vector<8x64xf32>
    %472 = arith.mulf %467, %469 : vector<8x64xf32>
    %473 = arith.addf %471, %472 : vector<8x64xf32>
    %474 = math.tanh %473 : vector<8x64xf32>
    %475 = arith.mulf %470, %474 : vector<8x64xf32>
    %476 = vector.extract_strided_slice %475 {offsets = [0, 0], sizes = [8, 32], strides = [1, 1]} : vector<8x64xf32> to vector<8x32xf32>
    %477 = vector.extract_strided_slice %475 {offsets = [0, 32], sizes = [8, 32], strides = [1, 1]} : vector<8x64xf32> to vector<8x32xf32>
    %478 = vector.extract_strided_slice %406 {offsets = [24, 0], sizes = [8, 256], strides = [1, 1]} : vector<64x256xf32> to vector<8x256xf32>
    %479 = vector.extract_strided_slice %408 {offsets = [32, 0], sizes = [8, 256], strides = [1, 1]} : vector<64x256xf32> to vector<8x256xf32>
    %480 = arith.addf %478, %479 : vector<8x256xf32>
    %cst_92 = arith.constant dense<0.000000e+00> : vector<8x256xf32>
    %481 = tpu.matmul %475, %409, %cst_92 {dimension_numbers = #tpu.dot_dimension_numbers<[1], [0], [0], [1], [0, 0, 1, 1], [], []>} : vector<8x64xf32>, vector<64x256xf32>, vector<8x256xf32> -> vector<8x256xf32>
    %482 = arith.addf %480, %481 : vector<8x256xf32>
    %483 = arith.negf %482 : vector<8x256xf32>
    %484 = math.exp %483 : vector<8x256xf32>
    %cst_93 = arith.constant 1.000000e+00 : f32
    %485 = vector.broadcast %cst_93 : f32 to vector<8x256xf32>
    %486 = arith.addf %485, %484 : vector<8x256xf32>
    %487 = arith.divf %485, %486 : vector<8x256xf32>
    %488 = math.tanh %482 : vector<8x256xf32>
    %489 = vector.extract_strided_slice %487 {offsets = [0, 0], sizes = [8, 64], strides = [1, 1]} : vector<8x256xf32> to vector<8x64xf32>
    %490 = vector.extract_strided_slice %487 {offsets = [0, 64], sizes = [8, 64], strides = [1, 1]} : vector<8x256xf32> to vector<8x64xf32>
    %491 = vector.extract_strided_slice %488 {offsets = [0, 128], sizes = [8, 64], strides = [1, 1]} : vector<8x256xf32> to vector<8x64xf32>
    %492 = vector.extract_strided_slice %487 {offsets = [0, 192], sizes = [8, 64], strides = [1, 1]} : vector<8x256xf32> to vector<8x64xf32>
    %493 = arith.mulf %490, %473 : vector<8x64xf32>
    %494 = arith.mulf %489, %491 : vector<8x64xf32>
    %495 = arith.addf %493, %494 : vector<8x64xf32>
    %496 = math.tanh %495 : vector<8x64xf32>
    %497 = arith.mulf %492, %496 : vector<8x64xf32>
    %498 = vector.extract_strided_slice %497 {offsets = [0, 0], sizes = [8, 32], strides = [1, 1]} : vector<8x64xf32> to vector<8x32xf32>
    %499 = vector.extract_strided_slice %497 {offsets = [0, 32], sizes = [8, 32], strides = [1, 1]} : vector<8x64xf32> to vector<8x32xf32>
    %500 = vector.extract_strided_slice %406 {offsets = [32, 0], sizes = [8, 256], strides = [1, 1]} : vector<64x256xf32> to vector<8x256xf32>
    %501 = vector.extract_strided_slice %408 {offsets = [24, 0], sizes = [8, 256], strides = [1, 1]} : vector<64x256xf32> to vector<8x256xf32>
    %502 = arith.addf %500, %501 : vector<8x256xf32>
    %cst_94 = arith.constant dense<0.000000e+00> : vector<8x256xf32>
    %503 = tpu.matmul %497, %409, %cst_94 {dimension_numbers = #tpu.dot_dimension_numbers<[1], [0], [0], [1], [0, 0, 1, 1], [], []>} : vector<8x64xf32>, vector<64x256xf32>, vector<8x256xf32> -> vector<8x256xf32>
    %504 = arith.addf %502, %503 : vector<8x256xf32>
    %505 = arith.negf %504 : vector<8x256xf32>
    %506 = math.exp %505 : vector<8x256xf32>
    %cst_95 = arith.constant 1.000000e+00 : f32
    %507 = vector.broadcast %cst_95 : f32 to vector<8x256xf32>
    %508 = arith.addf %507, %506 : vector<8x256xf32>
    %509 = arith.divf %507, %508 : vector<8x256xf32>
    %510 = math.tanh %504 : vector<8x256xf32>
    %511 = vector.extract_strided_slice %509 {offsets = [0, 0], sizes = [8, 64], strides = [1, 1]} : vector<8x256xf32> to vector<8x64xf32>
    %512 = vector.extract_strided_slice %509 {offsets = [0, 64], sizes = [8, 64], strides = [1, 1]} : vector<8x256xf32> to vector<8x64xf32>
    %513 = vector.extract_strided_slice %510 {offsets = [0, 128], sizes = [8, 64], strides = [1, 1]} : vector<8x256xf32> to vector<8x64xf32>
    %514 = vector.extract_strided_slice %509 {offsets = [0, 192], sizes = [8, 64], strides = [1, 1]} : vector<8x256xf32> to vector<8x64xf32>
    %515 = arith.mulf %512, %495 : vector<8x64xf32>
    %516 = arith.mulf %511, %513 : vector<8x64xf32>
    %517 = arith.addf %515, %516 : vector<8x64xf32>
    %518 = math.tanh %517 : vector<8x64xf32>
    %519 = arith.mulf %514, %518 : vector<8x64xf32>
    %520 = vector.extract_strided_slice %519 {offsets = [0, 0], sizes = [8, 32], strides = [1, 1]} : vector<8x64xf32> to vector<8x32xf32>
    %521 = vector.extract_strided_slice %519 {offsets = [0, 32], sizes = [8, 32], strides = [1, 1]} : vector<8x64xf32> to vector<8x32xf32>
    %522 = vector.extract_strided_slice %406 {offsets = [40, 0], sizes = [8, 256], strides = [1, 1]} : vector<64x256xf32> to vector<8x256xf32>
    %523 = vector.extract_strided_slice %408 {offsets = [16, 0], sizes = [8, 256], strides = [1, 1]} : vector<64x256xf32> to vector<8x256xf32>
    %524 = arith.addf %522, %523 : vector<8x256xf32>
    %cst_96 = arith.constant dense<0.000000e+00> : vector<8x256xf32>
    %525 = tpu.matmul %519, %409, %cst_96 {dimension_numbers = #tpu.dot_dimension_numbers<[1], [0], [0], [1], [0, 0, 1, 1], [], []>} : vector<8x64xf32>, vector<64x256xf32>, vector<8x256xf32> -> vector<8x256xf32>
    %526 = arith.addf %524, %525 : vector<8x256xf32>
    %527 = arith.negf %526 : vector<8x256xf32>
    %528 = math.exp %527 : vector<8x256xf32>
    %cst_97 = arith.constant 1.000000e+00 : f32
    %529 = vector.broadcast %cst_97 : f32 to vector<8x256xf32>
    %530 = arith.addf %529, %528 : vector<8x256xf32>
    %531 = arith.divf %529, %530 : vector<8x256xf32>
    %532 = math.tanh %526 : vector<8x256xf32>
    %533 = vector.extract_strided_slice %531 {offsets = [0, 0], sizes = [8, 64], strides = [1, 1]} : vector<8x256xf32> to vector<8x64xf32>
    %534 = vector.extract_strided_slice %531 {offsets = [0, 64], sizes = [8, 64], strides = [1, 1]} : vector<8x256xf32> to vector<8x64xf32>
    %535 = vector.extract_strided_slice %532 {offsets = [0, 128], sizes = [8, 64], strides = [1, 1]} : vector<8x256xf32> to vector<8x64xf32>
    %536 = vector.extract_strided_slice %531 {offsets = [0, 192], sizes = [8, 64], strides = [1, 1]} : vector<8x256xf32> to vector<8x64xf32>
    %537 = arith.mulf %534, %517 : vector<8x64xf32>
    %538 = arith.mulf %533, %535 : vector<8x64xf32>
    %539 = arith.addf %537, %538 : vector<8x64xf32>
    %540 = math.tanh %539 : vector<8x64xf32>
    %541 = arith.mulf %536, %540 : vector<8x64xf32>
    %542 = vector.extract_strided_slice %541 {offsets = [0, 0], sizes = [8, 32], strides = [1, 1]} : vector<8x64xf32> to vector<8x32xf32>
    %543 = vector.extract_strided_slice %541 {offsets = [0, 32], sizes = [8, 32], strides = [1, 1]} : vector<8x64xf32> to vector<8x32xf32>
    %544 = vector.extract_strided_slice %406 {offsets = [48, 0], sizes = [8, 256], strides = [1, 1]} : vector<64x256xf32> to vector<8x256xf32>
    %545 = vector.extract_strided_slice %408 {offsets = [8, 0], sizes = [8, 256], strides = [1, 1]} : vector<64x256xf32> to vector<8x256xf32>
    %546 = arith.addf %544, %545 : vector<8x256xf32>
    %cst_98 = arith.constant dense<0.000000e+00> : vector<8x256xf32>
    %547 = tpu.matmul %541, %409, %cst_98 {dimension_numbers = #tpu.dot_dimension_numbers<[1], [0], [0], [1], [0, 0, 1, 1], [], []>} : vector<8x64xf32>, vector<64x256xf32>, vector<8x256xf32> -> vector<8x256xf32>
    %548 = arith.addf %546, %547 : vector<8x256xf32>
    %549 = arith.negf %548 : vector<8x256xf32>
    %550 = math.exp %549 : vector<8x256xf32>
    %cst_99 = arith.constant 1.000000e+00 : f32
    %551 = vector.broadcast %cst_99 : f32 to vector<8x256xf32>
    %552 = arith.addf %551, %550 : vector<8x256xf32>
    %553 = arith.divf %551, %552 : vector<8x256xf32>
    %554 = math.tanh %548 : vector<8x256xf32>
    %555 = vector.extract_strided_slice %553 {offsets = [0, 0], sizes = [8, 64], strides = [1, 1]} : vector<8x256xf32> to vector<8x64xf32>
    %556 = vector.extract_strided_slice %553 {offsets = [0, 64], sizes = [8, 64], strides = [1, 1]} : vector<8x256xf32> to vector<8x64xf32>
    %557 = vector.extract_strided_slice %554 {offsets = [0, 128], sizes = [8, 64], strides = [1, 1]} : vector<8x256xf32> to vector<8x64xf32>
    %558 = vector.extract_strided_slice %553 {offsets = [0, 192], sizes = [8, 64], strides = [1, 1]} : vector<8x256xf32> to vector<8x64xf32>
    %559 = arith.mulf %556, %539 : vector<8x64xf32>
    %560 = arith.mulf %555, %557 : vector<8x64xf32>
    %561 = arith.addf %559, %560 : vector<8x64xf32>
    %562 = math.tanh %561 : vector<8x64xf32>
    %563 = arith.mulf %558, %562 : vector<8x64xf32>
    %564 = vector.extract_strided_slice %563 {offsets = [0, 0], sizes = [8, 32], strides = [1, 1]} : vector<8x64xf32> to vector<8x32xf32>
    %565 = vector.extract_strided_slice %563 {offsets = [0, 32], sizes = [8, 32], strides = [1, 1]} : vector<8x64xf32> to vector<8x32xf32>
    %566 = vector.extract_strided_slice %406 {offsets = [56, 0], sizes = [8, 256], strides = [1, 1]} : vector<64x256xf32> to vector<8x256xf32>
    %567 = vector.extract_strided_slice %408 {offsets = [0, 0], sizes = [8, 256], strides = [1, 1]} : vector<64x256xf32> to vector<8x256xf32>
    %568 = arith.addf %566, %567 : vector<8x256xf32>
    %cst_100 = arith.constant dense<0.000000e+00> : vector<8x256xf32>
    %569 = tpu.matmul %563, %409, %cst_100 {dimension_numbers = #tpu.dot_dimension_numbers<[1], [0], [0], [1], [0, 0, 1, 1], [], []>} : vector<8x64xf32>, vector<64x256xf32>, vector<8x256xf32> -> vector<8x256xf32>
    %570 = arith.addf %568, %569 : vector<8x256xf32>
    %571 = arith.negf %570 : vector<8x256xf32>
    %572 = math.exp %571 : vector<8x256xf32>
    %cst_101 = arith.constant 1.000000e+00 : f32
    %573 = vector.broadcast %cst_101 : f32 to vector<8x256xf32>
    %574 = arith.addf %573, %572 : vector<8x256xf32>
    %575 = arith.divf %573, %574 : vector<8x256xf32>
    %576 = math.tanh %570 : vector<8x256xf32>
    %577 = vector.extract_strided_slice %575 {offsets = [0, 0], sizes = [8, 64], strides = [1, 1]} : vector<8x256xf32> to vector<8x64xf32>
    %578 = vector.extract_strided_slice %575 {offsets = [0, 64], sizes = [8, 64], strides = [1, 1]} : vector<8x256xf32> to vector<8x64xf32>
    %579 = vector.extract_strided_slice %576 {offsets = [0, 128], sizes = [8, 64], strides = [1, 1]} : vector<8x256xf32> to vector<8x64xf32>
    %580 = vector.extract_strided_slice %575 {offsets = [0, 192], sizes = [8, 64], strides = [1, 1]} : vector<8x256xf32> to vector<8x64xf32>
    %581 = arith.mulf %578, %561 : vector<8x64xf32>
    %582 = arith.mulf %577, %579 : vector<8x64xf32>
    %583 = arith.addf %581, %582 : vector<8x64xf32>
    %584 = math.tanh %583 : vector<8x64xf32>
    %585 = arith.mulf %580, %584 : vector<8x64xf32>
    %586 = vector.extract_strided_slice %585 {offsets = [0, 0], sizes = [8, 32], strides = [1, 1]} : vector<8x64xf32> to vector<8x32xf32>
    %587 = vector.extract_strided_slice %585 {offsets = [0, 32], sizes = [8, 32], strides = [1, 1]} : vector<8x64xf32> to vector<8x32xf32>
    %588 = tpu.concatenate %432, %454, %476, %498, %520, %542, %564, %586 in 0 : vector<8x32xf32>, vector<8x32xf32>, vector<8x32xf32>, vector<8x32xf32>, vector<8x32xf32>, vector<8x32xf32>, vector<8x32xf32>, vector<8x32xf32> -> vector<64x32xf32>
    %589 = tpu.concatenate %587, %565, %543, %521, %499, %477, %455, %433 in 0 : vector<8x32xf32>, vector<8x32xf32>, vector<8x32xf32>, vector<8x32xf32>, vector<8x32xf32>, vector<8x32xf32>, vector<8x32xf32>, vector<8x32xf32> -> vector<64x32xf32>
    %590 = tpu.concatenate %588, %589 in 1 : vector<64x32xf32>, vector<64x32xf32> -> vector<64x64xf32>
    %c0_102 = arith.constant 0 : index
    %c0_103 = arith.constant 0 : index
    %591 = vector.load %arg17[%c0_102, %c0_103] : memref<64x256xf32, #tpu.memory_space<vmem>>, vector<64x256xf32>
    %cst_104 = arith.constant dense<0.000000e+00> : vector<64x256xf32>
    %592 = tpu.matmul %590, %591, %cst_104 {dimension_numbers = #tpu.dot_dimension_numbers<[1], [0], [0], [1], [0, 0, 1, 1], [], []>} : vector<64x64xf32>, vector<64x256xf32>, vector<64x256xf32> -> vector<64x256xf32>
    %c0_105 = arith.constant 0 : index
    %c0_106 = arith.constant 0 : index
    %593 = vector.load %arg20[%c0_105, %c0_106] : memref<1x256xf32, #tpu.memory_space<vmem>>, vector<1x256xf32>
    %594 = vector.broadcast %593 : vector<1x256xf32> to vector<64x256xf32>
    %595 = arith.addf %592, %594 : vector<64x256xf32>
    %c0_107 = arith.constant 0 : index
    %c0_108 = arith.constant 0 : index
    %596 = vector.load %arg18[%c0_107, %c0_108] : memref<64x256xf32, #tpu.memory_space<vmem>>, vector<64x256xf32>
    %cst_109 = arith.constant dense<0.000000e+00> : vector<64x256xf32>
    %597 = tpu.matmul %590, %596, %cst_109 {dimension_numbers = #tpu.dot_dimension_numbers<[1], [0], [0], [1], [0, 0, 1, 1], [], []>} : vector<64x64xf32>, vector<64x256xf32>, vector<64x256xf32> -> vector<64x256xf32>
    %c0_110 = arith.constant 0 : index
    %c0_111 = arith.constant 0 : index
    %598 = vector.load %arg19[%c0_110, %c0_111] : memref<64x256xf32, #tpu.memory_space<vmem>>, vector<64x256xf32>
    %cst_112 = arith.constant 0.000000e+00 : f32
    %599 = vector.broadcast %cst_112 : f32 to vector<8x64xf32>
    %cst_113 = arith.constant 0.000000e+00 : f32
    %600 = vector.broadcast %cst_113 : f32 to vector<8x64xf32>
    %601 = vector.extract_strided_slice %595 {offsets = [0, 0], sizes = [8, 256], strides = [1, 1]} : vector<64x256xf32> to vector<8x256xf32>
    %602 = vector.extract_strided_slice %597 {offsets = [56, 0], sizes = [8, 256], strides = [1, 1]} : vector<64x256xf32> to vector<8x256xf32>
    %603 = arith.addf %601, %602 : vector<8x256xf32>
    %cst_114 = arith.constant dense<0.000000e+00> : vector<8x256xf32>
    %604 = tpu.matmul %599, %598, %cst_114 {dimension_numbers = #tpu.dot_dimension_numbers<[1], [0], [0], [1], [0, 0, 1, 1], [], []>} : vector<8x64xf32>, vector<64x256xf32>, vector<8x256xf32> -> vector<8x256xf32>
    %605 = arith.addf %603, %604 : vector<8x256xf32>
    %606 = arith.negf %605 : vector<8x256xf32>
    %607 = math.exp %606 : vector<8x256xf32>
    %cst_115 = arith.constant 1.000000e+00 : f32
    %608 = vector.broadcast %cst_115 : f32 to vector<8x256xf32>
    %609 = arith.addf %608, %607 : vector<8x256xf32>
    %610 = arith.divf %608, %609 : vector<8x256xf32>
    %611 = math.tanh %605 : vector<8x256xf32>
    %612 = vector.extract_strided_slice %610 {offsets = [0, 0], sizes = [8, 64], strides = [1, 1]} : vector<8x256xf32> to vector<8x64xf32>
    %613 = vector.extract_strided_slice %610 {offsets = [0, 64], sizes = [8, 64], strides = [1, 1]} : vector<8x256xf32> to vector<8x64xf32>
    %614 = vector.extract_strided_slice %611 {offsets = [0, 128], sizes = [8, 64], strides = [1, 1]} : vector<8x256xf32> to vector<8x64xf32>
    %615 = vector.extract_strided_slice %610 {offsets = [0, 192], sizes = [8, 64], strides = [1, 1]} : vector<8x256xf32> to vector<8x64xf32>
    %616 = arith.mulf %613, %600 : vector<8x64xf32>
    %617 = arith.mulf %612, %614 : vector<8x64xf32>
    %618 = arith.addf %616, %617 : vector<8x64xf32>
    %619 = math.tanh %618 : vector<8x64xf32>
    %620 = arith.mulf %615, %619 : vector<8x64xf32>
    %621 = vector.extract_strided_slice %620 {offsets = [0, 0], sizes = [8, 32], strides = [1, 1]} : vector<8x64xf32> to vector<8x32xf32>
    %622 = vector.extract_strided_slice %620 {offsets = [0, 32], sizes = [8, 32], strides = [1, 1]} : vector<8x64xf32> to vector<8x32xf32>
    %623 = vector.extract_strided_slice %595 {offsets = [8, 0], sizes = [8, 256], strides = [1, 1]} : vector<64x256xf32> to vector<8x256xf32>
    %624 = vector.extract_strided_slice %597 {offsets = [48, 0], sizes = [8, 256], strides = [1, 1]} : vector<64x256xf32> to vector<8x256xf32>
    %625 = arith.addf %623, %624 : vector<8x256xf32>
    %cst_116 = arith.constant dense<0.000000e+00> : vector<8x256xf32>
    %626 = tpu.matmul %620, %598, %cst_116 {dimension_numbers = #tpu.dot_dimension_numbers<[1], [0], [0], [1], [0, 0, 1, 1], [], []>} : vector<8x64xf32>, vector<64x256xf32>, vector<8x256xf32> -> vector<8x256xf32>
    %627 = arith.addf %625, %626 : vector<8x256xf32>
    %628 = arith.negf %627 : vector<8x256xf32>
    %629 = math.exp %628 : vector<8x256xf32>
    %cst_117 = arith.constant 1.000000e+00 : f32
    %630 = vector.broadcast %cst_117 : f32 to vector<8x256xf32>
    %631 = arith.addf %630, %629 : vector<8x256xf32>
    %632 = arith.divf %630, %631 : vector<8x256xf32>
    %633 = math.tanh %627 : vector<8x256xf32>
    %634 = vector.extract_strided_slice %632 {offsets = [0, 0], sizes = [8, 64], strides = [1, 1]} : vector<8x256xf32> to vector<8x64xf32>
    %635 = vector.extract_strided_slice %632 {offsets = [0, 64], sizes = [8, 64], strides = [1, 1]} : vector<8x256xf32> to vector<8x64xf32>
    %636 = vector.extract_strided_slice %633 {offsets = [0, 128], sizes = [8, 64], strides = [1, 1]} : vector<8x256xf32> to vector<8x64xf32>
    %637 = vector.extract_strided_slice %632 {offsets = [0, 192], sizes = [8, 64], strides = [1, 1]} : vector<8x256xf32> to vector<8x64xf32>
    %638 = arith.mulf %635, %618 : vector<8x64xf32>
    %639 = arith.mulf %634, %636 : vector<8x64xf32>
    %640 = arith.addf %638, %639 : vector<8x64xf32>
    %641 = math.tanh %640 : vector<8x64xf32>
    %642 = arith.mulf %637, %641 : vector<8x64xf32>
    %643 = vector.extract_strided_slice %642 {offsets = [0, 0], sizes = [8, 32], strides = [1, 1]} : vector<8x64xf32> to vector<8x32xf32>
    %644 = vector.extract_strided_slice %642 {offsets = [0, 32], sizes = [8, 32], strides = [1, 1]} : vector<8x64xf32> to vector<8x32xf32>
    %645 = vector.extract_strided_slice %595 {offsets = [16, 0], sizes = [8, 256], strides = [1, 1]} : vector<64x256xf32> to vector<8x256xf32>
    %646 = vector.extract_strided_slice %597 {offsets = [40, 0], sizes = [8, 256], strides = [1, 1]} : vector<64x256xf32> to vector<8x256xf32>
    %647 = arith.addf %645, %646 : vector<8x256xf32>
    %cst_118 = arith.constant dense<0.000000e+00> : vector<8x256xf32>
    %648 = tpu.matmul %642, %598, %cst_118 {dimension_numbers = #tpu.dot_dimension_numbers<[1], [0], [0], [1], [0, 0, 1, 1], [], []>} : vector<8x64xf32>, vector<64x256xf32>, vector<8x256xf32> -> vector<8x256xf32>
    %649 = arith.addf %647, %648 : vector<8x256xf32>
    %650 = arith.negf %649 : vector<8x256xf32>
    %651 = math.exp %650 : vector<8x256xf32>
    %cst_119 = arith.constant 1.000000e+00 : f32
    %652 = vector.broadcast %cst_119 : f32 to vector<8x256xf32>
    %653 = arith.addf %652, %651 : vector<8x256xf32>
    %654 = arith.divf %652, %653 : vector<8x256xf32>
    %655 = math.tanh %649 : vector<8x256xf32>
    %656 = vector.extract_strided_slice %654 {offsets = [0, 0], sizes = [8, 64], strides = [1, 1]} : vector<8x256xf32> to vector<8x64xf32>
    %657 = vector.extract_strided_slice %654 {offsets = [0, 64], sizes = [8, 64], strides = [1, 1]} : vector<8x256xf32> to vector<8x64xf32>
    %658 = vector.extract_strided_slice %655 {offsets = [0, 128], sizes = [8, 64], strides = [1, 1]} : vector<8x256xf32> to vector<8x64xf32>
    %659 = vector.extract_strided_slice %654 {offsets = [0, 192], sizes = [8, 64], strides = [1, 1]} : vector<8x256xf32> to vector<8x64xf32>
    %660 = arith.mulf %657, %640 : vector<8x64xf32>
    %661 = arith.mulf %656, %658 : vector<8x64xf32>
    %662 = arith.addf %660, %661 : vector<8x64xf32>
    %663 = math.tanh %662 : vector<8x64xf32>
    %664 = arith.mulf %659, %663 : vector<8x64xf32>
    %665 = vector.extract_strided_slice %664 {offsets = [0, 0], sizes = [8, 32], strides = [1, 1]} : vector<8x64xf32> to vector<8x32xf32>
    %666 = vector.extract_strided_slice %664 {offsets = [0, 32], sizes = [8, 32], strides = [1, 1]} : vector<8x64xf32> to vector<8x32xf32>
    %667 = vector.extract_strided_slice %595 {offsets = [24, 0], sizes = [8, 256], strides = [1, 1]} : vector<64x256xf32> to vector<8x256xf32>
    %668 = vector.extract_strided_slice %597 {offsets = [32, 0], sizes = [8, 256], strides = [1, 1]} : vector<64x256xf32> to vector<8x256xf32>
    %669 = arith.addf %667, %668 : vector<8x256xf32>
    %cst_120 = arith.constant dense<0.000000e+00> : vector<8x256xf32>
    %670 = tpu.matmul %664, %598, %cst_120 {dimension_numbers = #tpu.dot_dimension_numbers<[1], [0], [0], [1], [0, 0, 1, 1], [], []>} : vector<8x64xf32>, vector<64x256xf32>, vector<8x256xf32> -> vector<8x256xf32>
    %671 = arith.addf %669, %670 : vector<8x256xf32>
    %672 = arith.negf %671 : vector<8x256xf32>
    %673 = math.exp %672 : vector<8x256xf32>
    %cst_121 = arith.constant 1.000000e+00 : f32
    %674 = vector.broadcast %cst_121 : f32 to vector<8x256xf32>
    %675 = arith.addf %674, %673 : vector<8x256xf32>
    %676 = arith.divf %674, %675 : vector<8x256xf32>
    %677 = math.tanh %671 : vector<8x256xf32>
    %678 = vector.extract_strided_slice %676 {offsets = [0, 0], sizes = [8, 64], strides = [1, 1]} : vector<8x256xf32> to vector<8x64xf32>
    %679 = vector.extract_strided_slice %676 {offsets = [0, 64], sizes = [8, 64], strides = [1, 1]} : vector<8x256xf32> to vector<8x64xf32>
    %680 = vector.extract_strided_slice %677 {offsets = [0, 128], sizes = [8, 64], strides = [1, 1]} : vector<8x256xf32> to vector<8x64xf32>
    %681 = vector.extract_strided_slice %676 {offsets = [0, 192], sizes = [8, 64], strides = [1, 1]} : vector<8x256xf32> to vector<8x64xf32>
    %682 = arith.mulf %679, %662 : vector<8x64xf32>
    %683 = arith.mulf %678, %680 : vector<8x64xf32>
    %684 = arith.addf %682, %683 : vector<8x64xf32>
    %685 = math.tanh %684 : vector<8x64xf32>
    %686 = arith.mulf %681, %685 : vector<8x64xf32>
    %687 = vector.extract_strided_slice %686 {offsets = [0, 0], sizes = [8, 32], strides = [1, 1]} : vector<8x64xf32> to vector<8x32xf32>
    %688 = vector.extract_strided_slice %686 {offsets = [0, 32], sizes = [8, 32], strides = [1, 1]} : vector<8x64xf32> to vector<8x32xf32>
    %689 = vector.extract_strided_slice %595 {offsets = [32, 0], sizes = [8, 256], strides = [1, 1]} : vector<64x256xf32> to vector<8x256xf32>
    %690 = vector.extract_strided_slice %597 {offsets = [24, 0], sizes = [8, 256], strides = [1, 1]} : vector<64x256xf32> to vector<8x256xf32>
    %691 = arith.addf %689, %690 : vector<8x256xf32>
    %cst_122 = arith.constant dense<0.000000e+00> : vector<8x256xf32>
    %692 = tpu.matmul %686, %598, %cst_122 {dimension_numbers = #tpu.dot_dimension_numbers<[1], [0], [0], [1], [0, 0, 1, 1], [], []>} : vector<8x64xf32>, vector<64x256xf32>, vector<8x256xf32> -> vector<8x256xf32>
    %693 = arith.addf %691, %692 : vector<8x256xf32>
    %694 = arith.negf %693 : vector<8x256xf32>
    %695 = math.exp %694 : vector<8x256xf32>
    %cst_123 = arith.constant 1.000000e+00 : f32
    %696 = vector.broadcast %cst_123 : f32 to vector<8x256xf32>
    %697 = arith.addf %696, %695 : vector<8x256xf32>
    %698 = arith.divf %696, %697 : vector<8x256xf32>
    %699 = math.tanh %693 : vector<8x256xf32>
    %700 = vector.extract_strided_slice %698 {offsets = [0, 0], sizes = [8, 64], strides = [1, 1]} : vector<8x256xf32> to vector<8x64xf32>
    %701 = vector.extract_strided_slice %698 {offsets = [0, 64], sizes = [8, 64], strides = [1, 1]} : vector<8x256xf32> to vector<8x64xf32>
    %702 = vector.extract_strided_slice %699 {offsets = [0, 128], sizes = [8, 64], strides = [1, 1]} : vector<8x256xf32> to vector<8x64xf32>
    %703 = vector.extract_strided_slice %698 {offsets = [0, 192], sizes = [8, 64], strides = [1, 1]} : vector<8x256xf32> to vector<8x64xf32>
    %704 = arith.mulf %701, %684 : vector<8x64xf32>
    %705 = arith.mulf %700, %702 : vector<8x64xf32>
    %706 = arith.addf %704, %705 : vector<8x64xf32>
    %707 = math.tanh %706 : vector<8x64xf32>
    %708 = arith.mulf %703, %707 : vector<8x64xf32>
    %709 = vector.extract_strided_slice %708 {offsets = [0, 0], sizes = [8, 32], strides = [1, 1]} : vector<8x64xf32> to vector<8x32xf32>
    %710 = vector.extract_strided_slice %708 {offsets = [0, 32], sizes = [8, 32], strides = [1, 1]} : vector<8x64xf32> to vector<8x32xf32>
    %711 = vector.extract_strided_slice %595 {offsets = [40, 0], sizes = [8, 256], strides = [1, 1]} : vector<64x256xf32> to vector<8x256xf32>
    %712 = vector.extract_strided_slice %597 {offsets = [16, 0], sizes = [8, 256], strides = [1, 1]} : vector<64x256xf32> to vector<8x256xf32>
    %713 = arith.addf %711, %712 : vector<8x256xf32>
    %cst_124 = arith.constant dense<0.000000e+00> : vector<8x256xf32>
    %714 = tpu.matmul %708, %598, %cst_124 {dimension_numbers = #tpu.dot_dimension_numbers<[1], [0], [0], [1], [0, 0, 1, 1], [], []>} : vector<8x64xf32>, vector<64x256xf32>, vector<8x256xf32> -> vector<8x256xf32>
    %715 = arith.addf %713, %714 : vector<8x256xf32>
    %716 = arith.negf %715 : vector<8x256xf32>
    %717 = math.exp %716 : vector<8x256xf32>
    %cst_125 = arith.constant 1.000000e+00 : f32
    %718 = vector.broadcast %cst_125 : f32 to vector<8x256xf32>
    %719 = arith.addf %718, %717 : vector<8x256xf32>
    %720 = arith.divf %718, %719 : vector<8x256xf32>
    %721 = math.tanh %715 : vector<8x256xf32>
    %722 = vector.extract_strided_slice %720 {offsets = [0, 0], sizes = [8, 64], strides = [1, 1]} : vector<8x256xf32> to vector<8x64xf32>
    %723 = vector.extract_strided_slice %720 {offsets = [0, 64], sizes = [8, 64], strides = [1, 1]} : vector<8x256xf32> to vector<8x64xf32>
    %724 = vector.extract_strided_slice %721 {offsets = [0, 128], sizes = [8, 64], strides = [1, 1]} : vector<8x256xf32> to vector<8x64xf32>
    %725 = vector.extract_strided_slice %720 {offsets = [0, 192], sizes = [8, 64], strides = [1, 1]} : vector<8x256xf32> to vector<8x64xf32>
    %726 = arith.mulf %723, %706 : vector<8x64xf32>
    %727 = arith.mulf %722, %724 : vector<8x64xf32>
    %728 = arith.addf %726, %727 : vector<8x64xf32>
    %729 = math.tanh %728 : vector<8x64xf32>
    %730 = arith.mulf %725, %729 : vector<8x64xf32>
    %731 = vector.extract_strided_slice %730 {offsets = [0, 0], sizes = [8, 32], strides = [1, 1]} : vector<8x64xf32> to vector<8x32xf32>
    %732 = vector.extract_strided_slice %730 {offsets = [0, 32], sizes = [8, 32], strides = [1, 1]} : vector<8x64xf32> to vector<8x32xf32>
    %733 = vector.extract_strided_slice %595 {offsets = [48, 0], sizes = [8, 256], strides = [1, 1]} : vector<64x256xf32> to vector<8x256xf32>
    %734 = vector.extract_strided_slice %597 {offsets = [8, 0], sizes = [8, 256], strides = [1, 1]} : vector<64x256xf32> to vector<8x256xf32>
    %735 = arith.addf %733, %734 : vector<8x256xf32>
    %cst_126 = arith.constant dense<0.000000e+00> : vector<8x256xf32>
    %736 = tpu.matmul %730, %598, %cst_126 {dimension_numbers = #tpu.dot_dimension_numbers<[1], [0], [0], [1], [0, 0, 1, 1], [], []>} : vector<8x64xf32>, vector<64x256xf32>, vector<8x256xf32> -> vector<8x256xf32>
    %737 = arith.addf %735, %736 : vector<8x256xf32>
    %738 = arith.negf %737 : vector<8x256xf32>
    %739 = math.exp %738 : vector<8x256xf32>
    %cst_127 = arith.constant 1.000000e+00 : f32
    %740 = vector.broadcast %cst_127 : f32 to vector<8x256xf32>
    %741 = arith.addf %740, %739 : vector<8x256xf32>
    %742 = arith.divf %740, %741 : vector<8x256xf32>
    %743 = math.tanh %737 : vector<8x256xf32>
    %744 = vector.extract_strided_slice %742 {offsets = [0, 0], sizes = [8, 64], strides = [1, 1]} : vector<8x256xf32> to vector<8x64xf32>
    %745 = vector.extract_strided_slice %742 {offsets = [0, 64], sizes = [8, 64], strides = [1, 1]} : vector<8x256xf32> to vector<8x64xf32>
    %746 = vector.extract_strided_slice %743 {offsets = [0, 128], sizes = [8, 64], strides = [1, 1]} : vector<8x256xf32> to vector<8x64xf32>
    %747 = vector.extract_strided_slice %742 {offsets = [0, 192], sizes = [8, 64], strides = [1, 1]} : vector<8x256xf32> to vector<8x64xf32>
    %748 = arith.mulf %745, %728 : vector<8x64xf32>
    %749 = arith.mulf %744, %746 : vector<8x64xf32>
    %750 = arith.addf %748, %749 : vector<8x64xf32>
    %751 = math.tanh %750 : vector<8x64xf32>
    %752 = arith.mulf %747, %751 : vector<8x64xf32>
    %753 = vector.extract_strided_slice %752 {offsets = [0, 0], sizes = [8, 32], strides = [1, 1]} : vector<8x64xf32> to vector<8x32xf32>
    %754 = vector.extract_strided_slice %752 {offsets = [0, 32], sizes = [8, 32], strides = [1, 1]} : vector<8x64xf32> to vector<8x32xf32>
    %755 = vector.extract_strided_slice %595 {offsets = [56, 0], sizes = [8, 256], strides = [1, 1]} : vector<64x256xf32> to vector<8x256xf32>
    %756 = vector.extract_strided_slice %597 {offsets = [0, 0], sizes = [8, 256], strides = [1, 1]} : vector<64x256xf32> to vector<8x256xf32>
    %757 = arith.addf %755, %756 : vector<8x256xf32>
    %cst_128 = arith.constant dense<0.000000e+00> : vector<8x256xf32>
    %758 = tpu.matmul %752, %598, %cst_128 {dimension_numbers = #tpu.dot_dimension_numbers<[1], [0], [0], [1], [0, 0, 1, 1], [], []>} : vector<8x64xf32>, vector<64x256xf32>, vector<8x256xf32> -> vector<8x256xf32>
    %759 = arith.addf %757, %758 : vector<8x256xf32>
    %760 = arith.negf %759 : vector<8x256xf32>
    %761 = math.exp %760 : vector<8x256xf32>
    %cst_129 = arith.constant 1.000000e+00 : f32
    %762 = vector.broadcast %cst_129 : f32 to vector<8x256xf32>
    %763 = arith.addf %762, %761 : vector<8x256xf32>
    %764 = arith.divf %762, %763 : vector<8x256xf32>
    %765 = math.tanh %759 : vector<8x256xf32>
    %766 = vector.extract_strided_slice %764 {offsets = [0, 0], sizes = [8, 64], strides = [1, 1]} : vector<8x256xf32> to vector<8x64xf32>
    %767 = vector.extract_strided_slice %764 {offsets = [0, 64], sizes = [8, 64], strides = [1, 1]} : vector<8x256xf32> to vector<8x64xf32>
    %768 = vector.extract_strided_slice %765 {offsets = [0, 128], sizes = [8, 64], strides = [1, 1]} : vector<8x256xf32> to vector<8x64xf32>
    %769 = vector.extract_strided_slice %764 {offsets = [0, 192], sizes = [8, 64], strides = [1, 1]} : vector<8x256xf32> to vector<8x64xf32>
    %770 = arith.mulf %767, %750 : vector<8x64xf32>
    %771 = arith.mulf %766, %768 : vector<8x64xf32>
    %772 = arith.addf %770, %771 : vector<8x64xf32>
    %773 = math.tanh %772 : vector<8x64xf32>
    %774 = arith.mulf %769, %773 : vector<8x64xf32>
    %775 = vector.extract_strided_slice %774 {offsets = [0, 0], sizes = [8, 32], strides = [1, 1]} : vector<8x64xf32> to vector<8x32xf32>
    %776 = vector.extract_strided_slice %774 {offsets = [0, 32], sizes = [8, 32], strides = [1, 1]} : vector<8x64xf32> to vector<8x32xf32>
    %777 = tpu.concatenate %621, %643, %665, %687, %709, %731, %753, %775 in 0 : vector<8x32xf32>, vector<8x32xf32>, vector<8x32xf32>, vector<8x32xf32>, vector<8x32xf32>, vector<8x32xf32>, vector<8x32xf32>, vector<8x32xf32> -> vector<64x32xf32>
    %778 = tpu.concatenate %776, %754, %732, %710, %688, %666, %644, %622 in 0 : vector<8x32xf32>, vector<8x32xf32>, vector<8x32xf32>, vector<8x32xf32>, vector<8x32xf32>, vector<8x32xf32>, vector<8x32xf32>, vector<8x32xf32> -> vector<64x32xf32>
    %779 = tpu.concatenate %777, %778 in 1 : vector<64x32xf32>, vector<64x32xf32> -> vector<64x64xf32>
    %cst_130 = arith.constant 0.000000e+00 : f32
    %780 = vector.broadcast %cst_130 : f32 to vector<24x64xf32>
    %781 = tpu.concatenate %780, %779, %780 in 0 : vector<24x64xf32>, vector<64x64xf32>, vector<24x64xf32> -> vector<112x64xf32>
    %782 = vector.extract_strided_slice %781 {offsets = [0, 0], sizes = [64, 64], strides = [1, 1]} : vector<112x64xf32> to vector<64x64xf32>
    %c0_131 = arith.constant 0 : index
    %c0_132 = arith.constant 0 : index
    %783 = vector.load %arg21[%c0_131, %c0_132] : memref<448x3xf32, #tpu.memory_space<vmem>>, vector<64x3xf32>
    %cst_133 = arith.constant dense<0.000000e+00> : vector<64x3xf32>
    %784 = tpu.matmul %782, %783, %cst_133 {dimension_numbers = #tpu.dot_dimension_numbers<[1], [0], [0], [1], [0, 0, 1, 1], [], []>} : vector<64x64xf32>, vector<64x3xf32>, vector<64x3xf32> -> vector<64x3xf32>
    %785 = vector.extract_strided_slice %781 {offsets = [8, 0], sizes = [64, 64], strides = [1, 1]} : vector<112x64xf32> to vector<64x64xf32>
    %c64 = arith.constant 64 : index
    %c0_134 = arith.constant 0 : index
    %786 = vector.load %arg21[%c64, %c0_134] : memref<448x3xf32, #tpu.memory_space<vmem>>, vector<64x3xf32>
    %cst_135 = arith.constant dense<0.000000e+00> : vector<64x3xf32>
    %787 = tpu.matmul %785, %786, %cst_135 {dimension_numbers = #tpu.dot_dimension_numbers<[1], [0], [0], [1], [0, 0, 1, 1], [], []>} : vector<64x64xf32>, vector<64x3xf32>, vector<64x3xf32> -> vector<64x3xf32>
    %788 = arith.addf %784, %787 : vector<64x3xf32>
    %789 = vector.extract_strided_slice %781 {offsets = [16, 0], sizes = [64, 64], strides = [1, 1]} : vector<112x64xf32> to vector<64x64xf32>
    %c128 = arith.constant 128 : index
    %c0_136 = arith.constant 0 : index
    %790 = vector.load %arg21[%c128, %c0_136] : memref<448x3xf32, #tpu.memory_space<vmem>>, vector<64x3xf32>
    %cst_137 = arith.constant dense<0.000000e+00> : vector<64x3xf32>
    %791 = tpu.matmul %789, %790, %cst_137 {dimension_numbers = #tpu.dot_dimension_numbers<[1], [0], [0], [1], [0, 0, 1, 1], [], []>} : vector<64x64xf32>, vector<64x3xf32>, vector<64x3xf32> -> vector<64x3xf32>
    %792 = arith.addf %788, %791 : vector<64x3xf32>
    %793 = vector.extract_strided_slice %781 {offsets = [24, 0], sizes = [64, 64], strides = [1, 1]} : vector<112x64xf32> to vector<64x64xf32>
    %c192 = arith.constant 192 : index
    %c0_138 = arith.constant 0 : index
    %794 = vector.load %arg21[%c192, %c0_138] : memref<448x3xf32, #tpu.memory_space<vmem>>, vector<64x3xf32>
    %cst_139 = arith.constant dense<0.000000e+00> : vector<64x3xf32>
    %795 = tpu.matmul %793, %794, %cst_139 {dimension_numbers = #tpu.dot_dimension_numbers<[1], [0], [0], [1], [0, 0, 1, 1], [], []>} : vector<64x64xf32>, vector<64x3xf32>, vector<64x3xf32> -> vector<64x3xf32>
    %796 = arith.addf %792, %795 : vector<64x3xf32>
    %797 = vector.extract_strided_slice %781 {offsets = [32, 0], sizes = [64, 64], strides = [1, 1]} : vector<112x64xf32> to vector<64x64xf32>
    %c256 = arith.constant 256 : index
    %c0_140 = arith.constant 0 : index
    %798 = vector.load %arg21[%c256, %c0_140] : memref<448x3xf32, #tpu.memory_space<vmem>>, vector<64x3xf32>
    %cst_141 = arith.constant dense<0.000000e+00> : vector<64x3xf32>
    %799 = tpu.matmul %797, %798, %cst_141 {dimension_numbers = #tpu.dot_dimension_numbers<[1], [0], [0], [1], [0, 0, 1, 1], [], []>} : vector<64x64xf32>, vector<64x3xf32>, vector<64x3xf32> -> vector<64x3xf32>
    %800 = arith.addf %796, %799 : vector<64x3xf32>
    %801 = vector.extract_strided_slice %781 {offsets = [40, 0], sizes = [64, 64], strides = [1, 1]} : vector<112x64xf32> to vector<64x64xf32>
    %c320 = arith.constant 320 : index
    %c0_142 = arith.constant 0 : index
    %802 = vector.load %arg21[%c320, %c0_142] : memref<448x3xf32, #tpu.memory_space<vmem>>, vector<64x3xf32>
    %cst_143 = arith.constant dense<0.000000e+00> : vector<64x3xf32>
    %803 = tpu.matmul %801, %802, %cst_143 {dimension_numbers = #tpu.dot_dimension_numbers<[1], [0], [0], [1], [0, 0, 1, 1], [], []>} : vector<64x64xf32>, vector<64x3xf32>, vector<64x3xf32> -> vector<64x3xf32>
    %804 = arith.addf %800, %803 : vector<64x3xf32>
    %805 = vector.extract_strided_slice %781 {offsets = [48, 0], sizes = [64, 64], strides = [1, 1]} : vector<112x64xf32> to vector<64x64xf32>
    %c384 = arith.constant 384 : index
    %c0_144 = arith.constant 0 : index
    %806 = vector.load %arg21[%c384, %c0_144] : memref<448x3xf32, #tpu.memory_space<vmem>>, vector<64x3xf32>
    %cst_145 = arith.constant dense<0.000000e+00> : vector<64x3xf32>
    %807 = tpu.matmul %805, %806, %cst_145 {dimension_numbers = #tpu.dot_dimension_numbers<[1], [0], [0], [1], [0, 0, 1, 1], [], []>} : vector<64x64xf32>, vector<64x3xf32>, vector<64x3xf32> -> vector<64x3xf32>
    %808 = arith.addf %804, %807 : vector<64x3xf32>
    %c0_146 = arith.constant 0 : index
    %c0_147 = arith.constant 0 : index
    %809 = vector.load %arg22[%c0_146, %c0_147] : memref<1x3xf32, #tpu.memory_space<vmem>>, vector<1x3xf32>
    %810 = vector.broadcast %809 : vector<1x3xf32> to vector<64x3xf32>
    %811 = arith.addf %808, %810 : vector<64x3xf32>
    %c0_148 = arith.constant 0 : index
    %c0_149 = arith.constant 0 : index
    %812 = vector.load %arg24[%c0_148, %c0_149] : memref<64x3xf32, #tpu.memory_space<vmem>>, vector<64x3xf32>
    tpu.vector_store %arg24[%c0_148, %c0_149], %811 {strides = array<i32>} : memref<64x3xf32, #tpu.memory_space<vmem>>, vector<64x3xf32>,
    return
  }
}

</mosaic_0001>

<bundles_post_ra>
// kernel: conv_rnn_multi_forward.1
= control target key start
LH: loop header
LB: loop body
LE: loop exit
PB: predicated region body
PF: predicated region fallthrough
CT: control target
= control target key end

     0   :  { %vm125_vm0 = vcmask 1044480   ;;  %vm94_vm1 = vcmask 39936   ;;  %v7475_v6 = vmov 0.0   ;;  %vm7476_vm2 = vmmov 0   ;;  %s7478_s25 = smov 64   ;;  %s9609_s3 = inlined_call_operand.vmem [shape: f32[5,16], index: 3, kind: input, shape index: {}]   ;;  %s9610_s0 = inlined_call_operand.vmem [shape: f32[80,5], index: 0, kind: input, shape index: {}]   ;;  %s9611_s6 = inlined_call_operand.vmem [shape: f32[32,128], index: 6, kind: input, shape index: {}]   ;;  %s9612_s5 = inlined_call_operand.vmem [shape: f32[17,128], index: 5, kind: input, shape index: {}]   ;;  %s9613_s1 = inlined_call_operand.vmem [shape: f32[80,1], index: 1, kind: input, shape index: {}]   ;;  %s9614_s4 = inlined_call_operand.vmem [shape: f32[1,16], index: 4, kind: input, shape index: {}]   ;;  %s9615_s7 = inlined_call_operand.vmem [shape: f32[1,128], index: 7, kind: input, shape index: {}]   ;;  %s9616_s8 = inlined_call_operand.vmem [shape: f32[32,128], index: 8, kind: input, shape index: {}]   ;;  %s9617_s9 = inlined_call_operand.vmem [shape: f32[32,128], index: 9, kind: input, shape index: {}]   ;;  %s9618_s10 = inlined_call_operand.vmem [shape: f32[1,128], index: 10, kind: input, shape index: {}]   ;;  %s9619_s11 = inlined_call_operand.vmem [shape: f32[32,3], index: 11, kind: input, shape index: {}]   ;;  %s9620_s12 = inlined_call_operand.vmem [shape: f32[1,3], index: 12, kind: input, shape index: {}]   ;;  %s9621_s23 = inlined_call_operand.vmem [shape: f32[72,3], index: 23, kind: output, shape index: {0}]   ;;  %s9622_s2 = inlined_call_operand.vmem [shape: f32[64,5], index: 2, kind: input, shape index: {}]   ;;  %s9623_s13 = inlined_call_operand.vmem [shape: f32[16,256], index: 13, kind: input, shape index: {}]   ;;  %s9624_s14 = inlined_call_operand.vmem [shape: f32[16,256], index: 14, kind: input, shape index: {}]   ;;  %s9625_s15 = inlined_call_operand.vmem [shape: f32[64,256], index: 15, kind: input, shape index: {}]   ;;  %s9626_s16 = inlined_call_operand.vmem [shape: f32[1,256], index: 16, kind: input, shape index: {}]   ;;  %s9627_s17 = inlined_call_operand.vmem [shape: f32[64,256], index: 17, kind: input, shape index: {}]   ;;  %s9628_s18 = inlined_call_operand.vmem [shape: f32[64,256], index: 18, kind: input, shape index: {}]   ;;  %s9629_s19 = inlined_call_operand.vmem [shape: f32[64,256], index: 19, kind: input, shape index: {}]   ;;  %s9630_s20 = inlined_call_operand.vmem [shape: f32[1,256], index: 20, kind: input, shape index: {}]   ;;  %s9631_s21 = inlined_call_operand.vmem [shape: f32[448,3], index: 21, kind: input, shape index: {}]   ;;  %s9632_s22 = inlined_call_operand.vmem [shape: f32[1,3], index: 22, kind: input, shape index: {}]   ;;  %s9633_s24 = inlined_call_operand.vmem [shape: f32[64,3], index: 24, kind: output, shape index: {1}]  }
   0x1   :  { %9642 = sst [smem:[#allocation2_spill]] %s9609_s3  ;;  %v7477_v19 = vmov 0   ;;  %vm331_vm3 = vcmask 130048   ;;  %vm498_vm4 = vcmask 261120   ;;  %vm2748_vm5 = vcmask 23552  }
   0x2   :  { %9643 = sst [smem:[#allocation3_spill]] %s9610_s0  ;;  %7083 = vset.pattern.permute.xlu0 %v7477_v19  ;;  %7084 = vset.pattern.permute.xlu1 %v7477_v19  ;;  %vm3202_vm6 = vcmask 523264  }
   0x3   :  { %9644 = sst [smem:[#allocation4_spill]] %s9611_s6 }
   0x4   :  { %9645 = sst [smem:[#allocation5_spill]] %s9612_s5 }
   0x5   :  { %9646 = sst [smem:[#allocation6_spill]] %s9613_s1 }
   0x6   :  { %9647 = sst [smem:[#allocation7_spill]] %s9614_s4 }
   0x7   :  { %9648 = sst [smem:[#allocation8_spill]] %s9615_s7 }
   0x8   :  { %9649 = sst [smem:[#allocation9_spill]] %s9616_s8 }
   0x9   :  { %9650 = sst [smem:[#allocation10_spill]] %s9617_s9 }
   0xa   :  { %s9651_s27 = sld [smem:[#allocation2_spill]] }
   0xb   :  { %s9652_s6 = sld [smem:[#allocation3_spill]] }
   0xc   :  { %s9653_s26 = sld [smem:[#allocation4_spill]] }
   0xd   :  { %s9654_s9 = sld [smem:[#allocation5_spill]] }
   0xe   :  { %s9655_s28 = sld [smem:[#allocation6_spill]] }
   0xf   :  { %s9656_s7 = sld [smem:[#allocation7_spill]] }
  0x10   :  { %v76_v0 = vld [vmem:[%s9651_s27] sm:$0x1f]  ;;  %s9657_s5 = sld [smem:[#allocation8_spill]] }
  0x11   :  { %v78_v1 = vld [vmem:[%s9652_s6] sm:$0xff]  ;;  %v79_v2 = vld [vmem:[%s9652_s6 + $0x8] sm:$0xff]  ;;  %6553 = vmatprep.subr.msk.mxu0 %vm125_vm0, %v76_v0  ;;  %v80_v3 = vld [vmem:[%s9652_s6 + $0x10] sm:$0xff]  ;;  %s9658_s30 = sld [smem:[#allocation9_spill]] }
  0x12   :  { %6555 = vmatprep.mubr.msk.f32.mxu0 %vm94_vm1, %v78_v1  ;;  %6554 = vmatpush3.msk.msra.mxu0 %vm125_vm0, %v76_v0  ;;  %v81_v4 = vld [vmem:[%s9652_s6 + $0x18] sm:$0xff]  ;;  %v82_v5 = vld [vmem:[%s9652_s6 + $0x20] sm:$0xff]  ;;  %v83_v8 = vld [vmem:[%s9652_s6 + $0x28] sm:$0xff]  ;;  %s9659_s8 = sld [smem:[#allocation10_spill]] }
  0x13   :  { %6556 = vmatmul.mubr.msk.f32.vlgmr.msra.gmra.mxu0 %vm94_vm1, %v79_v2  ;;  %6589 = vmatprep.subr.mxu0 %v7475_v6  ;;  %v7634_v7 = vld [vmem:[%s9653_s26 + $0x18] sm:$0xff]  ;;  %v7644_v9 = vld [vmem:[%s9653_s26 + $0x10] sm:$0xff]  ;;  %v255_v11 = vld [vmem:[%s9654_s9 + $0x8] sm:$0xff] }
  0x14   :  { %6558 = vmatprep.mubr.msk.f32.mxu0 %vm94_vm1, %v80_v3  ;;  %6590 = vmatpush3.msra.mxu0 %v7634_v7  ;;  %v84_v10 = vld [vmem:[%s9652_s6 + $0x30] sm:$0xff]  ;;  %v254_v12 = vld [vmem:[%s9654_s9] sm:$0xff]  ;;  %v7660_v13 = vld [vmem:[%s9653_s26 + $0x8] sm:$0xff] }
  0x15   :  { %6591 = vmatprep.subr.mxu0 %v7475_v6  ;;  %6570 = vmatprep.subr.mxu1 %v255_v11  ;;  %v85_v14 = vld [vmem:[%s9652_s6 + $0x38] sm:$0xff]  ;;  %v86_v15 = vld [vmem:[%s9652_s6 + $0x40] sm:$0xff]  ;;  %v87_v16 = vld [vmem:[%s9652_s6 + $0x48] sm:$0xff] }
  0x16   :  { %6571 = vmatpush3.msra.mxu1 %v255_v11  ;;  %6592 = vmatpush3.msra.mxu0 %v7644_v9  ;;  %v7683_v17 = vld [vmem:[%s9653_s26] sm:$0xff]  ;;  %v7729_v53 = vld [vmem:[%s9654_s9 + $0x10] ss:$0 sm:$0xff]  ;;  %s7479_s9 = smov 32  }
  0x17   :  { %6559 = vmatmul.mubr.msk.f32.gmra.mxu0 %vm94_vm1, %v81_v4  ;;  %6593 = vmatprep.subr.mxu0 %v7475_v6  ;;  %v256_v18 = vld [vmem:[%s9655_s28] sm:$0xff] }
  0x18   :  { %6561 = vmatprep.mubr.msk.f32.mxu0 %vm94_vm1, %v82_v5  ;;  %6572 = vmatprep.subr.mxu1 %v254_v12  ;;  %v6066_v20 = vld [vmem:[%s9656_s7] ss:$0 sm:$0xff] }
  0x19   :  { %6594 = vmatpush3.msra.mxu0 %v7660_v13  ;;  %6573 = vmatpush3.msra.mxu1 %v254_v12  ;;  %v7735_v58 = vld [vmem:[%s9657_s5] ss:$0 sm:$0xff]  ;;  %v257_v12 = vld [vmem:[%s9655_s28 + $0x8] sm:$0xff] }
  0x1a   :  { %6595 = vmatprep.subr.mxu0 %v7475_v6  ;;  %6600 = vmatprep.subr.mxu1 %v7475_v6 }
  0x1b   :  { %6562 = vmatmul.mubr.msk.f32.gmra.mxu0 %vm94_vm1, %v83_v8  ;;  %269 = vperm.xlu0 %7083, %v256_v18  }
  0x1c   :  { %6564 = vmatprep.mubr.msk.f32.mxu0 %vm94_vm1, %v84_v10  ;;  %6596 = vmatpush3.msra.mxu0 %v7683_v17 }
  0x1d   :  { %6611 = vmatprep.subr.mxu0 %v7475_v6 }
  0x1f   :  { %6565 = vmatmul.mubr.msk.f32.gmra.mxu0 %vm94_vm1, %v85_v14 }
  0x20   :  { %6567 = vmatprep.mubr.msk.f32.mxu0 %vm94_vm1, %v86_v15 }
  0x23   :  { %6568 = vmatmul.mubr.msk.f32.gmra.mxu0 %vm94_vm1, %v87_v16 }
  0x24   :  { %6597 = vmatprep.mubr.msk.f32.mxu0 %vm7476_vm2, %v7475_v6 }
  0x27   :  { %6598 = vmatmul.mubr.f32.vlgmr.msra.gmra.mxu0 %v7475_v6 }
  0x28   :  { %6619 = vmatprep.mubr.msk.f32.mxu0 %vm7476_vm2, %v7475_v6  ;;  %6612 = vmatpush3.msra.mxu0 %v7634_v7 }
  0x29   :  { %6613 = vmatprep.subr.mxu0 %v7475_v6 }
  0x2a   :  { %6614 = vmatpush3.msra.mxu0 %v7644_v9 }
  0x2b   :  { %6615 = vmatprep.subr.mxu0 %v7475_v6 }
  0x2c   :  { %6616 = vmatpush3.msra.mxu0 %v7660_v13 }
  0x2d   :  { %6617 = vmatprep.subr.mxu0 %v7475_v6 }
  0x2e   :  { %6618 = vmatpush3.msra.mxu0 %v7683_v17 }
  0x2f   :  { %6633 = vmatprep.subr.mxu0 %v7475_v6 }
  0x96   :  { %v270_v54 = vpop.permute.xlu0 %269 }
  0x97   :  { %v321_v55 = vmul.f32 %v7729_v53, %v270_v54 }
  0xd3   :  { %v6557_v21 = vpop.f32.mrf.mxu0 }
  0xd4   :  { %v201_v22 = vadd.f32 %v6557_v21, %v6066_v20 }
  0xd5   :  { %v195_v23 = vpop.f32.mrf.mxu0 }
  0xd6   :  { %v196_v24 = vadd.f32 %v6066_v20, %v195_v23 }
  0xd7   :  { %v6560_v27 = vpop.f32.mrf.mxu0 }
  0xd8   :  { %7085 = vtanh.f32 %v196_v24  ;;  %v211_v28 = vadd.f32 %v6560_v27, %v6066_v20 }
  0xd9   :  { %7087 = vtanh.f32 %v201_v22  ;;  %v205_v29 = vpop.f32.mrf.mxu0 }
  0xda   :  { %v206_v30 = vadd.f32 %v6066_v20, %v205_v29  ;;  %7089 = vtanh.f32 %v211_v28 }
  0xdb   :  { %v6563_v31 = vpop.f32.mrf.mxu0 }
  0xdc   :  { %7091 = vtanh.f32 %v206_v30  ;;  %v221_v32 = vadd.f32 %v6563_v31, %v6066_v20 }
  0xdd   :  { %v215_v33 = vpop.f32.mrf.mxu0 }
  0xde   :  { %v216_v34 = vadd.f32 %v6066_v20, %v215_v33  ;;  %7093 = vtanh.f32 %v221_v32 }
  0xdf   :  { %v6566_v35 = vpop.f32.mrf.mxu0 }
  0xe0   :  { %7095 = vtanh.f32 %v216_v34  ;;  %v231_v36 = vadd.f32 %v6566_v35, %v6066_v20 }
  0xe1   :  { %v225_v37 = vpop.f32.mrf.mxu0 }
  0xe2   :  { %v226_v38 = vadd.f32 %v6066_v20, %v225_v37  ;;  %7097 = vtanh.f32 %v231_v36 }
  0xe3   :  { %v6569_v39 = vpop.f32.mrf.mxu0 }
  0xe4   :  { %7099 = vtanh.f32 %v226_v38  ;;  %v241_v40 = vadd.f32 %v6569_v39, %v6066_v20 }
  0xe5   :  { %v7086_v25 = vpop.eup %7085  ;;  %v235_v41 = vpop.f32.mrf.mxu0 }
  0xe6   :  { %v7088_v26 = vpop.eup %7087  ;;  %6574 = vmatprep.mubr.msk.f32.mxu1 %vm331_vm3, %v7086_v25  ;;  %v236_v42 = vadd.f32 %v6066_v20, %v235_v41  ;;  %7101 = vtanh.f32 %v241_v40 }
  0xe7   :  { %6575 = vmatmul.mubr.msk.f32.vlgmr.msra.gmra.mxu1 %vm331_vm3, %v7088_v26  ;;  %v7090_v43 = vpop.eup %7089  ;;  %v568_v45 = vpop.f32.mrf.mxu0 }
  0xe8   :  { %6601 = vmatpush3.msra.mxu1 %v7634_v7  ;;  %7103 = vtanh.f32 %v236_v42 }
  0xe9   :  { %6602 = vmatprep.subr.mxu1 %v7475_v6  ;;  %v7092_v44 = vpop.eup %7091  ;;  %v6599_v47 = vpop.f32.mrf.mxu0 }
  0xea   :  { %6603 = vmatpush3.msra.mxu1 %v7644_v9  ;;  %6577 = vmatprep.mubr.msk.f32.mxu1 %vm331_vm3, %v7092_v44  ;;  %v258_v44 = vld [vmem:[%s9655_s28 + $0x10] sm:$0xff] }
  0xeb   :  { %6604 = vmatprep.subr.mxu1 %v7475_v6  ;;  %6578 = vmatmul.mubr.msk.f32.gmra.mxu1 %vm331_vm3, %v7090_v43  ;;  %v7094_v46 = vpop.eup %7093 }
  0xec   :  { %6605 = vmatpush3.msra.mxu1 %v7660_v13 }
  0xed   :  { %6606 = vmatprep.subr.mxu1 %v7475_v6  ;;  %v7096_v48 = vpop.eup %7095 }
  0xee   :  { %6607 = vmatpush3.msra.mxu1 %v7683_v17  ;;  %6580 = vmatprep.mubr.msk.f32.mxu1 %vm331_vm3, %v7096_v48 }
  0xef   :  { %6622 = vmatprep.subr.mxu1 %v7475_v6  ;;  %6581 = vmatmul.mubr.msk.f32.gmra.mxu1 %vm331_vm3, %v7094_v46  ;;  %v7098_v49 = vpop.eup %7097 }
  0xf1   :  { %v7100_v50 = vpop.eup %7099 }
  0xf2   :  { %6583 = vmatprep.mubr.msk.f32.mxu1 %vm331_vm3, %v7100_v50 }
  0xf3   :  { %6584 = vmatmul.mubr.msk.f32.gmra.mxu1 %vm331_vm3, %v7098_v49  ;;  %v7102_v51 = vpop.eup %7101 }
  0xf5   :  { %v7104_v52 = vpop.eup %7103 }
  0xf6   :  { %6586 = vmatprep.mubr.msk.f32.mxu1 %vm331_vm3, %v7104_v52 }
  0xf7   :  { %6587 = vmatmul.mubr.msk.f32.gmra.mxu1 %vm331_vm3, %v7102_v51 }
  0xf8   :  { %6608 = vmatprep.mubr.msk.f32.mxu1 %vm7476_vm2, %v7475_v6 }
 0x1a7   :  { %v6576_v56 = vpop.f32.mrf.mxu1 }
 0x1a9   :  { %v428_v57 = vpop.f32.mrf.mxu1 }
 0x1aa   :  { %v429_v59 = vadd.f32 %v428_v57, %v321_v55 }
 0x1ab   :  { %v7759_v18 = vpop.f32.mrf.mxu1 }
 0x1ac   :  { %v484_v60 = vadd.f32 %v7735_v58, %v429_v59 }
 0x1ad   :  { %v438_v19 = vpop.f32.mrf.mxu1 }
 0x1ae   :  { %v572_v61 = vadd.f32 %v568_v45, %v484_v60 }
 0x1af   :  { %v7761_v20 = vpop.f32.mrf.mxu1 }
 0x1b0   :  { %7105 = vtanh.f32 %v572_v61  ;;  %v6090_v63 = vmul.f32 -1.442695, %v572_v61 }
 0x1b1   :  { %v7763_v21 = vpop.f32.mrf.mxu1 }
 0x1b2   :  { %7107 = vpow2.f32 %v6090_v63 }
 0x1b3   :  { %v7765_v22 = vpop.f32.mrf.mxu1 }
 0x1b5   :  { %v7767_v24 = vpop.f32.mrf.mxu1 }
 0x1b7   :  { %v7770_v26 = vpop.f32.mrf.mxu1 }
 0x1b9   :  { %v7772_v28 = vpop.f32.mrf.mxu1 }
 0x1bd   :  { %v7106_v62 = vpop.eup %7105 }
 0x1be   :  { %582 = vrot.lane.b32.xlu0 %v7106_v62, %s7478_s25 }
 0x1bf   :  { %v7108_v0 = vpop.eup %7107 }
 0x1c0   :  { %v576_v1 = vadd.f32 1.0, %v7108_v0 }
 0x1c2   :  { %7109 = vrcp.f32 %v576_v1 }
 0x1cf   :  { %v7110_v2 = vpop.eup %7109 }
 0x1d0   :  { %v580_v5 = vmul.f32 0.0, %v7110_v2 }
 0x230   :  { %v583_v3 = vpop.permute.xlu0 %582 }
 0x231   :  { %v585_v4 = vmul.f32 %v7110_v2, %v583_v3 }
 0x233   :  { %587 = vrot.lane.b32.xlu1 %v585_v4, %s7479_s9  ;;  %v259_v4 = vld [vmem:[%s9655_s28 + $0x18] sm:$0xff] }
 0x2a5   :  { %v588_v8 = vpop.permute.xlu1 %587 }
 0x2a6   :  { %v590_v10 = vadd.f32 %v588_v8, %v580_v5 }
 0x2a8   :  { %7111 = vtanh.f32 %v590_v10 }
 0x2b5   :  { %v7112_v11 = vpop.eup %7111 }
 0x2b6   :  { %593 = vrot.lane.b32.xlu1 %v7112_v11, %s7478_s25 }
 0x2ba   :  { %274 = vperm.xlu1 %7084, %v257_v12  }
 0x328   :  { %v594_v14 = vpop.permute.xlu1 %593 }
 0x329   :  { %v596_v15 = vmul.f32 %v7110_v2, %v594_v14 }
 0x32b   :  { %598 = vrot.lane.b32.xlu0 %v596_v15, %s7479_s9 }
 0x335   :  { %v275_v23 = vpop.permute.xlu1 %274 }
 0x336   :  { %v322_v25 = vmul.f32 %v7729_v53, %v275_v23 }
 0x338   :  { %v434_v27 = vadd.f32 %v6576_v56, %v322_v25 }
 0x33a   :  { %v485_v29 = vadd.f32 %v7735_v58, %v434_v27 }
 0x39d   :  { %v7745_v16 = vpop.permute.xlu0 %598 }
 0x39e   :  { %6609 = vmatmul.mubr.msk.f32.vlgmr.msra.gmra.mxu1 %vm498_vm4, %v7745_v16 }
 0x39f   :  { %6623 = vmatpush3.msra.mxu1 %v7634_v7  ;;  %6630 = vmatprep.mubr.msk.f32.mxu1 %vm7476_vm2, %v7475_v6 }
 0x3a0   :  { %6624 = vmatprep.subr.mxu1 %v7475_v6 }
 0x3a1   :  { %6625 = vmatpush3.msra.mxu1 %v7644_v9 }
 0x3a2   :  { %6626 = vmatprep.subr.mxu1 %v7475_v6 }
 0x3a3   :  { %6627 = vmatpush3.msra.mxu1 %v7660_v13 }
 0x3a4   :  { %6628 = vmatprep.subr.mxu1 %v7475_v6 }
 0x3a5   :  { %6629 = vmatpush3.msra.mxu1 %v7683_v17 }
 0x3a6   :  { %6644 = vmatprep.subr.mxu1 %v7475_v6 }
 0x45e   :  { %v668_v30 = vpop.f32.mrf.mxu1 }
 0x45f   :  { %v672_v31 = vadd.f32 %v668_v30, %v485_v29 }
 0x460   :  { %v6610_v32 = vpop.f32.mrf.mxu1 }
 0x461   :  { %7113 = vtanh.f32 %v672_v31  ;;  %v6092_v34 = vmul.f32 -1.442695, %v672_v31 }
 0x463   :  { %7115 = vpow2.f32 %v6092_v34 }
 0x46e   :  { %v7114_v33 = vpop.eup %7113 }
 0x46f   :  { %682 = vrot.lane.b32.xlu0 %v7114_v33, %s7478_s25 }
 0x470   :  { %v7116_v35 = vpop.eup %7115 }
 0x471   :  { %v676_v36 = vadd.f32 1.0, %v7116_v35 }
 0x473   :  { %7117 = vrcp.f32 %v676_v36 }
 0x480   :  { %v7118_v37 = vpop.eup %7117 }
 0x481   :  { %v680_v40 = vmul.f32 %v7118_v37, %v590_v10 }
 0x4e1   :  { %v683_v38 = vpop.permute.xlu0 %682 }
 0x4e2   :  { %v685_v39 = vmul.f32 %v7118_v37, %v683_v38  ;;  %v260_v38 = vld [vmem:[%s9655_s28 + $0x20] sm:$0xff] }
 0x4e4   :  { %687 = vrot.lane.b32.xlu1 %v685_v39, %s7479_s9 }
 0x556   :  { %v688_v41 = vpop.permute.xlu1 %687 }
 0x557   :  { %v690_v42 = vadd.f32 %v688_v41, %v680_v40 }
 0x559   :  { %7119 = vtanh.f32 %v690_v42 }
 0x566   :  { %v7120_v43 = vpop.eup %7119 }
 0x567   :  { %693 = vrot.lane.b32.xlu0 %v7120_v43, %s7478_s25 }
 0x56b   :  { %279 = vperm.xlu0 %7083, %v258_v44  }
 0x5d9   :  { %v694_v45 = vpop.permute.xlu0 %693 }
 0x5da   :  { %v696_v46 = vmul.f32 %v7118_v37, %v694_v45 }
 0x5dc   :  { %698 = vrot.lane.b32.xlu1 %v696_v46, %s7479_s9 }
 0x5e6   :  { %v280_v48 = vpop.permute.xlu0 %279 }
 0x5e7   :  { %v323_v49 = vmul.f32 %v7729_v53, %v280_v48 }
 0x5e9   :  { %v439_v50 = vadd.f32 %v438_v19, %v323_v49 }
 0x5eb   :  { %v486_v51 = vadd.f32 %v7735_v58, %v439_v50 }
 0x64e   :  { %v7782_v47 = vpop.permute.xlu1 %698 }
 0x64f   :  { %6620 = vmatmul.mubr.msk.f32.vlgmr.msra.gmra.mxu0 %vm498_vm4, %v7782_v47 }
 0x650   :  { %6634 = vmatpush3.msra.mxu0 %v7634_v7  ;;  %6641 = vmatprep.mubr.msk.f32.mxu0 %vm7476_vm2, %v7475_v6 }
 0x651   :  { %6635 = vmatprep.subr.mxu0 %v7475_v6 }
 0x652   :  { %6636 = vmatpush3.msra.mxu0 %v7644_v9 }
 0x653   :  { %6637 = vmatprep.subr.mxu0 %v7475_v6 }
 0x654   :  { %6638 = vmatpush3.msra.mxu0 %v7660_v13 }
 0x655   :  { %6639 = vmatprep.subr.mxu0 %v7475_v6 }
 0x656   :  { %6640 = vmatpush3.msra.mxu0 %v7683_v17 }
 0x657   :  { %6655 = vmatprep.subr.mxu0 %v7475_v6 }
 0x70f   :  { %v768_v52 = vpop.f32.mrf.mxu0 }
 0x710   :  { %v772_v54 = vadd.f32 %v768_v52, %v486_v51 }
 0x711   :  { %v6621_v55 = vpop.f32.mrf.mxu0 }
 0x712   :  { %7121 = vtanh.f32 %v772_v54  ;;  %v6094_v57 = vmul.f32 -1.442695, %v772_v54 }
 0x714   :  { %7123 = vpow2.f32 %v6094_v57 }
 0x71f   :  { %v7122_v56 = vpop.eup %7121 }
 0x720   :  { %782 = vrot.lane.b32.xlu1 %v7122_v56, %s7478_s25 }
 0x721   :  { %v7124_v59 = vpop.eup %7123 }
 0x722   :  { %v776_v60 = vadd.f32 1.0, %v7124_v59 }
 0x724   :  { %7125 = vrcp.f32 %v776_v60 }
 0x731   :  { %v7126_v61 = vpop.eup %7125 }
 0x732   :  { %v780_v0 = vmul.f32 %v7126_v61, %v690_v42 }
 0x792   :  { %v783_v62 = vpop.permute.xlu1 %782 }
 0x793   :  { %v785_v63 = vmul.f32 %v7126_v61, %v783_v62  ;;  %v261_v62 = vld [vmem:[%s9655_s28 + $0x28] sm:$0xff] }
 0x795   :  { %787 = vrot.lane.b32.xlu0 %v785_v63, %s7479_s9 }
 0x807   :  { %v788_v1 = vpop.permute.xlu0 %787 }
 0x808   :  { %v790_v2 = vadd.f32 %v788_v1, %v780_v0 }
 0x80a   :  { %7127 = vtanh.f32 %v790_v2 }
 0x817   :  { %v7128_v3 = vpop.eup %7127 }
 0x818   :  { %793 = vrot.lane.b32.xlu1 %v7128_v3, %s7478_s25 }
 0x81c   :  { %284 = vperm.xlu1 %7084, %v259_v4  }
 0x88a   :  { %v794_v5 = vpop.permute.xlu1 %793 }
 0x88b   :  { %v796_v8 = vmul.f32 %v7126_v61, %v794_v5 }
 0x88d   :  { %798 = vrot.lane.b32.xlu0 %v796_v8, %s7479_s9 }
 0x897   :  { %v285_v11 = vpop.permute.xlu1 %284 }
 0x898   :  { %v324_v12 = vmul.f32 %v7729_v53, %v285_v11 }
 0x89a   :  { %v444_v14 = vadd.f32 %v7759_v18, %v324_v12 }
 0x89c   :  { %v487_v15 = vadd.f32 %v7735_v58, %v444_v14 }
 0x8ff   :  { %v7805_v10 = vpop.permute.xlu0 %798 }
 0x900   :  { %6631 = vmatmul.mubr.msk.f32.vlgmr.msra.gmra.mxu1 %vm498_vm4, %v7805_v10 }
 0x901   :  { %6645 = vmatpush3.msra.mxu1 %v7634_v7  ;;  %6652 = vmatprep.mubr.msk.f32.mxu1 %vm7476_vm2, %v7475_v6 }
 0x902   :  { %6646 = vmatprep.subr.mxu1 %v7475_v6 }
 0x903   :  { %6647 = vmatpush3.msra.mxu1 %v7644_v9 }
 0x904   :  { %6648 = vmatprep.subr.mxu1 %v7475_v6 }
 0x905   :  { %6649 = vmatpush3.msra.mxu1 %v7660_v13 }
 0x906   :  { %6650 = vmatprep.subr.mxu1 %v7475_v6 }
 0x907   :  { %6651 = vmatpush3.msra.mxu1 %v7683_v17 }
 0x908   :  { %6666 = vmatprep.subr.mxu1 %v7475_v6 }
 0x9c0   :  { %v868_v19 = vpop.f32.mrf.mxu1 }
 0x9c1   :  { %v872_v23 = vadd.f32 %v868_v19, %v487_v15 }
 0x9c2   :  { %v6632_v25 = vpop.f32.mrf.mxu1 }
 0x9c3   :  { %7129 = vtanh.f32 %v872_v23  ;;  %v6096_v29 = vmul.f32 -1.442695, %v872_v23 }
 0x9c5   :  { %7131 = vpow2.f32 %v6096_v29 }
 0x9d0   :  { %v7130_v27 = vpop.eup %7129 }
 0x9d1   :  { %882 = vrot.lane.b32.xlu0 %v7130_v27, %s7478_s25 }
 0x9d2   :  { %v7132_v30 = vpop.eup %7131 }
 0x9d3   :  { %v876_v31 = vadd.f32 1.0, %v7132_v30 }
 0x9d5   :  { %7133 = vrcp.f32 %v876_v31 }
 0x9e2   :  { %v7134_v32 = vpop.eup %7133 }
 0x9e3   :  { %v880_v18 = vmul.f32 %v7134_v32, %v790_v2 }
 0xa43   :  { %v883_v33 = vpop.permute.xlu0 %882 }
 0xa44   :  { %v885_v34 = vmul.f32 %v7134_v32, %v883_v33  ;;  %v262_v33 = vld [vmem:[%s9655_s28 + $0x30] sm:$0xff] }
 0xa46   :  { %887 = vrot.lane.b32.xlu1 %v885_v34, %s7479_s9 }
 0xab8   :  { %v888_v35 = vpop.permute.xlu1 %887 }
 0xab9   :  { %v890_v36 = vadd.f32 %v888_v35, %v880_v18 }
 0xabb   :  { %7135 = vtanh.f32 %v890_v36 }
 0xac8   :  { %v7136_v37 = vpop.eup %7135 }
 0xac9   :  { %893 = vrot.lane.b32.xlu0 %v7136_v37, %s7478_s25 }
 0xacd   :  { %289 = vperm.xlu0 %7083, %v260_v38  }
 0xb3b   :  { %v894_v39 = vpop.permute.xlu0 %893 }
 0xb3c   :  { %v896_v40 = vmul.f32 %v7134_v32, %v894_v39 }
 0xb3e   :  { %898 = vrot.lane.b32.xlu1 %v896_v40, %s7479_s9 }
 0xb48   :  { %v290_v42 = vpop.permute.xlu0 %289 }
 0xb49   :  { %v325_v43 = vmul.f32 %v7729_v53, %v290_v42 }
 0xb4b   :  { %v449_v44 = vadd.f32 %v7763_v21, %v325_v43 }
 0xb4d   :  { %v488_v45 = vadd.f32 %v7735_v58, %v449_v44 }
 0xbb0   :  { %v7829_v41 = vpop.permute.xlu1 %898 }
 0xbb1   :  { %6642 = vmatmul.mubr.msk.f32.vlgmr.msra.gmra.mxu0 %vm498_vm4, %v7829_v41 }
 0xbb2   :  { %6656 = vmatpush3.msra.mxu0 %v7634_v7  ;;  %6663 = vmatprep.mubr.msk.f32.mxu0 %vm7476_vm2, %v7475_v6 }
 0xbb3   :  { %6657 = vmatprep.subr.mxu0 %v7475_v6 }
 0xbb4   :  { %6658 = vmatpush3.msra.mxu0 %v7644_v9 }
 0xbb5   :  { %6659 = vmatprep.subr.mxu0 %v7475_v6 }
 0xbb6   :  { %6660 = vmatpush3.msra.mxu0 %v7660_v13 }
 0xbb7   :  { %6661 = vmatprep.subr.mxu0 %v7475_v6 }
 0xbb8   :  { %6662 = vmatpush3.msra.mxu0 %v7683_v17 }
 0xbb9   :  { %6677 = vmatprep.subr.mxu0 %v7475_v6 }
 0xc71   :  { %v968_v46 = vpop.f32.mrf.mxu0 }
 0xc72   :  { %v972_v48 = vadd.f32 %v968_v46, %v488_v45 }
 0xc73   :  { %v6643_v49 = vpop.f32.mrf.mxu0 }
 0xc74   :  { %7137 = vtanh.f32 %v972_v48  ;;  %v6098_v51 = vmul.f32 -1.442695, %v972_v48 }
 0xc76   :  { %7139 = vpow2.f32 %v6098_v51 }
 0xc81   :  { %v7138_v50 = vpop.eup %7137 }
 0xc82   :  { %982 = vrot.lane.b32.xlu1 %v7138_v50, %s7478_s25 }
 0xc83   :  { %v7140_v52 = vpop.eup %7139 }
 0xc84   :  { %v976_v54 = vadd.f32 1.0, %v7140_v52 }
 0xc86   :  { %7141 = vrcp.f32 %v976_v54 }
 0xc93   :  { %v7142_v55 = vpop.eup %7141 }
 0xc94   :  { %v980_v21 = vmul.f32 %v7142_v55, %v890_v36 }
 0xcf4   :  { %v983_v56 = vpop.permute.xlu1 %982 }
 0xcf5   :  { %v985_v57 = vmul.f32 %v7142_v55, %v983_v56  ;;  %v263_v56 = vld [vmem:[%s9655_s28 + $0x38] sm:$0xff] }
 0xcf7   :  { %987 = vrot.lane.b32.xlu0 %v985_v57, %s7479_s9 }
 0xd69   :  { %v988_v59 = vpop.permute.xlu0 %987 }
 0xd6a   :  { %v990_v60 = vadd.f32 %v988_v59, %v980_v21 }
 0xd6c   :  { %7143 = vtanh.f32 %v990_v60 }
 0xd79   :  { %v7144_v61 = vpop.eup %7143 }
 0xd7a   :  { %993 = vrot.lane.b32.xlu1 %v7144_v61, %s7478_s25 }
 0xd7e   :  { %294 = vperm.xlu1 %7084, %v261_v62  }
 0xdec   :  { %v994_v63 = vpop.permute.xlu1 %993 }
 0xded   :  { %v996_v0 = vmul.f32 %v7142_v55, %v994_v63 }
 0xdef   :  { %998 = vrot.lane.b32.xlu0 %v996_v0, %s7479_s9 }
 0xdf9   :  { %v295_v2 = vpop.permute.xlu1 %294 }
 0xdfa   :  { %v326_v3 = vmul.f32 %v7729_v53, %v295_v2 }
 0xdfc   :  { %v454_v4 = vadd.f32 %v7761_v20, %v326_v3 }
 0xdfe   :  { %v489_v5 = vadd.f32 %v7735_v58, %v454_v4 }
 0xe61   :  { %v7853_v1 = vpop.permute.xlu0 %998 }
 0xe62   :  { %6653 = vmatmul.mubr.msk.f32.vlgmr.msra.gmra.mxu1 %vm498_vm4, %v7853_v1 }
 0xe63   :  { %6667 = vmatpush3.msra.mxu1 %v7634_v7  ;;  %6674 = vmatprep.mubr.msk.f32.mxu1 %vm7476_vm2, %v7475_v6 }
 0xe64   :  { %6668 = vmatprep.subr.mxu1 %v7475_v6 }
 0xe65   :  { %6669 = vmatpush3.msra.mxu1 %v7644_v9 }
 0xe66   :  { %6670 = vmatprep.subr.mxu1 %v7475_v6 }
 0xe67   :  { %6671 = vmatpush3.msra.mxu1 %v7660_v13 }
 0xe68   :  { %6672 = vmatprep.subr.mxu1 %v7475_v6 }
 0xe69   :  { %6673 = vmatpush3.msra.mxu1 %v7683_v17 }
 0xe6a   :  { %6688 = vmatprep.subr.mxu1 %v7475_v6 }
 0xf22   :  { %v1068_v8 = vpop.f32.mrf.mxu1 }
 0xf23   :  { %v1072_v11 = vadd.f32 %v1068_v8, %v489_v5 }
 0xf24   :  { %v6654_v12 = vpop.f32.mrf.mxu1 }
 0xf25   :  { %7145 = vtanh.f32 %v1072_v11  ;;  %v6100_v15 = vmul.f32 -1.442695, %v1072_v11 }
 0xf27   :  { %7147 = vpow2.f32 %v6100_v15  ;;  %v264_v15 = vld [vmem:[%s9655_s28 + $0x40] sm:$0xff] }
 0xf32   :  { %v7146_v14 = vpop.eup %7145 }
 0xf33   :  { %1082 = vrot.lane.b32.xlu0 %v7146_v14, %s7478_s25 }
 0xf34   :  { %v7148_v19 = vpop.eup %7147 }
 0xf35   :  { %v1076_v23 = vadd.f32 1.0, %v7148_v19  ;;  %v1500_v19 = vld [vmem:[%s9658_s30 + $0x18] sm:$0xff] }
 0xf37   :  { %7149 = vrcp.f32 %v1076_v23 }
 0xf44   :  { %v7150_v25 = vpop.eup %7149 }
 0xf45   :  { %v1080_v20 = vmul.f32 %v7150_v25, %v990_v60 }
 0xfa5   :  { %v1083_v27 = vpop.permute.xlu0 %1082 }
 0xfa6   :  { %v1085_v29 = vmul.f32 %v7150_v25, %v1083_v27 }
 0xfa8   :  { %1087 = vrot.lane.b32.xlu1 %v1085_v29, %s7479_s9  ;;  %v1499_v29 = vld [vmem:[%s9658_s30 + $0x10] sm:$0xff] }
0x101a   :  { %v1088_v30 = vpop.permute.xlu1 %1087 }
0x101b   :  { %v1090_v31 = vadd.f32 %v1088_v30, %v1080_v20  ;;  %v1498_v20 = vld [vmem:[%s9658_s30 + $0x8] sm:$0xff]  ;;  %v1497_v30 = vld [vmem:[%s9658_s30] sm:$0xff] }
0x101d   :  { %7151 = vtanh.f32 %v1090_v31 }
0x102a   :  { %v7152_v32 = vpop.eup %7151 }
0x102b   :  { %1093 = vrot.lane.b32.xlu0 %v7152_v32, %s7478_s25 }
0x102f   :  { %299 = vperm.xlu0 %7083, %v262_v33  }
0x109d   :  { %v1094_v34 = vpop.permute.xlu0 %1093 }
0x109e   :  { %v1096_v18 = vmul.f32 %v7150_v25, %v1094_v34 }
0x10a0   :  { %1098 = vrot.lane.b32.xlu1 %v1096_v18, %s7479_s9 }
0x10aa   :  { %v300_v36 = vpop.permute.xlu0 %299 }
0x10ab   :  { %v327_v37 = vmul.f32 %v7729_v53, %v300_v36 }
0x10ad   :  { %v459_v38 = vadd.f32 %v7767_v24, %v327_v37 }
0x10af   :  { %v490_v39 = vadd.f32 %v7735_v58, %v459_v38 }
0x1112   :  { %v7877_v35 = vpop.permute.xlu1 %1098 }
0x1113   :  { %6664 = vmatmul.mubr.msk.f32.vlgmr.msra.gmra.mxu0 %vm498_vm4, %v7877_v35 }
0x1114   :  { %6678 = vmatpush3.msra.mxu0 %v7634_v7  ;;  %6685 = vmatprep.mubr.msk.f32.mxu0 %vm7476_vm2, %v7475_v6 }
0x1115   :  { %6679 = vmatprep.subr.mxu0 %v7475_v6 }
0x1116   :  { %6680 = vmatpush3.msra.mxu0 %v7644_v9 }
0x1117   :  { %6681 = vmatprep.subr.mxu0 %v7475_v6 }
0x1118   :  { %6682 = vmatpush3.msra.mxu0 %v7660_v13 }
0x1119   :  { %6683 = vmatprep.subr.mxu0 %v7475_v6 }
0x111a   :  { %6684 = vmatpush3.msra.mxu0 %v7683_v17 }
0x111b   :  { %6699 = vmatprep.subr.mxu0 %v1500_v19 }
0x11d3   :  { %v1168_v40 = vpop.f32.mrf.mxu0 }
0x11d4   :  { %v1172_v42 = vadd.f32 %v1168_v40, %v490_v39 }
0x11d5   :  { %v6665_v43 = vpop.f32.mrf.mxu0 }
0x11d6   :  { %7153 = vtanh.f32 %v1172_v42  ;;  %v6102_v45 = vmul.f32 -1.442695, %v1172_v42  ;;  %v7965_v43 = vld [vmem:[%s9659_s8 + $0x18] sm:$0xff] }
0x11d8   :  { %7155 = vpow2.f32 %v6102_v45  ;;  %v7978_v45 = vld [vmem:[%s9659_s8 + $0x8] sm:$0xff] }
0x11e3   :  { %v7154_v44 = vpop.eup %7153 }
0x11e4   :  { %1182 = vrot.lane.b32.xlu1 %v7154_v44, %s7478_s25  ;;  %v7971_v44 = vld [vmem:[%s9659_s8 + $0x10] sm:$0xff] }
0x11e5   :  { %v7156_v46 = vpop.eup %7155 }
0x11e6   :  { %v1176_v48 = vadd.f32 1.0, %v7156_v46  ;;  %v7985_v46 = vld [vmem:[%s9659_s8] sm:$0xff] }
0x11e8   :  { %7157 = vrcp.f32 %v1176_v48 }
0x11f5   :  { %v7158_v49 = vpop.eup %7157 }
0x11f6   :  { %v1180_v24 = vmul.f32 %v7158_v49, %v1090_v31 }
0x1256   :  { %v1183_v50 = vpop.permute.xlu1 %1182 }
0x1257   :  { %v1185_v51 = vmul.f32 %v7158_v49, %v1183_v50 }
0x1259   :  { %1187 = vrot.lane.b32.xlu0 %v1185_v51, %s7479_s9 }
0x12cb   :  { %v1188_v52 = vpop.permute.xlu0 %1187 }
0x12cc   :  { %v1190_v54 = vadd.f32 %v1188_v52, %v1180_v24 }
0x12ce   :  { %7159 = vtanh.f32 %v1190_v54 }
0x12db   :  { %v7160_v55 = vpop.eup %7159 }
0x12dc   :  { %1193 = vrot.lane.b32.xlu1 %v7160_v55, %s7478_s25  ;;  %v8019_v55 = vld [vmem:[%s9618_s10] ss:$0 sm:$0xff] }
0x12e0   :  { %304 = vperm.xlu1 %7084, %v263_v56  }
0x134e   :  { %v1194_v57 = vpop.permute.xlu1 %1193 }
0x134f   :  { %v1196_v21 = vmul.f32 %v7158_v49, %v1194_v57 }
0x1351   :  { %1198 = vrot.lane.b32.xlu0 %v1196_v21, %s7479_s9 }
0x135b   :  { %v305_v60 = vpop.permute.xlu1 %304 }
0x13c3   :  { %v7900_v59 = vpop.permute.xlu0 %1198 }
0x13c4   :  { %6675 = vmatmul.mubr.msk.f32.vlgmr.msra.gmra.mxu1 %vm498_vm4, %v7900_v59 }
0x13c5   :  { %6689 = vmatpush3.msra.mxu1 %v7634_v7  ;;  %6696 = vmatprep.mubr.msk.f32.mxu1 %vm7476_vm2, %v7475_v6  ;;  %v328_v7 = vmul.f32 %v7729_v53, %v305_v60 }
0x13c6   :  { %6690 = vmatprep.subr.mxu1 %v7475_v6 }
0x13c7   :  { %6691 = vmatpush3.msra.mxu1 %v7644_v9  ;;  %v464_v61 = vadd.f32 %v7765_v22, %v328_v7 }
0x13c8   :  { %6692 = vmatprep.subr.mxu1 %v7475_v6 }
0x13c9   :  { %6693 = vmatpush3.msra.mxu1 %v7660_v13  ;;  %v491_v62 = vadd.f32 %v7735_v58, %v464_v61 }
0x13ca   :  { %6694 = vmatprep.subr.mxu1 %v7475_v6 }
0x13cb   :  { %6695 = vmatpush3.msra.mxu1 %v7683_v17 }
0x13cc   :  { %6722 = vmatprep.subr.mxu1 %v7475_v6 }
0x1484   :  { %v1268_v63 = vpop.f32.mrf.mxu1 }
0x1485   :  { %v1272_v0 = vadd.f32 %v1268_v63, %v491_v62 }
0x1486   :  { %v6676_v9 = vpop.f32.mrf.mxu1 }
0x1487   :  { %7161 = vtanh.f32 %v1272_v0  ;;  %v6104_v13 = vmul.f32 -1.442695, %v1272_v0 }
0x1489   :  { %7163 = vpow2.f32 %v6104_v13 }
0x1494   :  { %v7162_v2 = vpop.eup %7161 }
0x1495   :  { %1282 = vrot.lane.b32.xlu0 %v7162_v2, %s7478_s25 }
0x1496   :  { %v7164_v3 = vpop.eup %7163 }
0x1497   :  { %v1276_v17 = vadd.f32 1.0, %v7164_v3 }
0x1499   :  { %7165 = vrcp.f32 %v1276_v17 }
0x14a6   :  { %v7166_v4 = vpop.eup %7165 }
0x14a7   :  { %v1280_v22 = vmul.f32 %v7166_v4, %v1190_v54 }
0x1507   :  { %v1283_v5 = vpop.permute.xlu0 %1282 }
0x1508   :  { %v1285_v8 = vmul.f32 %v7166_v4, %v1283_v5 }
0x150a   :  { %1287 = vrot.lane.b32.xlu1 %v1285_v8, %s7479_s9 }
0x157c   :  { %v1288_v11 = vpop.permute.xlu1 %1287 }
0x157d   :  { %v1290_v12 = vadd.f32 %v1288_v11, %v1280_v22 }
0x157f   :  { %7167 = vtanh.f32 %v1290_v12 }
0x158c   :  { %v7168_v14 = vpop.eup %7167 }
0x158d   :  { %1293 = vrot.lane.b32.xlu0 %v7168_v14, %s7478_s25 }
0x1591   :  { %309 = vperm.xlu0 %7083, %v264_v15  }
0x15ff   :  { %v1294_v23 = vpop.permute.xlu0 %1293 }
0x1600   :  { %v1296_v25 = vmul.f32 %v7166_v4, %v1294_v23 }
0x1602   :  { %1298 = vrot.lane.b32.xlu1 %v1296_v25, %s7479_s9 }
0x1674   :  { %v1299_v27 = vpop.permute.xlu1 %1298 }
0x1675   :  { %6686 = vmatmul.mubr.msk.f32.vlgmr.msra.gmra.mxu0 %vm498_vm4, %v1299_v27 }
0x1676   :  { %6700 = vmatpush3.msra.mxu0 %v1500_v19  ;;  %6707 = vmatprep.mubr.msk.f32.mxu0 %vm498_vm4, %v7745_v16  ;;  %v310_v16 = vpop.permute.xlu0 %309 }
0x1677   :  { %6701 = vmatprep.subr.mxu0 %v1499_v29 }
0x1678   :  { %6702 = vmatpush3.msra.mxu0 %v1499_v29 }
0x1679   :  { %6703 = vmatprep.subr.mxu0 %v1498_v20 }
0x167a   :  { %6704 = vmatpush3.msra.mxu0 %v1498_v20 }
0x167b   :  { %6705 = vmatprep.subr.mxu0 %v1497_v30 }
0x167c   :  { %6706 = vmatpush3.msra.mxu0 %v1497_v30 }
0x167d   :  { %6708 = vmatmul.mubr.msk.f32.vlgmr.msra.gmra.mxu0 %vm498_vm4, %v7782_v47  ;;  %6755 = vmatprep.subr.mxu0 %v7475_v6  ;;  %v329_v47 = vmul.f32 %v7729_v53, %v310_v16 }
0x167e   :  { %6710 = vmatprep.mubr.msk.f32.mxu0 %vm498_vm4, %v7805_v10  ;;  %6756 = vmatpush3.msra.mxu0 %v7965_v43 }
0x167f   :  { %v469_v31 = vadd.f32 %v7772_v28, %v329_v47  ;;  %6757 = vmatprep.subr.mxu0 %v7475_v6 }
0x1680   :  { %6758 = vmatpush3.msra.mxu0 %v7971_v44 }
0x1681   :  { %6711 = vmatmul.mubr.msk.f32.gmra.mxu0 %vm498_vm4, %v7829_v41  ;;  %v492_v10 = vadd.f32 %v7735_v58, %v469_v31  ;;  %6759 = vmatprep.subr.mxu0 %v7475_v6 }
0x1682   :  { %6713 = vmatprep.mubr.msk.f32.mxu0 %vm498_vm4, %v7853_v1  ;;  %6760 = vmatpush3.msra.mxu0 %v7978_v45 }
0x1683   :  { %6761 = vmatprep.subr.mxu0 %v7475_v6 }
0x1684   :  { %6762 = vmatpush3.msra.mxu0 %v7985_v46 }
0x1685   :  { %6714 = vmatmul.mubr.msk.f32.gmra.mxu0 %vm498_vm4, %v7877_v35  ;;  %6777 = vmatprep.subr.mxu0 %v7475_v6 }
0x1686   :  { %6716 = vmatprep.mubr.msk.f32.mxu0 %vm498_vm4, %v7900_v59 }
0x1689   :  { %6717 = vmatmul.mubr.msk.f32.gmra.mxu0 %vm498_vm4, %v1299_v27 }
0x1735   :  { %v1368_v32 = vpop.f32.mrf.mxu0 }
0x1736   :  { %v1372_v41 = vadd.f32 %v1368_v32, %v492_v10  ;;  %v265_v10 = vld [vmem:[%s9655_s28 + $0x48] sm:$0xff] }
0x1737   :  { %v6687_v33 = vpop.f32.mrf.mxu0 }
0x1738   :  { %7169 = vtanh.f32 %v1372_v41  ;;  %v6106_v34 = vmul.f32 -1.442695, %v1372_v41 }
0x173a   :  { %7171 = vpow2.f32 %v6106_v34 }
0x173d   :  { %v6709_v51 = vpop.f32.mrf.mxu0 }
0x173e   :  { %v1585_v22 = vadd.f32 %v6709_v51, %v8019_v55 }
0x173f   :  { %v1579_v54 = vpop.f32.mrf.mxu0 }
0x1740   :  { %v1580_v56 = vadd.f32 %v8019_v55, %v1579_v54 }
0x1741   :  { %v6712_v51 = vpop.f32.mrf.mxu0 }
0x1745   :  { %v7170_v1 = vpop.eup %7169 }
0x1746   :  { %1382 = vrot.lane.b32.xlu1 %v7170_v1, %s7478_s25 }
0x1747   :  { %v7172_v18 = vpop.eup %7171 }
0x1748   :  { %v1376_v35 = vadd.f32 1.0, %v7172_v18 }
0x174a   :  { %7173 = vrcp.f32 %v1376_v35 }
0x1757   :  { %v7174_v36 = vpop.eup %7173 }
0x1758   :  { %v1380_v28 = vmul.f32 %v7174_v36, %v1290_v12 }
0x17b8   :  { %v1383_v37 = vpop.permute.xlu1 %1382 }
0x17b9   :  { %v1385_v38 = vmul.f32 %v7174_v36, %v1383_v37 }
0x17bb   :  { %1387 = vrot.lane.b32.xlu0 %v1385_v38, %s7479_s9 }
0x182d   :  { %v1388_v39 = vpop.permute.xlu0 %1387 }
0x182e   :  { %v7958_v40 = vadd.f32 %v1388_v39, %v1380_v28 }
0x1830   :  { %7175 = vtanh.f32 %v7958_v40 }
0x183d   :  { %v7176_v42 = vpop.eup %7175 }
0x183e   :  { %1393 = vrot.lane.b32.xlu1 %v7176_v42, %s7478_s25 }
0x18b0   :  { %v1394_v48 = vpop.permute.xlu1 %1393 }
0x18b1   :  { %v1396_v49 = vmul.f32 %v7174_v36, %v1394_v48 }
0x18b3   :  { %1398 = vrot.lane.b32.xlu0 %v1396_v49, %s7479_s9 }
0x1925   :  { %v1399_v50 = vpop.permute.xlu0 %1398 }
0x1926   :  { %6697 = vmatmul.mubr.msk.f32.vlgmr.msra.gmra.mxu1 %vm498_vm4, %v1399_v50  ;;  %6719 = vmatprep.mubr.msk.f32.mxu0 %vm498_vm4, %v1399_v50 }
0x1927   :  { %6723 = vmatpush3.msra.mxu1 %v7965_v43  ;;  %6730 = vmatprep.mubr.msk.f32.mxu1 %vm7476_vm2, %v7475_v6 }
0x1928   :  { %6724 = vmatprep.subr.mxu1 %v7475_v6 }
0x1929   :  { %6725 = vmatpush3.msra.mxu1 %v7971_v44 }
0x192a   :  { %6726 = vmatprep.subr.mxu1 %v7475_v6 }
0x192b   :  { %6727 = vmatpush3.msra.mxu1 %v7978_v45 }
0x192c   :  { %6728 = vmatprep.subr.mxu1 %v7475_v6 }
0x192d   :  { %6729 = vmatpush3.msra.mxu1 %v7985_v46 }
0x192e   :  { %6731 = vmatmul.mubr.f32.vlgmr.msra.gmra.mxu1 %v7475_v6  ;;  %6733 = vmatprep.subr.mxu1 %v7475_v6 }
0x192f   :  { %6734 = vmatpush3.msra.mxu1 %v7965_v43  ;;  %6741 = vmatprep.mubr.msk.f32.mxu1 %vm7476_vm2, %v7475_v6 }
0x1930   :  { %6735 = vmatprep.subr.mxu1 %v7475_v6 }
0x1931   :  { %6736 = vmatpush3.msra.mxu1 %v7971_v44 }
0x1932   :  { %6737 = vmatprep.subr.mxu1 %v7475_v6 }
0x1933   :  { %6738 = vmatpush3.msra.mxu1 %v7978_v45 }
0x1934   :  { %6739 = vmatprep.subr.mxu1 %v7475_v6 }
0x1935   :  { %6740 = vmatpush3.msra.mxu1 %v7985_v46 }
0x1936   :  { %6744 = vmatprep.subr.mxu1 %v7475_v6 }
0x19e6   :  { %v8014_v24 = vpop.f32.mrf.mxu1 }
0x19e8   :  { %v6698_v52 = vpop.f32.mrf.mxu1 }
0x19ee   :  { %v1698_v57 = vpop.f32.mrf.mxu1 }
0x19ef   :  { %v1702_v21 = vadd.f32 %v1698_v57, %v1580_v56 }
0x19f0   :  { %v6732_v59 = vpop.f32.mrf.mxu1 }
0x19f1   :  { %7177 = vtanh.f32 %v1702_v21  ;;  %v6120_v7 = vmul.f32 -1.442695, %v1702_v21 }
0x19f3   :  { %7179 = vpow2.f32 %v6120_v7 }
0x19fe   :  { %v7178_v60 = vpop.eup %7177 }
0x19ff   :  { %1712 = vrot.lane.b32.xlu1 %v7178_v60, %s7478_s25 }
0x1a00   :  { %v7180_v61 = vpop.eup %7179 }
0x1a01   :  { %v1706_v62 = vadd.f32 1.0, %v7180_v61 }
0x1a03   :  { %7181 = vrcp.f32 %v1706_v62 }
0x1a10   :  { %v7182_v63 = vpop.eup %7181 }
0x1a11   :  { %v1710_v2 = vmul.f32 0.0, %v7182_v63 }
0x1a71   :  { %v1713_v0 = vpop.permute.xlu1 %1712 }
0x1a72   :  { %v1715_v9 = vmul.f32 %v7182_v63, %v1713_v0 }
0x1a74   :  { %1717 = vrot.lane.b32.xlu0 %v1715_v9, %s7479_s9 }
0x1ae6   :  { %v1718_v13 = vpop.permute.xlu0 %1717 }
0x1ae7   :  { %v1720_v3 = vadd.f32 %v1718_v13, %v1710_v2 }
0x1ae9   :  { %7183 = vtanh.f32 %v1720_v3 }
0x1af6   :  { %v7184_v17 = vpop.eup %7183 }
0x1af7   :  { %1723 = vrot.lane.b32.xlu1 %v7184_v17, %s7478_s25 }
0x1b69   :  { %v1724_v4 = vpop.permute.xlu1 %1723 }
0x1b6a   :  { %v1726_v5 = vmul.f32 %v7182_v63, %v1724_v4 }
0x1b6c   :  { %1728 = vrot.lane.b32.xlu0 %v1726_v5, %s7479_s9 }
0x1bde   :  { %v8026_v8 = vpop.permute.xlu0 %1728 }
0x1bdf   :  { %6742 = vmatmul.mubr.msk.f32.vlgmr.msra.gmra.mxu1 %vm498_vm4, %v8026_v8 }
0x1be0   :  { %6745 = vmatpush3.msra.mxu1 %v7965_v43  ;;  %6752 = vmatprep.mubr.msk.f32.mxu1 %vm7476_vm2, %v7475_v6 }
0x1be1   :  { %6746 = vmatprep.subr.mxu1 %v7475_v6 }
0x1be2   :  { %6747 = vmatpush3.msra.mxu1 %v7971_v44 }
0x1be3   :  { %6748 = vmatprep.subr.mxu1 %v7475_v6 }
0x1be4   :  { %6749 = vmatpush3.msra.mxu1 %v7978_v45 }
0x1be5   :  { %6750 = vmatprep.subr.mxu1 %v7475_v6 }
0x1be6   :  { %6751 = vmatpush3.msra.mxu1 %v7985_v46 }
0x1be7   :  { %6766 = vmatprep.subr.mxu1 %v7475_v6 }
0x1c9f   :  { %v1798_v11 = vpop.f32.mrf.mxu1 }
0x1ca0   :  { %v1802_v12 = vadd.f32 %v1798_v11, %v1585_v22 }
0x1ca1   :  { %v6743_v14 = vpop.f32.mrf.mxu1 }
0x1ca2   :  { %7185 = vtanh.f32 %v1802_v12  ;;  %v6122_v19 = vmul.f32 -1.442695, %v1802_v12 }
0x1ca4   :  { %7187 = vpow2.f32 %v6122_v19 }
0x1caf   :  { %v7186_v15 = vpop.eup %7185 }
0x1cb0   :  { %1812 = vrot.lane.b32.xlu1 %v7186_v15, %s7478_s25 }
0x1cb1   :  { %v7188_v23 = vpop.eup %7187 }
0x1cb2   :  { %v1806_v25 = vadd.f32 1.0, %v7188_v23 }
0x1cb4   :  { %7189 = vrcp.f32 %v1806_v25  ;;  %v1595_v25 = vadd.f32 %v6712_v51, %v8019_v55 }
0x1cc1   :  { %v7190_v27 = vpop.eup %7189 }
0x1cc2   :  { %v1810_v30 = vmul.f32 %v7190_v27, %v1720_v3 }
0x1d22   :  { %v1813_v29 = vpop.permute.xlu1 %1812 }
0x1d23   :  { %v1815_v20 = vmul.f32 %v7190_v27, %v1813_v29 }
0x1d25   :  { %1817 = vrot.lane.b32.xlu0 %v1815_v20, %s7479_s9 }
0x1d97   :  { %v1818_v16 = vpop.permute.xlu0 %1817 }
0x1d98   :  { %v8043_v47 = vadd.f32 %v1818_v16, %v1810_v30 }
0x1d9a   :  { %7191 = vtanh.f32 %v8043_v47 }
0x1da7   :  { %v7192_v31 = vpop.eup %7191 }
0x1da8   :  { %1823 = vrot.lane.b32.xlu1 %v7192_v31, %s7478_s25 }
0x1dac   :  { %314 = vperm.xlu1 %7084, %v265_v10  }
0x1e1a   :  { %v1824_v32 = vpop.permute.xlu1 %1823 }
0x1e1b   :  { %v1826_v41 = vmul.f32 %v7190_v27, %v1824_v32 }
0x1e1d   :  { %1828 = vrot.lane.b32.xlu0 %v1826_v41, %s7479_s9 }
0x1e27   :  { %v315_v33 = vpop.permute.xlu1 %314 }
0x1e28   :  { %v330_v1 = vmul.f32 %v7729_v53, %v315_v33 }
0x1e2a   :  { %v474_v34 = vadd.f32 %v7770_v26, %v330_v1 }
0x1e2c   :  { %v493_v18 = vadd.f32 %v7735_v58, %v474_v34 }
0x1e2e   :  { %v1472_v35 = vadd.f32 %v8014_v24, %v493_v18  ;;  %v1589_v24 = vpop.f32.mrf.mxu0 }
0x1e2f   :  { %v1590_v52 = vadd.f32 %v8019_v55, %v1589_v24 }
0x1e30   :  { %7193 = vtanh.f32 %v1472_v35  ;;  %v6108_v37 = vmul.f32 -1.442695, %v1472_v35  ;;  %v8103_v11 = vpop.f32.mrf.mxu0 }
0x1e32   :  { %7195 = vpow2.f32 %v6108_v37  ;;  %v1599_v12 = vpop.f32.mrf.mxu0 }
0x1e34   :  { %v8105_v14 = vpop.f32.mrf.mxu0 }
0x1e36   :  { %v8107_v15 = vpop.f32.mrf.mxu0 }
0x1e3d   :  { %v7194_v36 = vpop.eup %7193 }
0x1e3e   :  { %1482 = vrot.lane.b32.xlu0 %v7194_v36, %s7478_s25 }
0x1e3f   :  { %v7196_v53 = vpop.eup %7195 }
0x1e40   :  { %v1476_v58 = vadd.f32 1.0, %v7196_v53  ;;  %v1600_v53 = vadd.f32 %v8019_v55, %v1599_v12 }
0x1e42   :  { %7197 = vrcp.f32 %v1476_v58 }
0x1e4f   :  { %v7198_v26 = vpop.eup %7197 }
0x1e50   :  { %v1480_v42 = vmul.f32 %v7198_v26, %v7958_v40 }
0x1e8f   :  { %v8056_v38 = vpop.permute.xlu0 %1828 }
0x1e90   :  { %6753 = vmatmul.mubr.msk.f32.vlgmr.msra.gmra.mxu1 %vm498_vm4, %v8056_v38 }
0x1e91   :  { %6767 = vmatpush3.msra.mxu1 %v7965_v43  ;;  %6774 = vmatprep.mubr.msk.f32.mxu1 %vm7476_vm2, %v7475_v6 }
0x1e92   :  { %6768 = vmatprep.subr.mxu1 %v7475_v6 }
0x1e93   :  { %6769 = vmatpush3.msra.mxu1 %v7971_v44 }
0x1e94   :  { %6770 = vmatprep.subr.mxu1 %v7475_v6 }
0x1e95   :  { %6771 = vmatpush3.msra.mxu1 %v7978_v45 }
0x1e96   :  { %6772 = vmatprep.subr.mxu1 %v7475_v6 }
0x1e97   :  { %6773 = vmatpush3.msra.mxu1 %v7985_v46 }
0x1e98   :  { %6788 = vmatprep.subr.mxu1 %v7475_v6 }
0x1eb0   :  { %v1483_v28 = vpop.permute.xlu0 %1482 }
0x1eb1   :  { %v1485_v39 = vmul.f32 %v7198_v26, %v1483_v28 }
0x1eb3   :  { %1487 = vrot.lane.b32.xlu0 %v1485_v39, %s7479_s9 }
0x1f25   :  { %v1488_v48 = vpop.permute.xlu0 %1487 }
0x1f26   :  { %v8072_v49 = vadd.f32 %v1488_v48, %v1480_v42 }
0x1f28   :  { %7199 = vtanh.f32 %v8072_v49 }
0x1f35   :  { %v7200_v50 = vpop.eup %7199 }
0x1f36   :  { %1493 = vrot.lane.b32.xlu0 %v7200_v50, %s7478_s25 }
0x1f50   :  { %v1898_v54 = vpop.f32.mrf.mxu1 }
0x1f51   :  { %v1902_v56 = vadd.f32 %v1898_v54, %v1590_v52 }
0x1f52   :  { %v6754_v57 = vpop.f32.mrf.mxu1 }
0x1f53   :  { %7201 = vtanh.f32 %v1902_v56  ;;  %v6124_v60 = vmul.f32 -1.442695, %v1902_v56 }
0x1f55   :  { %7203 = vpow2.f32 %v6124_v60 }
0x1f60   :  { %v7202_v21 = vpop.eup %7201 }
0x1f61   :  { %1912 = vrot.lane.b32.xlu1 %v7202_v21, %s7478_s25 }
0x1f62   :  { %v7204_v7 = vpop.eup %7203 }
0x1f63   :  { %v1906_v61 = vadd.f32 1.0, %v7204_v7  ;;  %v1605_v7 = vadd.f32 %v8103_v11, %v8019_v55 }
0x1f65   :  { %7205 = vrcp.f32 %v1906_v61 }
0x1f72   :  { %v7206_v62 = vpop.eup %7205 }
0x1f73   :  { %v1910_v2 = vmul.f32 %v7206_v62, %v8043_v47 }
0x1fa8   :  { %v1494_v40 = vpop.permute.xlu0 %1493 }
0x1fa9   :  { %v1496_v59 = vmul.f32 %v7198_v26, %v1494_v40 }
0x1fab   :  { %1509 = vrot.lane.b32.xlu0 %v1496_v59, %s7479_s9 }
0x1fd3   :  { %v1913_v63 = vpop.permute.xlu1 %1912 }
0x1fd4   :  { %v1915_v0 = vmul.f32 %v7206_v62, %v1913_v63 }
0x1fd6   :  { %1917 = vrot.lane.b32.xlu1 %v1915_v0, %s7479_s9 }
0x201d   :  { %v8080_v9 = vpop.permute.xlu0 %1509 }
0x201e   :  { %6720 = vmatmul.mubr.msk.f32.gmra.mxu0 %vm498_vm4, %v8080_v9 }
0x201f   :  { %6763 = vmatprep.mubr.msk.f32.mxu0 %vm7476_vm2, %v7475_v6 }
0x2048   :  { %v1918_v13 = vpop.permute.xlu1 %1917 }
0x2049   :  { %v1920_v3 = vadd.f32 %v1918_v13, %v1910_v2 }
0x204b   :  { %7207 = vtanh.f32 %v1920_v3 }
0x2058   :  { %v7208_v17 = vpop.eup %7207 }
0x2059   :  { %1923 = vrot.lane.b32.xlu1 %v7208_v17, %s7478_s25 }
0x20cb   :  { %v1924_v4 = vpop.permute.xlu1 %1923 }
0x20cc   :  { %v1926_v5 = vmul.f32 %v7206_v62, %v1924_v4 }
0x20ce   :  { %1928 = vrot.lane.b32.xlu1 %v1926_v5, %s7479_s9 }
0x20de   :  { %v8109_v19 = vpop.f32.mrf.mxu0 }
0x20e0   :  { %v8111_v23 = vpop.f32.mrf.mxu0 }
0x2140   :  { %v8089_v22 = vpop.permute.xlu1 %1928 }
0x2141   :  { %6764 = vmatmul.mubr.msk.f32.vlgmr.msra.gmra.mxu0 %vm498_vm4, %v8089_v22 }
0x2142   :  { %6778 = vmatpush3.msra.mxu0 %v7965_v43  ;;  %6785 = vmatprep.mubr.msk.f32.mxu0 %vm7476_vm2, %v7475_v6 }
0x2143   :  { %6779 = vmatprep.subr.mxu0 %v7475_v6 }
0x2144   :  { %6780 = vmatpush3.msra.mxu0 %v7971_v44 }
0x2145   :  { %6781 = vmatprep.subr.mxu0 %v7475_v6 }
0x2146   :  { %6782 = vmatpush3.msra.mxu0 %v7978_v45 }
0x2147   :  { %6783 = vmatprep.subr.mxu0 %v7475_v6 }
0x2148   :  { %6784 = vmatpush3.msra.mxu0 %v7985_v46 }
0x2149   :  { %6799 = vmatprep.subr.mxu0 %v7475_v6 }
0x2201   :  { %v1998_v27 = vpop.f32.mrf.mxu0 }
0x2202   :  { %v2002_v29 = vadd.f32 %v1998_v27, %v1595_v25 }
0x2203   :  { %v6765_v20 = vpop.f32.mrf.mxu0 }
0x2204   :  { %7209 = vtanh.f32 %v2002_v29  ;;  %v6126_v16 = vmul.f32 -1.442695, %v2002_v29 }
0x2206   :  { %7211 = vpow2.f32 %v6126_v16  ;;  %v1610_v16 = vadd.f32 %v8019_v55, %v8107_v15 }
0x2211   :  { %v7210_v30 = vpop.eup %7209 }
0x2212   :  { %2012 = vrot.lane.b32.xlu0 %v7210_v30, %s7478_s25 }
0x2213   :  { %v7212_v47 = vpop.eup %7211 }
0x2214   :  { %v2006_v31 = vadd.f32 1.0, %v7212_v47 }
0x2216   :  { %7213 = vrcp.f32 %v2006_v31 }
0x2223   :  { %v7214_v10 = vpop.eup %7213 }
0x2224   :  { %v2010_v33 = vmul.f32 %v7214_v10, %v1920_v3 }
0x2284   :  { %v2013_v32 = vpop.permute.xlu0 %2012 }
0x2285   :  { %v2015_v41 = vmul.f32 %v7214_v10, %v2013_v32 }
0x2287   :  { %2017 = vrot.lane.b32.xlu1 %v2015_v41, %s7479_s9 }
0x22f9   :  { %v2018_v1 = vpop.permute.xlu1 %2017 }
0x22fa   :  { %v2020_v34 = vadd.f32 %v2018_v1, %v2010_v33 }
0x22fc   :  { %7215 = vtanh.f32 %v2020_v34 }
0x2309   :  { %v7216_v18 = vpop.eup %7215 }
0x230a   :  { %2023 = vrot.lane.b32.xlu0 %v7216_v18, %s7478_s25 }
0x237c   :  { %v2024_v35 = vpop.permute.xlu0 %2023 }
0x237d   :  { %v2026_v36 = vmul.f32 %v7214_v10, %v2024_v35 }
0x237f   :  { %2028 = vrot.lane.b32.xlu1 %v2026_v36, %s7479_s9 }
0x23f1   :  { %v8118_v37 = vpop.permute.xlu1 %2028 }
0x23f2   :  { %6775 = vmatmul.mubr.msk.f32.vlgmr.msra.gmra.mxu1 %vm498_vm4, %v8118_v37 }
0x23f3   :  { %6789 = vmatpush3.msra.mxu1 %v7965_v43  ;;  %6796 = vmatprep.mubr.msk.f32.mxu1 %vm7476_vm2, %v7475_v6 }
0x23f4   :  { %6790 = vmatprep.subr.mxu1 %v7475_v6 }
0x23f5   :  { %6791 = vmatpush3.msra.mxu1 %v7971_v44 }
0x23f6   :  { %6792 = vmatprep.subr.mxu1 %v7475_v6 }
0x23f7   :  { %6793 = vmatpush3.msra.mxu1 %v7978_v45 }
0x23f8   :  { %6794 = vmatprep.subr.mxu1 %v7475_v6 }
0x23f9   :  { %6795 = vmatpush3.msra.mxu1 %v7985_v46 }
0x23fa   :  { %6810 = vmatprep.subr.mxu1 %v7475_v6 }
0x24b2   :  { %v2098_v58 = vpop.f32.mrf.mxu1 }
0x24b3   :  { %v2102_v26 = vadd.f32 %v2098_v58, %v1600_v53 }
0x24b4   :  { %v6776_v28 = vpop.f32.mrf.mxu1 }
0x24b5   :  { %7217 = vtanh.f32 %v2102_v26  ;;  %v6128_v42 = vmul.f32 -1.442695, %v2102_v26 }
0x24b7   :  { %7219 = vpow2.f32 %v6128_v42  ;;  %v8193_v42 = vld [vmem:[%s9651_s27] sm:$0x1f] }
0x24c2   :  { %v7218_v39 = vpop.eup %7217 }
0x24c3   :  { %2112 = vrot.lane.b32.xlu0 %v7218_v39, %s7478_s25 }
0x24c4   :  { %v7220_v48 = vpop.eup %7219 }
0x24c5   :  { %v2106_v50 = vadd.f32 1.0, %v7220_v48 }
0x24c7   :  { %7221 = vrcp.f32 %v2106_v50 }
0x24d4   :  { %v7222_v51 = vpop.eup %7221 }
0x24d5   :  { %v2110_v54 = vmul.f32 %v7222_v51, %v2020_v34 }
0x2535   :  { %v2113_v24 = vpop.permute.xlu0 %2112 }
0x2536   :  { %v2115_v52 = vmul.f32 %v7222_v51, %v2113_v24 }
0x2538   :  { %2117 = vrot.lane.b32.xlu1 %v2115_v52, %s7479_s9 }
0x25aa   :  { %v2118_v56 = vpop.permute.xlu1 %2117 }
0x25ab   :  { %v2120_v57 = vadd.f32 %v2118_v56, %v2110_v54 }
0x25ad   :  { %7223 = vtanh.f32 %v2120_v57 }
0x25ba   :  { %v7224_v21 = vpop.eup %7223 }
0x25bb   :  { %2123 = vrot.lane.b32.xlu0 %v7224_v21, %s7478_s25 }
0x262d   :  { %v2124_v40 = vpop.permute.xlu0 %2123 }
0x262e   :  { %v2126_v59 = vmul.f32 %v7222_v51, %v2124_v40 }
0x2630   :  { %2128 = vrot.lane.b32.xlu1 %v2126_v59, %s7479_s9 }
0x26a2   :  { %v8137_v60 = vpop.permute.xlu1 %2128 }
0x26a3   :  { %6786 = vmatmul.mubr.msk.f32.vlgmr.msra.gmra.mxu0 %vm498_vm4, %v8137_v60 }
0x26a4   :  { %6800 = vmatpush3.msra.mxu0 %v7965_v43  ;;  %6807 = vmatprep.mubr.msk.f32.mxu0 %vm7476_vm2, %v7475_v6 }
0x26a5   :  { %6801 = vmatprep.subr.mxu0 %v7475_v6 }
0x26a6   :  { %6802 = vmatpush3.msra.mxu0 %v7971_v44 }
0x26a7   :  { %6803 = vmatprep.subr.mxu0 %v7475_v6 }
0x26a8   :  { %6804 = vmatpush3.msra.mxu0 %v7978_v45 }
0x26a9   :  { %6805 = vmatprep.subr.mxu0 %v7475_v6 }
0x26aa   :  { %6806 = vmatpush3.msra.mxu0 %v7985_v46 }
0x26ab   :  { %6821 = vmatprep.subr.mxu0 %v7475_v6 }
0x2763   :  { %v2198_v61 = vpop.f32.mrf.mxu0 }
0x2764   :  { %v2202_v62 = vadd.f32 %v2198_v61, %v1605_v7  ;;  %v2630_v61 = vld [vmem:[%s9619_s11 + $0x18] sm:$0xff] }
0x2765   :  { %v6787_v63 = vpop.f32.mrf.mxu0 }
0x2766   :  { %7225 = vtanh.f32 %v2202_v62  ;;  %v6130_v2 = vmul.f32 -1.442695, %v2202_v62  ;;  %v2629_v63 = vld [vmem:[%s9619_s11 + $0x10] sm:$0xff] }
0x2768   :  { %7227 = vpow2.f32 %v6130_v2  ;;  %v2627_v2 = vld [vmem:[%s9619_s11] sm:$0xff] }
0x2773   :  { %v7226_v0 = vpop.eup %7225 }
0x2774   :  { %2212 = vrot.lane.b32.xlu0 %v7226_v0, %s7478_s25  ;;  %v2628_v0 = vld [vmem:[%s9619_s11 + $0x8] sm:$0xff] }
0x2775   :  { %v7228_v13 = vpop.eup %7227 }
0x2776   :  { %v2206_v3 = vadd.f32 1.0, %v7228_v13 }
0x2778   :  { %7229 = vrcp.f32 %v2206_v3 }
0x2785   :  { %v7230_v17 = vpop.eup %7229 }
0x2786   :  { %v2210_v12 = vmul.f32 %v7230_v17, %v2120_v57 }
0x27e6   :  { %v2213_v4 = vpop.permute.xlu0 %2212 }
0x27e7   :  { %v2215_v5 = vmul.f32 %v7230_v17, %v2213_v4 }
0x27e9   :  { %2217 = vrot.lane.b32.xlu1 %v2215_v5, %s7479_s9 }
0x285b   :  { %v2218_v25 = vpop.permute.xlu1 %2217 }
0x285c   :  { %v2220_v11 = vadd.f32 %v2218_v25, %v2210_v12 }
0x285e   :  { %7231 = vtanh.f32 %v2220_v11 }
0x286b   :  { %v7232_v27 = vpop.eup %7231 }
0x286c   :  { %2223 = vrot.lane.b32.xlu0 %v7232_v27, %s7478_s25 }
0x28de   :  { %v2224_v29 = vpop.permute.xlu0 %2223 }
0x28df   :  { %v2226_v20 = vmul.f32 %v7230_v17, %v2224_v29 }
0x28e1   :  { %2228 = vrot.lane.b32.xlu1 %v2226_v20, %s7479_s9 }
0x2953   :  { %v8157_v30 = vpop.permute.xlu1 %2228 }
0x2954   :  { %6797 = vmatmul.mubr.msk.f32.vlgmr.msra.gmra.mxu1 %vm498_vm4, %v8157_v30 }
0x2955   :  { %6811 = vmatpush3.msra.mxu1 %v7965_v43  ;;  %6818 = vmatprep.mubr.msk.f32.mxu1 %vm7476_vm2, %v7475_v6 }
0x2956   :  { %6812 = vmatprep.subr.mxu1 %v7475_v6 }
0x2957   :  { %6813 = vmatpush3.msra.mxu1 %v7971_v44 }
0x2958   :  { %6814 = vmatprep.subr.mxu1 %v7475_v6 }
0x2959   :  { %6815 = vmatpush3.msra.mxu1 %v7978_v45 }
0x295a   :  { %6816 = vmatprep.subr.mxu1 %v7475_v6 }
0x295b   :  { %6817 = vmatpush3.msra.mxu1 %v7985_v46 }
0x295c   :  { %6832 = vmatprep.subr.mxu1 %v7475_v6 }
0x2a14   :  { %v2298_v47 = vpop.f32.mrf.mxu1 }
0x2a15   :  { %v2302_v31 = vadd.f32 %v2298_v47, %v1610_v16 }
0x2a16   :  { %v6798_v10 = vpop.f32.mrf.mxu1 }
0x2a17   :  { %7233 = vtanh.f32 %v2302_v31  ;;  %v6132_v41 = vmul.f32 -1.442695, %v2302_v31 }
0x2a19   :  { %7235 = vpow2.f32 %v6132_v41 }
0x2a24   :  { %v7234_v32 = vpop.eup %7233 }
0x2a25   :  { %2312 = vrot.lane.b32.xlu0 %v7234_v32, %s7478_s25 }
0x2a26   :  { %v7236_v33 = vpop.eup %7235 }
0x2a27   :  { %v2306_v1 = vadd.f32 1.0, %v7236_v33 }
0x2a29   :  { %7237 = vrcp.f32 %v2306_v1 }
0x2a36   :  { %v7238_v34 = vpop.eup %7237 }
0x2a37   :  { %v2310_v36 = vmul.f32 %v7238_v34, %v2220_v11 }
0x2a97   :  { %v2313_v18 = vpop.permute.xlu0 %2312 }
0x2a98   :  { %v2315_v35 = vmul.f32 %v7238_v34, %v2313_v18 }
0x2a9a   :  { %2317 = vrot.lane.b32.xlu1 %v2315_v35, %s7479_s9 }
0x2b0c   :  { %v2318_v53 = vpop.permute.xlu1 %2317 }
0x2b0d   :  { %v2320_v15 = vadd.f32 %v2318_v53, %v2310_v36 }
0x2b0f   :  { %7239 = vtanh.f32 %v2320_v15 }
0x2b1c   :  { %v7240_v58 = vpop.eup %7239 }
0x2b1d   :  { %2323 = vrot.lane.b32.xlu0 %v7240_v58, %s7478_s25 }
0x2b8f   :  { %v2324_v26 = vpop.permute.xlu0 %2323 }
0x2b90   :  { %v2326_v28 = vmul.f32 %v7238_v34, %v2324_v26 }
0x2b92   :  { %2328 = vrot.lane.b32.xlu1 %v2326_v28, %s7479_s9 }
0x2c04   :  { %v8177_v39 = vpop.permute.xlu1 %2328 }
0x2c05   :  { %6808 = vmatmul.mubr.msk.f32.vlgmr.msra.gmra.mxu0 %vm498_vm4, %v8177_v39 }
0x2c06   :  { %6822 = vmatpush3.msra.mxu0 %v7965_v43  ;;  %6829 = vmatprep.mubr.msk.f32.mxu0 %vm7476_vm2, %v7475_v6  ;;  %v1615_v43 = vadd.f32 %v8105_v14, %v8019_v55 }
0x2c07   :  { %6823 = vmatprep.subr.mxu0 %v7475_v6 }
0x2c08   :  { %6824 = vmatpush3.msra.mxu0 %v7971_v44 }
0x2c09   :  { %6825 = vmatprep.subr.mxu0 %v7475_v6 }
0x2c0a   :  { %6826 = vmatpush3.msra.mxu0 %v7978_v45 }
0x2c0b   :  { %6827 = vmatprep.subr.mxu0 %v7475_v6 }
0x2c0c   :  { %6828 = vmatpush3.msra.mxu0 %v7985_v46 }
0x2c0d   :  { %6867 = vmatprep.subr.msk.mxu0 %vm125_vm0, %v8193_v42 }
0x2cc5   :  { %v2398_v44 = vpop.f32.mrf.mxu0 }
0x2cc6   :  { %v2402_v48 = vadd.f32 %v2398_v44, %v1615_v43 }
0x2cc7   :  { %v6809_v50 = vpop.f32.mrf.mxu0 }
0x2cc8   :  { %7241 = vtanh.f32 %v2402_v48  ;;  %v6134_v51 = vmul.f32 -1.442695, %v2402_v48 }
0x2cca   :  { %7243 = vpow2.f32 %v6134_v51 }
0x2cd5   :  { %v7242_v45 = vpop.eup %7241 }
0x2cd6   :  { %2412 = vrot.lane.b32.xlu0 %v7242_v45, %s7478_s25 }
0x2cd7   :  { %v7244_v46 = vpop.eup %7243 }
0x2cd8   :  { %v2406_v24 = vadd.f32 1.0, %v7244_v46 }
0x2cda   :  { %7245 = vrcp.f32 %v2406_v24  ;;  %v1625_v24 = vadd.f32 %v8109_v19, %v8019_v55  ;;  %v2760_v19 = vld [vmem:[%s9622_s2 + $0x10] sm:$0xff] }
0x2ce7   :  { %v7246_v52 = vpop.eup %7245 }
0x2ce8   :  { %v2410_v57 = vmul.f32 %v7246_v52, %v2320_v15 }
0x2d48   :  { %v2413_v54 = vpop.permute.xlu0 %2412 }
0x2d49   :  { %v2415_v56 = vmul.f32 %v7246_v52, %v2413_v54 }
0x2d4b   :  { %2417 = vrot.lane.b32.xlu1 %v2415_v56, %s7479_s9 }
0x2dbd   :  { %v2418_v21 = vpop.permute.xlu1 %2417 }
0x2dbe   :  { %v8201_v14 = vadd.f32 %v2418_v21, %v2410_v57 }
0x2dc0   :  { %7247 = vtanh.f32 %v8201_v14 }
0x2dcd   :  { %v7248_v40 = vpop.eup %7247 }
0x2dce   :  { %2423 = vrot.lane.b32.xlu0 %v7248_v40, %s7478_s25  ;;  %v2761_v40 = vld [vmem:[%s9622_s2 + $0x18] sm:$0xff] }
0x2e40   :  { %v2424_v59 = vpop.permute.xlu0 %2423 }
0x2e41   :  { %v2426_v7 = vmul.f32 %v7246_v52, %v2424_v59  ;;  %v2762_v59 = vld [vmem:[%s9622_s2 + $0x20] sm:$0xff] }
0x2e43   :  { %2428 = vrot.lane.b32.xlu1 %v2426_v7, %s7479_s9  ;;  %v2763_v7 = vld [vmem:[%s9622_s2 + $0x28] sm:$0xff] }
0x2eb5   :  { %v2429_v62 = vpop.permute.xlu1 %2428 }
0x2eb6   :  { %6819 = vmatmul.mubr.msk.f32.vlgmr.msra.gmra.mxu1 %vm498_vm4, %v2429_v62 }
0x2eb7   :  { %6833 = vmatpush3.msra.mxu1 %v2630_v61  ;;  %6840 = vmatprep.mubr.msk.f32.mxu1 %vm7476_vm2, %v7475_v6  ;;  %v2764_v61 = vld [vmem:[%s9622_s2 + $0x30] sm:$0xff] }
0x2eb8   :  { %6834 = vmatprep.subr.mxu1 %v7475_v6 }
0x2eb9   :  { %6835 = vmatpush3.msra.mxu1 %v2629_v63  ;;  %v2765_v63 = vld [vmem:[%s9622_s2 + $0x38] sm:$0xff] }
0x2eba   :  { %6836 = vmatprep.subr.mxu1 %v7475_v6 }
0x2ebb   :  { %6837 = vmatpush3.msra.mxu1 %v2628_v0 }
0x2ebc   :  { %6838 = vmatprep.subr.mxu1 %v7475_v6 }
0x2ebd   :  { %6839 = vmatpush3.msra.mxu1 %v2627_v2 }
0x2ebe   :  { %6841 = vmatmul.mubr.msk.f32.vlgmr.msra.gmra.mxu1 %vm498_vm4, %v8026_v8  ;;  %v1620_v8 = vadd.f32 %v8019_v55, %v8111_v23  ;;  %v2759_v55 = vld [vmem:[%s9622_s2 + $0x8] sm:$0xff] }
0x2ebf   :  { %6843 = vmatprep.mubr.msk.f32.mxu1 %vm7476_vm2, %v7475_v6 }
0x2ec2   :  { %6844 = vmatmul.mubr.msk.f32.gmra.mxu1 %vm498_vm4, %v8056_v38 }
0x2ec3   :  { %6846 = vmatprep.mubr.msk.f32.mxu1 %vm7476_vm2, %v7475_v6 }
0x2ec6   :  { %6847 = vmatmul.mubr.msk.f32.gmra.mxu1 %vm498_vm4, %v8089_v22 }
0x2ec7   :  { %6849 = vmatprep.mubr.msk.f32.mxu1 %vm7476_vm2, %v7475_v6 }
0x2eca   :  { %6850 = vmatmul.mubr.msk.f32.gmra.mxu1 %vm498_vm4, %v8118_v37 }
0x2ecb   :  { %6852 = vmatprep.mubr.msk.f32.mxu1 %vm7476_vm2, %v7475_v6 }
0x2ece   :  { %6853 = vmatmul.mubr.msk.f32.gmra.mxu1 %vm498_vm4, %v8137_v60  ;;  %v8260_v60 = vld [vmem:[%s9620_s12] ss:$0 sm:$0xff] }
0x2ecf   :  { %6855 = vmatprep.mubr.msk.f32.mxu1 %vm7476_vm2, %v7475_v6 }
0x2ed2   :  { %6856 = vmatmul.mubr.msk.f32.gmra.mxu1 %vm498_vm4, %v8157_v30 }
0x2ed3   :  { %6858 = vmatprep.mubr.msk.f32.mxu1 %vm7476_vm2, %v7475_v6 }
0x2ed6   :  { %6859 = vmatmul.mubr.msk.f32.gmra.mxu1 %vm498_vm4, %v8177_v39 }
0x2ed7   :  { %6861 = vmatprep.mubr.msk.f32.mxu1 %vm7476_vm2, %v7475_v6 }
0x2eda   :  { %6862 = vmatmul.mubr.msk.f32.gmra.mxu1 %vm498_vm4, %v2429_v62 }
0x2edb   :  { %6864 = vmatprep.mubr.msk.f32.mxu1 %vm7476_vm2, %v7475_v6 }
0x2f76   :  { %v2498_v38 = vpop.f32.mrf.mxu1 }
0x2f77   :  { %v2502_v22 = vadd.f32 %v2498_v38, %v1620_v8 }
0x2f78   :  { %v6820_v37 = vpop.f32.mrf.mxu1 }
0x2f79   :  { %7249 = vtanh.f32 %v2502_v22  ;;  %v6136_v53 = vmul.f32 -1.442695, %v2502_v22 }
0x2f7b   :  { %7251 = vpow2.f32 %v6136_v53 }
0x2f7e   :  { %v2704_v13 = vpop.f32.mrf.mxu1 }
0x2f7f   :  { %v2705_v3 = vadd.f32 %v8260_v60, %v2704_v13 }
0x2f80   :  { %v6842_v17 = vpop.f32.mrf.mxu1 }
0x2f81   :  { %2749 = vst.msk [vmem:[%s9621_s23] sm:$0xff] %vm2748_vm5, %v2705_v3 }
0x2f82   :  { %v2709_v23 = vpop.f32.mrf.mxu1 }
0x2f83   :  { %v2710_v4 = vadd.f32 %v8260_v60, %v2709_v23  ;;  %v2906_v23 = vld [vmem:[%s9623_s13 + $0x18] sm:$0xff] }
0x2f84   :  { %v6845_v5 = vpop.f32.mrf.mxu1 }
0x2f85   :  { %2750 = vst.msk [vmem:[%s9621_s23 + $0x8] sm:$0xff] %vm2748_vm5, %v2710_v4  ;;  %v2905_v4 = vld [vmem:[%s9623_s13 + $0x10] sm:$0xff]  ;;  %v2904_v5 = vld [vmem:[%s9623_s13 + $0x8] sm:$0xff] }
0x2f86   :  { %v7250_v12 = vpop.eup %7249  ;;  %v2714_v25 = vpop.f32.mrf.mxu1 }
0x2f87   :  { %v2715_v11 = vadd.f32 %v8260_v60, %v2714_v25  ;;  %2512 = vrot.lane.b32.xlu0 %v7250_v12, %s7478_s25  ;;  %v2903_v25 = vld [vmem:[%s9623_s13] sm:$0xff] }
0x2f88   :  { %v6848_v27 = vpop.f32.mrf.mxu1  ;;  %v7252_v15 = vpop.eup %7251 }
0x2f89   :  { %2751 = vst.msk [vmem:[%s9621_s23 + $0x10] sm:$0xff] %vm2748_vm5, %v2715_v11  ;;  %v2506_v58 = vadd.f32 1.0, %v7252_v15  ;;  %v3059_v11 = vld [vmem:[%s9624_s14 + $0x18] sm:$0xff]  ;;  %v3058_v27 = vld [vmem:[%s9624_s14 + $0x10] sm:$0xff] }
0x2f8a   :  { %v2719_v29 = vpop.f32.mrf.mxu1  ;;  %3088 = vmatprep.subr.mxu1 %v3059_v11  ;;  %v8400_v15 = vld [vmem:[%s9625_s15 + $0x70] sm:$0xff] }
0x2f8b   :  { %v2720_v20 = vadd.f32 %v8260_v60, %v2719_v29  ;;  %7253 = vrcp.f32 %v2506_v58  ;;  %v7474_v29 = vld [vmem:[%s9656_s7] ss:$0 sm:$0xff]  ;;  %3089 = vmatpush1.msra.mxu1 %v3058_v27 }
0x2f8c   :  { %v6851_v30 = vpop.f32.mrf.mxu1 }
0x2f8d   :  { %2752 = vst.msk [vmem:[%s9621_s23 + $0x18] sm:$0xff] %vm2748_vm5, %v2720_v20 }
0x2f8e   :  { %v2724_v16 = vpop.f32.mrf.mxu1 }
0x2f8f   :  { %v2725_v47 = vadd.f32 %v8260_v60, %v2724_v16  ;;  %v3057_v16 = vld [vmem:[%s9624_s14 + $0x8] sm:$0xff] }
0x2f90   :  { %v6854_v31 = vpop.f32.mrf.mxu1  ;;  %3090 = vmatprep.subr.mxu1 %v3057_v16 }
0x2f91   :  { %2753 = vst.msk [vmem:[%s9621_s23 + $0x20] sm:$0xff] %vm2748_vm5, %v2725_v47  ;;  %v3056_v47 = vld [vmem:[%s9624_s14] sm:$0xff]  ;;  %v8391_v31 = vld [vmem:[%s9625_s15 + $0x78] sm:$0xff]  ;;  %s7480_s14 = smov 96  }
0x2f92   :  { %v2729_v10 = vpop.f32.mrf.mxu1  ;;  %3091 = vmatpush1.msra.mxu1 %v3056_v47 }
0x2f93   :  { %v2730_v32 = vadd.f32 %v8260_v60, %v2729_v10  ;;  %3430 = vmatprep.subr.mxu1 %v8391_v31 }
0x2f94   :  { %v6857_v41 = vpop.f32.mrf.mxu1 }
0x2f95   :  { %2754 = vst.msk [vmem:[%s9621_s23 + $0x28] sm:$0xff] %vm2748_vm5, %v2730_v32 }
0x2f96   :  { %v2734_v33 = vpop.f32.mrf.mxu1 }
0x2f97   :  { %v2735_v1 = vadd.f32 %v8260_v60, %v2734_v33 }
0x2f98   :  { %v6860_v34 = vpop.f32.mrf.mxu1  ;;  %v7254_v26 = vpop.eup %7253 }
0x2f99   :  { %2755 = vst.msk [vmem:[%s9621_s23 + $0x30] sm:$0xff] %vm2748_vm5, %v2735_v1  ;;  %v2510_v43 = vmul.f32 %v7254_v26, %v8201_v14 }
0x2f9a   :  { %v2739_v18 = vpop.f32.mrf.mxu1 }
0x2f9b   :  { %v2740_v35 = vadd.f32 %v8260_v60, %v2739_v18 }
0x2f9c   :  { %v6863_v36 = vpop.f32.mrf.mxu1 }
0x2f9d   :  { %2756 = vst.msk [vmem:[%s9621_s23 + $0x38] sm:$0xff] %vm2748_vm5, %v2740_v35 }
0x2ff9   :  { %v2513_v28 = vpop.permute.xlu0 %2512 }
0x2ffa   :  { %v2515_v39 = vmul.f32 %v7254_v26, %v2513_v28 }
0x2ffc   :  { %2517 = vrot.lane.b32.xlu1 %v2515_v39, %s7479_s9  ;;  %v8417_v39 = vld [vmem:[%s9625_s15 + $0x60] sm:$0xff] }
0x306e   :  { %v2518_v44 = vpop.permute.xlu1 %2517 }
0x306f   :  { %v2520_v48 = vadd.f32 %v2518_v44, %v2510_v43  ;;  %v8425_v44 = vld [vmem:[%s9625_s15 + $0x58] sm:$0xff] }
0x3071   :  { %7255 = vtanh.f32 %v2520_v48 }
0x307e   :  { %v7256_v50 = vpop.eup %7255 }
0x307f   :  { %2523 = vrot.lane.b32.xlu0 %v7256_v50, %s7478_s25  ;;  %v8435_v50 = vld [vmem:[%s9625_s15 + $0x50] sm:$0xff] }
0x30f1   :  { %v2524_v45 = vpop.permute.xlu0 %2523 }
0x30f2   :  { %v2526_v51 = vmul.f32 %v7254_v26, %v2524_v45 }
0x30f4   :  { %2528 = vrot.lane.b32.xlu1 %v2526_v51, %s7479_s9  ;;  %v8443_v51 = vld [vmem:[%s9625_s15 + $0x48] sm:$0xff] }
0x3166   :  { %v2529_v46 = vpop.permute.xlu1 %2528 }
0x3167   :  { %6830 = vmatmul.mubr.msk.f32.vlgmr.msra.gmra.mxu0 %vm498_vm4, %v2529_v46  ;;  %6865 = vmatmul.mubr.msk.f32.gmra.mxu1 %vm498_vm4, %v2529_v46 }
0x3168   :  { %6868 = vmatpush3.msk.msra.mxu0 %vm125_vm0, %v8193_v42  ;;  %3124 = vmatprep.mubr.f32.mxu1 %v7475_v6  ;;  %v2758_v42 = vld [vmem:[%s9622_s2] sm:$0xff] }
0x3169   :  { %6869 = vmatprep.mubr.msk.f32.mxu0 %vm94_vm1, %v2758_v42  ;;  %2971 = vmatprep.subr.mxu0 %v2906_v23  ;;  %v8497_v42 = vld [vmem:[%s9625_s15 + $0x18] sm:$0xff] }
0x316b   :  { %6870 = vmatmul.mubr.msk.f32.vlgmr.msra.gmra.mxu0 %vm94_vm1, %v2759_v55 }
0x316c   :  { %6872 = vmatprep.mubr.msk.f32.mxu0 %vm94_vm1, %v2760_v19  ;;  %2972 = vmatpush1.msra.mxu0 %v2905_v4  ;;  %v8507_v19 = vld [vmem:[%s9625_s15 + $0x10] sm:$0xff] }
0x316d   :  { %2973 = vmatprep.subr.mxu0 %v2904_v5 }
0x316e   :  { %2974 = vmatpush1.msra.mxu0 %v2903_v25 }
0x316f   :  { %6873 = vmatmul.mubr.msk.f32.gmra.mxu0 %vm94_vm1, %v2761_v40  ;;  %3222 = vmatprep.subr.mxu0 %v8391_v31  ;;  %v8515_v40 = vld [vmem:[%s9625_s15 + $0x8] sm:$0xff] }
0x3170   :  { %6875 = vmatprep.mubr.msk.f32.mxu0 %vm94_vm1, %v2762_v59 }
0x3173   :  { %6876 = vmatmul.mubr.msk.f32.gmra.mxu0 %vm94_vm1, %v2763_v7  ;;  %v8523_v7 = vld [vmem:[%s9625_s15] sm:$0xff] }
0x3174   :  { %6878 = vmatprep.mubr.msk.f32.mxu0 %vm94_vm1, %v2764_v61 }
0x3177   :  { %6879 = vmatmul.mubr.msk.f32.gmra.mxu0 %vm94_vm1, %v2765_v63 }
0x3178   :  { %3007 = vmatprep.mubr.f32.mxu0 %v7475_v6 }
0x3227   :  { %v2598_v52 = vpop.f32.mrf.mxu0  ;;  %v2744_v54 = vpop.f32.mrf.mxu1 }
0x3228   :  { %v2602_v56 = vadd.f32 %v2598_v52, %v1625_v24  ;;  %v2745_v57 = vadd.f32 %v8260_v60, %v2744_v54  ;;  %v8453_v24 = vld [vmem:[%s9625_s15 + $0x40] sm:$0xff]  ;;  %v8461_v52 = vld [vmem:[%s9625_s15 + $0x38] sm:$0xff] }
0x3229   :  { %v6831_v21 = vpop.f32.mrf.mxu0  ;;  %v6866_v14 = vpop.f32.mrf.mxu1 }
0x322a   :  { %7257 = vtanh.f32 %v2602_v56  ;;  %2757 = vst.msk [vmem:[%s9621_s23 + $0x40] sm:$0xff] %vm2748_vm5, %v2745_v57  ;;  %v6138_v0 = vmul.f32 -1.442695, %v2602_v56  ;;  %v8471_v56 = vld [vmem:[%s9625_s15 + $0x30] sm:$0xff]  ;;  %v8479_v57 = vld [vmem:[%s9625_s15 + $0x28] sm:$0xff]  ;;  %v8489_v14 = vld [vmem:[%s9625_s15 + $0x20] sm:$0xff] }
0x322b   :  { %v6871_v17 = vpop.f32.mrf.mxu0 }
0x322c   :  { %7259 = vpow2.f32 %v6138_v0  ;;  %v2862_v20 = vadd.f32 %v7474_v29, %v6871_v17 }
0x322d   :  { %v2856_v12 = vpop.f32.mrf.mxu0 }
0x322e   :  { %v2857_v30 = vadd.f32 %v7474_v29, %v2856_v12 }
0x322f   :  { %v6874_v10 = vpop.f32.mrf.mxu0 }
0x3230   :  { %v2872_v34 = vadd.f32 %v7474_v29, %v6874_v10 }
0x3231   :  { %v2866_v41 = vpop.f32.mrf.mxu0 }
0x3232   :  { %v2867_v33 = vadd.f32 %v7474_v29, %v2866_v41 }
0x3233   :  { %v6877_v1 = vpop.f32.mrf.mxu0 }
0x3234   :  { %v2882_v58 = vadd.f32 %v7474_v29, %v6877_v1 }
0x3235   :  { %v2876_v18 = vpop.f32.mrf.mxu0 }
0x3236   :  { %v2877_v35 = vadd.f32 %v7474_v29, %v2876_v18 }
0x3237   :  { %v7258_v62 = vpop.eup %7257  ;;  %v6880_v36 = vpop.f32.mrf.mxu0 }
0x3238   :  { %2612 = vrot.lane.b32.xlu0 %v7258_v62, %s7478_s25  ;;  %v2892_v45 = vadd.f32 %v7474_v29, %v6880_v36 }
0x3239   :  { %v7260_v2 = vpop.eup %7259  ;;  %v2886_v28 = vpop.f32.mrf.mxu0 }
0x323a   :  { %v2606_v8 = vadd.f32 1.0, %v7260_v2  ;;  %v2887_v43 = vadd.f32 %v7474_v29, %v2886_v28  ;;  %v2909_v2 = vlaneseq }
0x323c   :  { %7261 = vrcp.f32 %v2606_v8  ;;  %v8541_v8 = vshrl.u32 %v2909_v2, 7 }
0x3249   :  { %v8353_v38 = vpop.eup %7261 }
0x324a   :  { %v2610_v60 = vmul.f32 %v8353_v38, %v2520_v48 }
0x32aa   :  { %v2613_v22 = vpop.permute.xlu0 %2612 }
0x32ab   :  { %v2615_v37 = vmul.f32 %v8353_v38, %v2613_v22  ;;  %v2911_v22 = vsub.s32 0, %v8541_v8 }
0x32ad   :  { %2617 = vrot.lane.b32.xlu1 %v2615_v37, %s7479_s9  ;;  %v2907_v37 = vld [vmem:[%s9626_s16] sm:$0x3] }
0x32ae   :  { %v8558_v23 = vrot.slane %v2907_v37, %v2911_v22 }
0x331f   :  { %v2618_v13 = vpop.permute.xlu1 %2617 }
0x3320   :  { %v8358_v3 = vadd.f32 %v2618_v13, %v2610_v60  ;;  %v2915_v13 = vsub.s32 1, %v8541_v8 }
0x3322   :  { %7263 = vtanh.f32 %v8358_v3  ;;  %v8564_v12 = vrot.slane %v2907_v37, %v2915_v13 }
0x3323   :  { %7265 = vtanh.f32 %v2857_v30 }
0x3324   :  { %7267 = vtanh.f32 %v2862_v20 }
0x3325   :  { %7269 = vtanh.f32 %v2867_v33 }
0x3326   :  { %7271 = vtanh.f32 %v2872_v34 }
0x3327   :  { %7273 = vtanh.f32 %v2877_v35 }
0x3328   :  { %7275 = vtanh.f32 %v2882_v58 }
0x3329   :  { %7277 = vtanh.f32 %v2887_v43 }
0x332a   :  { %7279 = vtanh.f32 %v2892_v45 }
0x332f   :  { %v7264_v32 = vpop.eup %7263 }
0x3330   :  { %2623 = vrot.lane.b32.xlu0 %v7264_v32, %s7478_s25  ;;  %v7266_v53 = vpop.eup %7265 }
0x3331   :  { %6158 = vmatmul.mubr.msk.f32.vlgmr.msra.gmra.mxu0 %vm331_vm3, %v7266_v53  ;;  %6166 = vmatmul.mubr.msk.f32.vlgmr.msra.gmra.mxu1 %vm331_vm3, %v7266_v53  ;;  %v7268_v26 = vpop.eup %7267 }
0x3332   :  { %3013 = vmatprep.mubr.f32.mxu0 %v7475_v6  ;;  %3130 = vmatprep.mubr.f32.mxu1 %v7475_v6  ;;  %v7270_v48 = vpop.eup %7269 }
0x3333   :  { %3223 = vmatpush1.msra.mxu0 %v8400_v15  ;;  %3431 = vmatpush1.msra.mxu1 %v8400_v15  ;;  %v7272_v46 = vpop.eup %7271 }
0x3334   :  { %3196 = vrot.lane.b32.xlu0 %v8072_v49, %s7480_s14  ;;  %v8407_v49 = vld [vmem:[%s9625_s15 + $0x68] sm:$0xff]  ;;  %v7274_v54 = vpop.eup %7273 }
0x3335   :  { %3224 = vmatprep.subr.mxu0 %v8407_v49  ;;  %3432 = vmatprep.subr.mxu1 %v8407_v49  ;;  %v7276_v21 = vpop.eup %7275 }
0x3336   :  { %6159 = vmatmul.mubr.msk.f32.gmra.mxu0 %vm331_vm3, %v7268_v26  ;;  %6167 = vmatmul.mubr.msk.f32.gmra.mxu1 %vm331_vm3, %v7268_v26  ;;  %v7278_v55 = vpop.eup %7277 }
0x3337   :  { %3019 = vmatprep.mubr.f32.mxu0 %v7475_v6  ;;  %3136 = vmatprep.mubr.f32.mxu1 %v7475_v6  ;;  %v7280_v59 = vpop.eup %7279 }
0x3338   :  { %3225 = vmatpush1.msra.mxu0 %v8417_v39  ;;  %3433 = vmatpush1.msra.mxu1 %v8417_v39 }
0x3339   :  { %3226 = vmatprep.subr.mxu0 %v8425_v44  ;;  %3434 = vmatprep.subr.mxu1 %v8425_v44 }
0x333a   :  { %6160 = vmatmul.mubr.msk.f32.gmra.mxu0 %vm331_vm3, %v7270_v48  ;;  %6168 = vmatmul.mubr.msk.f32.gmra.mxu1 %vm331_vm3, %v7270_v48 }
0x333b   :  { %3025 = vmatprep.mubr.f32.mxu0 %v7475_v6  ;;  %3142 = vmatprep.mubr.f32.mxu1 %v7475_v6 }
0x333c   :  { %3227 = vmatpush1.msra.mxu0 %v8435_v50  ;;  %3435 = vmatpush1.msra.mxu1 %v8435_v50 }
0x333d   :  { %3228 = vmatprep.subr.mxu0 %v8443_v51  ;;  %3436 = vmatprep.subr.mxu1 %v8443_v51 }
0x333e   :  { %6161 = vmatmul.mubr.msk.f32.gmra.mxu0 %vm331_vm3, %v7272_v46  ;;  %6169 = vmatmul.mubr.msk.f32.gmra.mxu1 %vm331_vm3, %v7272_v46 }
0x333f   :  { %3031 = vmatprep.mubr.f32.mxu0 %v7475_v6  ;;  %3148 = vmatprep.mubr.f32.mxu1 %v7475_v6 }
0x3340   :  { %3229 = vmatpush1.msra.mxu0 %v8453_v24  ;;  %3437 = vmatpush1.msra.mxu1 %v8453_v24 }
0x3341   :  { %3230 = vmatprep.subr.mxu0 %v8461_v52  ;;  %3438 = vmatprep.subr.mxu1 %v8461_v52 }
0x3342   :  { %6162 = vmatmul.mubr.msk.f32.gmra.mxu0 %vm331_vm3, %v7274_v54  ;;  %6170 = vmatmul.mubr.msk.f32.gmra.mxu1 %vm331_vm3, %v7274_v54 }
0x3343   :  { %3037 = vmatprep.mubr.f32.mxu0 %v7475_v6  ;;  %3154 = vmatprep.mubr.f32.mxu1 %v7475_v6 }
0x3344   :  { %3231 = vmatpush1.msra.mxu0 %v8471_v56  ;;  %3439 = vmatpush1.msra.mxu1 %v8471_v56 }
0x3345   :  { %3232 = vmatprep.subr.mxu0 %v8479_v57  ;;  %3440 = vmatprep.subr.mxu1 %v8479_v57 }
0x3346   :  { %6163 = vmatmul.mubr.msk.f32.gmra.mxu0 %vm331_vm3, %v7276_v21  ;;  %6171 = vmatmul.mubr.msk.f32.gmra.mxu1 %vm331_vm3, %v7276_v21 }
0x3347   :  { %3043 = vmatprep.mubr.f32.mxu0 %v7475_v6  ;;  %3160 = vmatprep.mubr.f32.mxu1 %v7475_v6 }
0x3348   :  { %3233 = vmatpush1.msra.mxu0 %v8489_v14  ;;  %3441 = vmatpush1.msra.mxu1 %v8489_v14 }
0x3349   :  { %3234 = vmatprep.subr.mxu0 %v8497_v42  ;;  %3442 = vmatprep.subr.mxu1 %v8497_v42 }
0x334a   :  { %6164 = vmatmul.mubr.msk.f32.gmra.mxu0 %vm331_vm3, %v7278_v55  ;;  %6172 = vmatmul.mubr.msk.f32.gmra.mxu1 %vm331_vm3, %v7278_v55 }
0x334b   :  { %3049 = vmatprep.mubr.f32.mxu0 %v7475_v6  ;;  %3166 = vmatprep.mubr.f32.mxu1 %v7475_v6 }
0x334c   :  { %3235 = vmatpush1.msra.mxu0 %v8507_v19  ;;  %3443 = vmatpush1.msra.mxu1 %v8507_v19 }
0x334d   :  { %3236 = vmatprep.subr.mxu0 %v8515_v40  ;;  %3444 = vmatprep.subr.mxu1 %v8515_v40 }
0x334e   :  { %6165 = vmatmul.mubr.msk.f32.gmra.mxu0 %vm331_vm3, %v7280_v59  ;;  %6173 = vmatmul.mubr.msk.f32.gmra.mxu1 %vm331_vm3, %v7280_v59 }
0x334f   :  { %3237 = vmatpush1.msra.mxu0 %v8523_v7  ;;  %3270 = vmatprep.mubr.f32.mxu0 %v7475_v6 }
0x3350   :  { %3328 = vmatprep.subr.mxu0 %v8391_v31  ;;  %3445 = vmatpush1.msra.mxu1 %v8523_v7 }
0x3351   :  { %3478 = vmatprep.mubr.f32.mxu1 %v7475_v6  ;;  %3634 = vmatprep.subr.mxu1 %v8391_v31 }
0x33a2   :  { %v2624_v61 = vpop.permute.xlu0 %2623 }
0x33a3   :  { %v2626_v62 = vmul.f32 %v8353_v38, %v2624_v61 }
0x33a5   :  { %3191 = vrot.lane.b32.xlu1 %v2626_v62, %s7478_s25 }
0x33a6   :  { %v3197_v63 = vpop.permute.xlu0 %3196 }
0x33a7   :  { %v3199_v0 = vsel %vm498_vm4, %v3197_v63, %v8358_v3 }
0x33a9   :  { %3293 = vrot.lane.b32.xlu1 %v3199_v0, %s7478_s25 }
0x33f1   :  { %v8547_v60 = vpop.f32.mrf.mxu0  ;;  %v8549_v38 = vpop.f32.mrf.mxu1 }
0x33f3   :  { %v8552_v17 = vpop.f32.mrf.mxu0  ;;  %v8554_v3 = vpop.f32.mrf.mxu1 }
0x33f6   :  { %v3015_v4 = vpop.f32.mrf.mxu0  ;;  %v8560_v5 = vpop.f32.mrf.mxu1 }
0x33f7   :  { %v3016_v25 = vadd.f32 %v3015_v4, %v8558_v23 }
0x33f8   :  { %v3017_v11 = vpop.f32.mrf.mxu0  ;;  %v8567_v27 = vpop.f32.mrf.mxu1 }
0x33f9   :  { %v3018_v29 = vadd.f32 %v3017_v11, %v8564_v12 }
0x33fa   :  { %v3021_v20 = vpop.f32.mrf.mxu0  ;;  %v8570_v30 = vpop.f32.mrf.mxu1 }
0x33fb   :  { %v3022_v16 = vadd.f32 %v3021_v20, %v8558_v23 }
0x33fc   :  { %v3023_v47 = vpop.f32.mrf.mxu0  ;;  %v8573_v10 = vpop.f32.mrf.mxu1 }
0x33fd   :  { %v3024_v32 = vadd.f32 %v3023_v47, %v8564_v12 }
0x33fe   :  { %v3027_v41 = vpop.f32.mrf.mxu0  ;;  %v3144_v33 = vpop.f32.mrf.mxu1 }
0x33ff   :  { %v3028_v1 = vadd.f32 %v3027_v41, %v8558_v23 }
0x3400   :  { %v3029_v34 = vpop.f32.mrf.mxu0  ;;  %v3146_v18 = vpop.f32.mrf.mxu1 }
0x3401   :  { %v3030_v35 = vadd.f32 %v3029_v34, %v8564_v12 }
0x3402   :  { %v3033_v36 = vpop.f32.mrf.mxu0  ;;  %v3150_v53 = vpop.f32.mrf.mxu1 }
0x3403   :  { %v3034_v58 = vadd.f32 %v3033_v36, %v8558_v23  ;;  %v8579_v26 = vadd.f32 %v3150_v53, %v3028_v1 }
0x3404   :  { %v3035_v28 = vpop.f32.mrf.mxu0  ;;  %v3152_v43 = vpop.f32.mrf.mxu1 }
0x3405   :  { %v8581_v48 = vadd.f32 %v3144_v33, %v3034_v58  ;;  %v3036_v45 = vadd.f32 %v3035_v28, %v8564_v12  ;;  %v8584_v46 = vadd.f32 %v3152_v43, %v3030_v35  ;;  %v3010_v43 = vadd.f32 %v8547_v60, %v8558_v23 }
0x3406   :  { %v3039_v54 = vpop.f32.mrf.mxu0  ;;  %v3156_v21 = vpop.f32.mrf.mxu1 }
0x3407   :  { %v8586_v55 = vadd.f32 %v3146_v18, %v3036_v45  ;;  %v3040_v59 = vadd.f32 %v3039_v54, %v8558_v23  ;;  %v8589_v61 = vadd.f32 %v3156_v21, %v3022_v16 }
0x3408   :  { %v3041_v62 = vpop.f32.mrf.mxu0  ;;  %v3158_v63 = vpop.f32.mrf.mxu1 }
0x3409   :  { %v3042_v0 = vadd.f32 %v3041_v62, %v8564_v12  ;;  %v8592_v2 = vadd.f32 %v3158_v63, %v3024_v32  ;;  %v8635_v58 = vadd.f32 %v8570_v30, %v3040_v59 }
0x340a   :  { %v3045_v37 = vpop.f32.mrf.mxu0  ;;  %v3162_v4 = vpop.f32.mrf.mxu1 }
0x340b   :  { %v3046_v11 = vadd.f32 %v3045_v37, %v8558_v23  ;;  %v8595_v20 = vadd.f32 %v3162_v4, %v3016_v25  ;;  %v8638_v28 = vadd.f32 %v8573_v10, %v3042_v0 }
0x340c   :  { %v3047_v47 = vpop.f32.mrf.mxu0  ;;  %v3164_v41 = vpop.f32.mrf.mxu1 }
0x340d   :  { %v3048_v1 = vadd.f32 %v3047_v47, %v8564_v12  ;;  %v8598_v16 = vadd.f32 %v3164_v41, %v3018_v29  ;;  %v8623_v29 = vadd.f32 %v8560_v5, %v3046_v11 }
0x340e   :  { %v3051_v18 = vpop.f32.mrf.mxu0  ;;  %v3168_v5 = vpop.f32.mrf.mxu1 }
0x340f   :  { %v3052_v32 = vadd.f32 %v3051_v18, %v8558_v23  ;;  %v8626_v35 = vadd.f32 %v8567_v27, %v3048_v1  ;;  %v3200_v45 = vadd.f32 %v3168_v5, %v3010_v43 }
0x3411   :  { %v8629_v36 = vadd.f32 %v8549_v38, %v3052_v32  ;;  %v3012_v38 = vadd.f32 %v8552_v17, %v8564_v12 }
0x3417   :  { %v3192_v33 = vpop.permute.xlu1 %3191 }
0x3418   :  { %v3194_v34 = vsel %vm498_vm4, %v8080_v9, %v3192_v33  ;;  %v3053_v9 = vpop.f32.mrf.mxu0 }
0x3419   :  { %6174 = vmatmul.mubr.msk.f32.vlgmr.msra.gmra.mxu0 %vm3202_vm6, %v3194_v34  ;;  %v3054_v25 = vadd.f32 %v3053_v9, %v8564_v12 }
0x341a   :  { %3329 = vmatpush1.msra.mxu0 %v8400_v15  ;;  %3376 = vmatprep.mubr.f32.mxu0 %v7475_v6 }
0x341b   :  { %3330 = vmatprep.subr.mxu0 %v8407_v49  ;;  %v8632_v53 = vadd.f32 %v8554_v3, %v3054_v25  ;;  %v3170_v3 = vpop.f32.mrf.mxu1  ;;  %v3294_v11 = vpop.permute.xlu1 %3293 }
0x341c   :  { %3331 = vmatpush1.msra.mxu0 %v8417_v39  ;;  %v3201_v63 = vadd.f32 %v3170_v3, %v3012_v38 }
0x341d   :  { %3332 = vmatprep.subr.mxu0 %v8425_v44 }
0x341e   :  { %3333 = vmatpush1.msra.mxu0 %v8435_v50 }
0x341f   :  { %3334 = vmatprep.subr.mxu0 %v8443_v51 }
0x3420   :  { %3335 = vmatpush1.msra.mxu0 %v8453_v24 }
0x3421   :  { %3336 = vmatprep.subr.mxu0 %v8461_v52 }
0x3422   :  { %3337 = vmatpush1.msra.mxu0 %v8471_v56 }
0x3423   :  { %3338 = vmatprep.subr.mxu0 %v8479_v57 }
0x3424   :  { %3339 = vmatpush1.msra.mxu0 %v8489_v14 }
0x3425   :  { %3340 = vmatprep.subr.mxu0 %v8497_v42 }
0x3426   :  { %3341 = vmatpush1.msra.mxu0 %v8507_v19 }
0x3427   :  { %3342 = vmatprep.subr.mxu0 %v8515_v40 }
0x3428   :  { %3343 = vmatpush1.msra.mxu0 %v8523_v7 }
0x3429   :  { %3532 = vmatprep.subr.mxu0 %v8391_v31 }
0x34d9   :  { %v3272_v54 = vpop.f32.mrf.mxu0 }
0x34da   :  { %v3277_v27 = vadd.f32 %v3272_v54, %v3200_v45 }
0x34db   :  { %v3274_v62 = vpop.f32.mrf.mxu0 }
0x34dc   :  { %v6175_v21 = vmul.f32 -1.442695, %v3277_v27  ;;  %v3278_v30 = vadd.f32 %v3274_v62, %v3201_v63 }
0x34de   :  { %7281 = vpow2.f32 %v6175_v21  ;;  %v6176_v23 = vmul.f32 -1.442695, %v3278_v30 }
0x34df   :  { %7283 = vtanh.f32 %v3278_v30 }
0x34eb   :  { %v7282_v59 = vpop.eup %7281 }
0x34ec   :  { %v3285_v37 = vadd.f32 1.0, %v7282_v59  ;;  %v7284_v10 = vpop.eup %7283 }
0x34ee   :  { %7285 = vrcp.f32 %v3285_v37 }
0x34ef   :  { %7287 = vpow2.f32 %v6176_v23 }
0x34fb   :  { %v7286_v0 = vpop.eup %7285 }
0x34fc   :  { %v3297_v60 = vmul.f32 %v7286_v0, %v7284_v10  ;;  %v7288_v4 = vpop.eup %7287  ;;  %v3296_v41 = vmul.f32 %v7286_v0, %v3294_v11 }
0x34fd   :  { %v3286_v47 = vadd.f32 1.0, %v7288_v4 }
0x34fe   :  { %3299 = vrot.lane.b32.xlu0 %v3297_v60, %s7478_s25 }
0x34ff   :  { %7289 = vrcp.f32 %v3286_v47 }
0x350c   :  { %v7290_v33 = vpop.eup %7289 }
0x3570   :  { %v3300_v17 = vpop.permute.xlu0 %3299 }
0x3571   :  { %v3302_v12 = vadd.f32 %v3300_v17, %v3296_v41 }
0x3573   :  { %7291 = vtanh.f32 %v3302_v12 }
0x3580   :  { %v7292_v1 = vpop.eup %7291 }
0x3581   :  { %v3304_v34 = vmul.f32 %v7292_v1, %v7290_v33 }
0x3583   :  { %3308 = vrot.lane.b32.xlu1 %v3304_v34, %s7478_s25 }
0x35f5   :  { %v8646_v18 = vpop.permute.xlu1 %3308 }
0x35f6   :  { %6177 = vmatmul.mubr.msk.f32.vlgmr.msra.gmra.mxu0 %vm3202_vm6, %v8646_v18 }
0x35f7   :  { %3533 = vmatpush1.msra.mxu0 %v8400_v15  ;;  %3580 = vmatprep.mubr.f32.mxu0 %v7475_v6 }
0x35f8   :  { %3534 = vmatprep.subr.mxu0 %v8407_v49 }
0x35f9   :  { %3535 = vmatpush1.msra.mxu0 %v8417_v39 }
0x35fa   :  { %3536 = vmatprep.subr.mxu0 %v8425_v44 }
0x35fb   :  { %3537 = vmatpush1.msra.mxu0 %v8435_v50 }
0x35fc   :  { %3538 = vmatprep.subr.mxu0 %v8443_v51 }
0x35fd   :  { %3539 = vmatpush1.msra.mxu0 %v8453_v24 }
0x35fe   :  { %3540 = vmatprep.subr.mxu0 %v8461_v52 }
0x35ff   :  { %3541 = vmatpush1.msra.mxu0 %v8471_v56 }
0x3600   :  { %3542 = vmatprep.subr.mxu0 %v8479_v57 }
0x3601   :  { %3543 = vmatpush1.msra.mxu0 %v8489_v14 }
0x3602   :  { %3544 = vmatprep.subr.mxu0 %v8497_v42 }
0x3603   :  { %3545 = vmatpush1.msra.mxu0 %v8507_v19 }
0x3604   :  { %3546 = vmatprep.subr.mxu0 %v8515_v40 }
0x3605   :  { %3547 = vmatpush1.msra.mxu0 %v8523_v7 }
0x3606   :  { %3736 = vmatprep.subr.mxu0 %v8391_v31 }
0x36b6   :  { %v3378_v32 = vpop.f32.mrf.mxu0 }
0x36b7   :  { %v3383_v9 = vadd.f32 %v3378_v32, %v8595_v20 }
0x36b8   :  { %v3380_v43 = vpop.f32.mrf.mxu0 }
0x36b9   :  { %v6178_v25 = vmul.f32 -1.442695, %v3383_v9  ;;  %v3384_v5 = vadd.f32 %v3380_v43, %v8598_v16 }
0x36bb   :  { %7293 = vpow2.f32 %v6178_v25  ;;  %v6179_v3 = vmul.f32 -1.442695, %v3384_v5 }
0x36bc   :  { %7295 = vtanh.f32 %v3384_v5 }
0x36c8   :  { %v7294_v45 = vpop.eup %7293 }
0x36c9   :  { %v3391_v54 = vadd.f32 1.0, %v7294_v45  ;;  %v7296_v27 = vpop.eup %7295 }
0x36cb   :  { %7297 = vrcp.f32 %v3391_v54 }
0x36cc   :  { %7299 = vpow2.f32 %v6179_v3 }
0x36d8   :  { %v7298_v21 = vpop.eup %7297 }
0x36d9   :  { %v3399_v38 = vmul.f32 %v7298_v21, %v7296_v27  ;;  %v7300_v62 = vpop.eup %7299  ;;  %v3398_v30 = vmul.f32 %v7298_v21, %v3302_v12 }
0x36da   :  { %v3392_v63 = vadd.f32 1.0, %v7300_v62 }
0x36db   :  { %3401 = vrot.lane.b32.xlu0 %v3399_v38, %s7478_s25 }
0x36dc   :  { %7301 = vrcp.f32 %v3392_v63 }
0x36e9   :  { %v7302_v37 = vpop.eup %7301 }
0x374d   :  { %v3402_v20 = vpop.permute.xlu0 %3401 }
0x374e   :  { %v3404_v59 = vadd.f32 %v3402_v20, %v3398_v30 }
0x3750   :  { %7303 = vtanh.f32 %v3404_v59 }
0x375d   :  { %v7304_v16 = vpop.eup %7303 }
0x375e   :  { %v3406_v10 = vmul.f32 %v7304_v16, %v7302_v37 }
0x3760   :  { %3410 = vrot.lane.b32.xlu1 %v3406_v10, %s7478_s25 }
0x37d2   :  { %v8671_v0 = vpop.permute.xlu1 %3410 }
0x37d3   :  { %6180 = vmatmul.mubr.msk.f32.vlgmr.msra.gmra.mxu1 %vm3202_vm6, %v8671_v0 }
0x37d4   :  { %3635 = vmatpush1.msra.mxu1 %v8400_v15  ;;  %3682 = vmatprep.mubr.f32.mxu1 %v7475_v6 }
0x37d5   :  { %3636 = vmatprep.subr.mxu1 %v8407_v49 }
0x37d6   :  { %3637 = vmatpush1.msra.mxu1 %v8417_v39 }
0x37d7   :  { %3638 = vmatprep.subr.mxu1 %v8425_v44 }
0x37d8   :  { %3639 = vmatpush1.msra.mxu1 %v8435_v50 }
0x37d9   :  { %3640 = vmatprep.subr.mxu1 %v8443_v51 }
0x37da   :  { %3641 = vmatpush1.msra.mxu1 %v8453_v24 }
0x37db   :  { %3642 = vmatprep.subr.mxu1 %v8461_v52 }
0x37dc   :  { %3643 = vmatpush1.msra.mxu1 %v8471_v56 }
0x37dd   :  { %3644 = vmatprep.subr.mxu1 %v8479_v57 }
0x37de   :  { %3645 = vmatpush1.msra.mxu1 %v8489_v14 }
0x37df   :  { %3646 = vmatprep.subr.mxu1 %v8497_v42 }
0x37e0   :  { %3647 = vmatpush1.msra.mxu1 %v8507_v19 }
0x37e1   :  { %3648 = vmatprep.subr.mxu1 %v8515_v40 }
0x37e2   :  { %3649 = vmatpush1.msra.mxu1 %v8523_v7 }
0x37e3   :  { %3838 = vmatprep.subr.mxu1 %v8391_v31 }
0x3893   :  { %v3480_v60 = vpop.f32.mrf.mxu1 }
0x3894   :  { %v3485_v23 = vadd.f32 %v3480_v60, %v8589_v61 }
0x3895   :  { %v3482_v11 = vpop.f32.mrf.mxu1 }
0x3896   :  { %v6181_v4 = vmul.f32 -1.442695, %v3485_v23  ;;  %v3486_v47 = vadd.f32 %v3482_v11, %v8592_v2 }
0x3898   :  { %7305 = vpow2.f32 %v6181_v4  ;;  %v6182_v34 = vmul.f32 -1.442695, %v3486_v47 }
0x3899   :  { %7307 = vtanh.f32 %v3486_v47 }
0x38a5   :  { %v7306_v41 = vpop.eup %7305 }
0x38a6   :  { %v3493_v17 = vadd.f32 1.0, %v7306_v41  ;;  %v7308_v12 = vpop.eup %7307 }
0x38a8   :  { %7309 = vrcp.f32 %v3493_v17 }
0x38a9   :  { %7311 = vpow2.f32 %v6182_v34 }
0x38b5   :  { %v7310_v33 = vpop.eup %7309 }
0x38b6   :  { %v3501_v1 = vmul.f32 %v7310_v33, %v7308_v12  ;;  %v7312_v32 = vpop.eup %7311  ;;  %v3500_v25 = vmul.f32 %v7310_v33, %v3404_v59 }
0x38b7   :  { %v3494_v9 = vadd.f32 1.0, %v7312_v32 }
0x38b8   :  { %3503 = vrot.lane.b32.xlu0 %v3501_v1, %s7478_s25 }
0x38b9   :  { %7313 = vrcp.f32 %v3494_v9 }
0x38c6   :  { %v7314_v5 = vpop.eup %7313 }
0x392a   :  { %v3504_v61 = vpop.permute.xlu0 %3503 }
0x392b   :  { %v3506_v43 = vadd.f32 %v3504_v61, %v3500_v25 }
0x392d   :  { %7315 = vtanh.f32 %v3506_v43 }
0x393a   :  { %v7316_v2 = vpop.eup %7315 }
0x393b   :  { %v3508_v45 = vmul.f32 %v7316_v2, %v7314_v5 }
0x393d   :  { %3512 = vrot.lane.b32.xlu1 %v3508_v45, %s7478_s25 }
0x39af   :  { %v8696_v54 = vpop.permute.xlu1 %3512 }
0x39b0   :  { %6183 = vmatmul.mubr.msk.f32.vlgmr.msra.gmra.mxu0 %vm3202_vm6, %v8696_v54 }
0x39b1   :  { %3737 = vmatpush1.msra.mxu0 %v8400_v15  ;;  %3784 = vmatprep.mubr.f32.mxu0 %v7475_v6 }
0x39b2   :  { %3738 = vmatprep.subr.mxu0 %v8407_v49 }
0x39b3   :  { %3739 = vmatpush1.msra.mxu0 %v8417_v39 }
0x39b4   :  { %3740 = vmatprep.subr.mxu0 %v8425_v44 }
0x39b5   :  { %3741 = vmatpush1.msra.mxu0 %v8435_v50 }
0x39b6   :  { %3742 = vmatprep.subr.mxu0 %v8443_v51 }
0x39b7   :  { %3743 = vmatpush1.msra.mxu0 %v8453_v24 }
0x39b8   :  { %3744 = vmatprep.subr.mxu0 %v8461_v52 }
0x39b9   :  { %3745 = vmatpush1.msra.mxu0 %v8471_v56 }
0x39ba   :  { %3746 = vmatprep.subr.mxu0 %v8479_v57 }
0x39bb   :  { %3747 = vmatpush1.msra.mxu0 %v8489_v14 }
0x39bc   :  { %3748 = vmatprep.subr.mxu0 %v8497_v42 }
0x39bd   :  { %3749 = vmatpush1.msra.mxu0 %v8507_v19 }
0x39be   :  { %3750 = vmatprep.subr.mxu0 %v8515_v40 }
0x39bf   :  { %3751 = vmatpush1.msra.mxu0 %v8523_v7 }
0x39c0   :  { %3940 = vmatprep.subr.mxu0 %v8391_v31 }
0x3a70   :  { %v3582_v27 = vpop.f32.mrf.mxu0 }
0x3a71   :  { %v3587_v21 = vadd.f32 %v3582_v27, %v8579_v26 }
0x3a72   :  { %v3584_v3 = vpop.f32.mrf.mxu0 }
0x3a73   :  { %v6184_v38 = vmul.f32 -1.442695, %v3587_v21  ;;  %v3588_v62 = vadd.f32 %v3584_v3, %v8584_v46 }
0x3a75   :  { %7317 = vpow2.f32 %v6184_v38  ;;  %v6185_v16 = vmul.f32 -1.442695, %v3588_v62 }
0x3a76   :  { %7319 = vtanh.f32 %v3588_v62 }
0x3a82   :  { %v7318_v63 = vpop.eup %7317 }
0x3a83   :  { %v3595_v30 = vadd.f32 1.0, %v7318_v63  ;;  %v7320_v20 = vpop.eup %7319 }
0x3a85   :  { %7321 = vrcp.f32 %v3595_v30 }
0x3a86   :  { %7323 = vpow2.f32 %v6185_v16 }
0x3a92   :  { %v7322_v59 = vpop.eup %7321 }
0x3a93   :  { %v3603_v37 = vmul.f32 %v7322_v59, %v7320_v20  ;;  %v7324_v31 = vpop.eup %7323  ;;  %v3602_v60 = vmul.f32 %v7322_v59, %v3506_v43 }
0x3a94   :  { %v3596_v10 = vadd.f32 1.0, %v7324_v31 }
0x3a95   :  { %3605 = vrot.lane.b32.xlu0 %v3603_v37, %s7478_s25 }
0x3a96   :  { %7325 = vrcp.f32 %v3596_v10 }
0x3aa3   :  { %v7326_v4 = vpop.eup %7325 }
0x3b07   :  { %v3606_v26 = vpop.permute.xlu0 %3605 }
0x3b08   :  { %v3608_v23 = vadd.f32 %v3606_v26, %v3602_v60 }
0x3b0a   :  { %7327 = vtanh.f32 %v3608_v23 }
0x3b17   :  { %v7328_v46 = vpop.eup %7327 }
0x3b18   :  { %v3610_v11 = vmul.f32 %v7328_v46, %v7326_v4 }
0x3b1a   :  { %3614 = vrot.lane.b32.xlu1 %v3610_v11, %s7478_s25 }
0x3b8c   :  { %v8721_v47 = vpop.permute.xlu1 %3614 }
0x3b8d   :  { %6186 = vmatmul.mubr.msk.f32.vlgmr.msra.gmra.mxu1 %vm3202_vm6, %v8721_v47 }
0x3b8e   :  { %3839 = vmatpush1.msra.mxu1 %v8400_v15  ;;  %3886 = vmatprep.mubr.f32.mxu1 %v7475_v6 }
0x3b8f   :  { %3840 = vmatprep.subr.mxu1 %v8407_v49 }
0x3b90   :  { %3841 = vmatpush1.msra.mxu1 %v8417_v39 }
0x3b91   :  { %3842 = vmatprep.subr.mxu1 %v8425_v44 }
0x3b92   :  { %3843 = vmatpush1.msra.mxu1 %v8435_v50 }
0x3b93   :  { %3844 = vmatprep.subr.mxu1 %v8443_v51 }
0x3b94   :  { %3845 = vmatpush1.msra.mxu1 %v8453_v24 }
0x3b95   :  { %3846 = vmatprep.subr.mxu1 %v8461_v52 }
0x3b96   :  { %3847 = vmatpush1.msra.mxu1 %v8471_v56 }
0x3b97   :  { %3848 = vmatprep.subr.mxu1 %v8479_v57 }
0x3b98   :  { %3849 = vmatpush1.msra.mxu1 %v8489_v14 }
0x3b99   :  { %3850 = vmatprep.subr.mxu1 %v8497_v42 }
0x3b9a   :  { %3851 = vmatpush1.msra.mxu1 %v8507_v19 }
0x3b9b   :  { %3852 = vmatprep.subr.mxu1 %v8515_v40 }
0x3b9c   :  { %3853 = vmatpush1.msra.mxu1 %v8523_v7 }
0x3c4d   :  { %v3684_v41 = vpop.f32.mrf.mxu1 }
0x3c4e   :  { %v3689_v17 = vadd.f32 %v3684_v41, %v8581_v48 }
0x3c4f   :  { %v3686_v33 = vpop.f32.mrf.mxu1 }
0x3c50   :  { %v6187_v12 = vmul.f32 -1.442695, %v3689_v17  ;;  %v3690_v1 = vadd.f32 %v3686_v33, %v8586_v55 }
0x3c52   :  { %7329 = vpow2.f32 %v6187_v12  ;;  %v6188_v43 = vmul.f32 -1.442695, %v3690_v1 }
0x3c53   :  { %7331 = vtanh.f32 %v3690_v1 }
0x3c5f   :  { %v7330_v34 = vpop.eup %7329 }
0x3c60   :  { %v3697_v32 = vadd.f32 1.0, %v7330_v34  ;;  %v7332_v9 = vpop.eup %7331 }
0x3c62   :  { %7333 = vrcp.f32 %v3697_v32 }
0x3c63   :  { %7335 = vpow2.f32 %v6188_v43 }
0x3c6f   :  { %v7334_v25 = vpop.eup %7333 }
0x3c70   :  { %v3705_v61 = vmul.f32 %v7334_v25, %v7332_v9  ;;  %v7336_v5 = vpop.eup %7335  ;;  %v3704_v45 = vmul.f32 %v7334_v25, %v3608_v23 }
0x3c71   :  { %v3698_v2 = vadd.f32 1.0, %v7336_v5 }
0x3c72   :  { %3707 = vrot.lane.b32.xlu0 %v3705_v61, %s7478_s25 }
0x3c73   :  { %7337 = vrcp.f32 %v3698_v2 }
0x3c80   :  { %v7338_v21 = vpop.eup %7337 }
0x3ce4   :  { %v3708_v48 = vpop.permute.xlu0 %3707 }
0x3ce5   :  { %v3710_v27 = vadd.f32 %v3708_v48, %v3704_v45 }
0x3ce7   :  { %7339 = vtanh.f32 %v3710_v27 }
0x3cf4   :  { %v7340_v55 = vpop.eup %7339 }
0x3cf5   :  { %v3712_v38 = vmul.f32 %v7340_v55, %v7338_v21  ;;  %v4218_v21 = vld [vmem:[%s9628_s18 + $0x78] sm:$0xff]  ;;  %v4051_v55 = vld [vmem:[%s9627_s17 + $0x68] sm:$0xff] }
0x3cf7   :  { %3716 = vrot.lane.b32.xlu1 %v3712_v38, %s7478_s25  ;;  %v4217_v38 = vld [vmem:[%s9628_s18 + $0x70] sm:$0xff] }
0x3d69   :  { %v8745_v3 = vpop.permute.xlu1 %3716 }
0x3d6a   :  { %6189 = vmatmul.mubr.msk.f32.vlgmr.msra.gmra.mxu0 %vm3202_vm6, %v8745_v3 }
0x3d6b   :  { %3941 = vmatpush1.msra.mxu0 %v8400_v15  ;;  %3988 = vmatprep.mubr.f32.mxu0 %v7475_v6 }
0x3d6c   :  { %3942 = vmatprep.subr.mxu0 %v8407_v49 }
0x3d6d   :  { %3943 = vmatpush1.msra.mxu0 %v8417_v39 }
0x3d6e   :  { %3944 = vmatprep.subr.mxu0 %v8425_v44 }
0x3d6f   :  { %3945 = vmatpush1.msra.mxu0 %v8435_v50 }
0x3d70   :  { %3946 = vmatprep.subr.mxu0 %v8443_v51 }
0x3d71   :  { %3947 = vmatpush1.msra.mxu0 %v8453_v24 }
0x3d72   :  { %3948 = vmatprep.subr.mxu0 %v8461_v52 }
0x3d73   :  { %3949 = vmatpush1.msra.mxu0 %v8471_v56 }
0x3d74   :  { %3950 = vmatprep.subr.mxu0 %v8479_v57 }
0x3d75   :  { %3951 = vmatpush1.msra.mxu0 %v8489_v14 }
0x3d76   :  { %3952 = vmatprep.subr.mxu0 %v8497_v42 }
0x3d77   :  { %3953 = vmatpush1.msra.mxu0 %v8507_v19 }
0x3d78   :  { %3954 = vmatprep.subr.mxu0 %v8515_v40 }
0x3d79   :  { %3955 = vmatpush1.msra.mxu0 %v8523_v7 }
0x3d7a   :  { %4235 = vmatprep.subr.mxu0 %v4218_v21  ;;  %v8985_v21 = vld [vmem:[%s9629_s19 + $0x30] sm:$0xff] }
0x3e2a   :  { %v3786_v15 = vpop.f32.mrf.mxu0 }
0x3e2b   :  { %v3791_v49 = vadd.f32 %v3786_v15, %v8635_v58  ;;  %v4050_v15 = vld [vmem:[%s9627_s17 + $0x60] sm:$0xff] }
0x3e2c   :  { %v3788_v44 = vpop.f32.mrf.mxu0 }
0x3e2d   :  { %v6190_v39 = vmul.f32 -1.442695, %v3791_v49  ;;  %v3792_v50 = vadd.f32 %v3788_v44, %v8638_v28  ;;  %v4216_v49 = vld [vmem:[%s9628_s18 + $0x68] sm:$0xff]  ;;  %v4215_v44 = vld [vmem:[%s9628_s18 + $0x60] sm:$0xff] }
0x3e2f   :  { %7341 = vpow2.f32 %v6190_v39  ;;  %v6191_v14 = vmul.f32 -1.442695, %v3792_v50  ;;  %v4049_v39 = vld [vmem:[%s9627_s17 + $0x58] sm:$0xff] }
0x3e30   :  { %7343 = vtanh.f32 %v3792_v50  ;;  %v4048_v50 = vld [vmem:[%s9627_s17 + $0x50] sm:$0xff] }
0x3e3c   :  { %v7342_v51 = vpop.eup %7341 }
0x3e3d   :  { %v3799_v24 = vadd.f32 1.0, %v7342_v51  ;;  %v7344_v52 = vpop.eup %7343  ;;  %v4214_v51 = vld [vmem:[%s9628_s18 + $0x58] sm:$0xff] }
0x3e3f   :  { %7345 = vrcp.f32 %v3799_v24  ;;  %v4047_v24 = vld [vmem:[%s9627_s17 + $0x48] sm:$0xff] }
0x3e40   :  { %7347 = vpow2.f32 %v6191_v14  ;;  %v4211_v14 = vld [vmem:[%s9628_s18 + $0x40] sm:$0xff] }
0x3e4c   :  { %v7346_v56 = vpop.eup %7345 }
0x3e4d   :  { %v3807_v57 = vmul.f32 %v7346_v56, %v7344_v52  ;;  %v7348_v42 = vpop.eup %7347  ;;  %v3806_v40 = vmul.f32 %v7346_v56, %v3710_v27  ;;  %v4213_v52 = vld [vmem:[%s9628_s18 + $0x50] sm:$0xff]  ;;  %v4212_v56 = vld [vmem:[%s9628_s18 + $0x48] sm:$0xff] }
0x3e4e   :  { %v3800_v19 = vadd.f32 1.0, %v7348_v42  ;;  %v4045_v42 = vld [vmem:[%s9627_s17 + $0x38] sm:$0xff] }
0x3e4f   :  { %3809 = vrot.lane.b32.xlu0 %v3807_v57, %s7478_s25  ;;  %v4046_v57 = vld [vmem:[%s9627_s17 + $0x40] sm:$0xff] }
0x3e50   :  { %7349 = vrcp.f32 %v3800_v19  ;;  %v4210_v19 = vld [vmem:[%s9628_s18 + $0x38] sm:$0xff] }
0x3e5d   :  { %v7350_v62 = vpop.eup %7349 }
0x3ec1   :  { %v3810_v7 = vpop.permute.xlu0 %3809 }
0x3ec2   :  { %v3812_v58 = vadd.f32 %v3810_v7, %v3806_v40  ;;  %v4044_v40 = vld [vmem:[%s9627_s17 + $0x30] sm:$0xff] }
0x3ec3   :  { %v4209_v7 = vld [vmem:[%s9628_s18 + $0x30] sm:$0xff] }
0x3ec4   :  { %7351 = vtanh.f32 %v3812_v58 }
0x3ed1   :  { %v7352_v28 = vpop.eup %7351 }
0x3ed2   :  { %v3814_v63 = vmul.f32 %v7352_v28, %v7350_v62  ;;  %v4208_v62 = vld [vmem:[%s9628_s18 + $0x28] sm:$0xff]  ;;  %v4042_v28 = vld [vmem:[%s9627_s17 + $0x20] sm:$0xff] }
0x3ed4   :  { %3818 = vrot.lane.b32.xlu1 %v3814_v63, %s7478_s25  ;;  %v4207_v63 = vld [vmem:[%s9628_s18 + $0x20] sm:$0xff] }
0x3f46   :  { %v8769_v30 = vpop.permute.xlu1 %3818 }
0x3f47   :  { %6192 = vmatmul.mubr.msk.f32.vlgmr.msra.gmra.mxu1 %vm3202_vm6, %v8769_v30 }
0x3f48   :  { %4154 = vmatprep.mubr.f32.mxu1 %v7475_v6 }
0x4007   :  { %v3888_v20 = vpop.f32.mrf.mxu1 }
0x4008   :  { %v3893_v59 = vadd.f32 %v3888_v20, %v8623_v29  ;;  %v4041_v20 = vld [vmem:[%s9627_s17 + $0x18] sm:$0xff] }
0x4009   :  { %v3890_v16 = vpop.f32.mrf.mxu1 }
0x400a   :  { %v6193_v37 = vmul.f32 -1.442695, %v3893_v59  ;;  %v3894_v31 = vadd.f32 %v3890_v16, %v8626_v35  ;;  %v4206_v59 = vld [vmem:[%s9628_s18 + $0x18] sm:$0xff]  ;;  %v4205_v16 = vld [vmem:[%s9628_s18 + $0x10] sm:$0xff] }
0x400c   :  { %7353 = vpow2.f32 %v6193_v37  ;;  %v6194_v46 = vmul.f32 -1.442695, %v3894_v31  ;;  %v4040_v37 = vld [vmem:[%s9627_s17 + $0x10] sm:$0xff] }
0x400d   :  { %7355 = vtanh.f32 %v3894_v31  ;;  %v4039_v31 = vld [vmem:[%s9627_s17 + $0x8] sm:$0xff] }
0x4019   :  { %v7354_v10 = vpop.eup %7353 }
0x401a   :  { %v3901_v60 = vadd.f32 1.0, %v7354_v10  ;;  %v7356_v26 = vpop.eup %7355  ;;  %v4204_v10 = vld [vmem:[%s9628_s18 + $0x8] sm:$0xff] }
0x401c   :  { %7357 = vrcp.f32 %v3901_v60  ;;  %v4038_v60 = vld [vmem:[%s9627_s17] sm:$0xff] }
0x401d   :  { %7359 = vpow2.f32 %v6194_v46 }
0x4029   :  { %v7358_v23 = vpop.eup %7357 }
0x402a   :  { %v3909_v4 = vmul.f32 %v7358_v23, %v7356_v26  ;;  %v7360_v11 = vpop.eup %7359  ;;  %v3908_v17 = vmul.f32 %v7358_v23, %v3812_v58  ;;  %v4043_v58 = vld [vmem:[%s9627_s17 + $0x28] sm:$0xff] }
0x402b   :  { %v3902_v41 = vadd.f32 1.0, %v7360_v11 }
0x402c   :  { %3911 = vrot.lane.b32.xlu0 %v3909_v4, %s7478_s25 }
0x402d   :  { %7361 = vrcp.f32 %v3902_v41 }
0x403a   :  { %v7362_v35 = vpop.eup %7361 }
0x409e   :  { %v3912_v29 = vpop.permute.xlu0 %3911 }
0x409f   :  { %v8777_v12 = vadd.f32 %v3912_v29, %v3908_v17  ;;  %v4203_v17 = vld [vmem:[%s9628_s18] sm:$0xff]  ;;  %v8897_v29 = vld [vmem:[%s9629_s19 + $0x78] sm:$0xff] }
0x40a1   :  { %7363 = vtanh.f32 %v8777_v12 }
0x40ae   :  { %v7364_v33 = vpop.eup %7363 }
0x40af   :  { %v3916_v1 = vmul.f32 %v7364_v33, %v7362_v35 }
0x40b1   :  { %3920 = vrot.lane.b32.xlu1 %v3916_v1, %s7478_s25 }
0x4123   :  { %v8781_v34 = vpop.permute.xlu1 %3920 }
0x4124   :  { %6195 = vmatmul.mubr.msk.f32.vlgmr.msra.gmra.mxu0 %vm3202_vm6, %v8781_v34 }
0x4125   :  { %4283 = vmatprep.mubr.f32.mxu0 %v7475_v6  ;;  %4236 = vmatpush1.msra.mxu0 %v4217_v38  ;;  %v8998_v38 = vld [vmem:[%s9629_s19 + $0x28] sm:$0xff] }
0x4126   :  { %4237 = vmatprep.subr.mxu0 %v4216_v49  ;;  %v9027_v49 = vld [vmem:[%s9629_s19 + $0x10] sm:$0xff] }
0x4127   :  { %4238 = vmatpush1.msra.mxu0 %v4215_v44 }
0x4128   :  { %4239 = vmatprep.subr.mxu0 %v4214_v51 }
0x4129   :  { %4240 = vmatpush1.msra.mxu0 %v4213_v52 }
0x412a   :  { %4241 = vmatprep.subr.mxu0 %v4212_v56 }
0x412b   :  { %4242 = vmatpush1.msra.mxu0 %v4211_v14 }
0x412c   :  { %4243 = vmatprep.subr.mxu0 %v4210_v19 }
0x412d   :  { %4244 = vmatpush1.msra.mxu0 %v4209_v7 }
0x412e   :  { %4245 = vmatprep.subr.mxu0 %v4208_v62 }
0x412f   :  { %4246 = vmatpush1.msra.mxu0 %v4207_v63 }
0x4130   :  { %4247 = vmatprep.subr.mxu0 %v4206_v59 }
0x4131   :  { %4248 = vmatpush1.msra.mxu0 %v4205_v16 }
0x4132   :  { %4249 = vmatprep.subr.mxu0 %v4204_v10 }
0x4133   :  { %4250 = vmatpush1.msra.mxu0 %v4203_v17 }
0x4134   :  { %4470 = vmatprep.subr.mxu0 %v8897_v29 }
0x41e4   :  { %v3990_v32 = vpop.f32.mrf.mxu0 }
0x41e5   :  { %v3995_v9 = vadd.f32 %v3990_v32, %v8629_v36  ;;  %v4053_v36 = vld [vmem:[%s9627_s17 + $0x78] sm:$0xff]  ;;  %v8907_v32 = vld [vmem:[%s9629_s19 + $0x70] sm:$0xff] }
0x41e6   :  { %v3992_v61 = vpop.f32.mrf.mxu0  ;;  %4106 = vmatprep.subr.mxu1 %v4053_v36  ;;  %v4033_v36 = vsel %vm498_vm4, %v8721_v47, %v8745_v3 }
0x41e7   :  { %v6196_v25 = vmul.f32 -1.442695, %v3995_v9  ;;  %v8788_v43 = vadd.f32 %v3992_v61, %v8632_v53  ;;  %v4052_v53 = vld [vmem:[%s9627_s17 + $0x70] sm:$0xff]  ;;  %v8922_v61 = vld [vmem:[%s9629_s19 + $0x60] sm:$0xff] }
0x41e8   :  { %4107 = vmatpush1.msra.mxu1 %v4052_v53  ;;  %v8977_v53 = vld [vmem:[%s9629_s19 + $0x38] sm:$0xff] }
0x41e9   :  { %7365 = vpow2.f32 %v6196_v25  ;;  %4108 = vmatprep.subr.mxu1 %v4051_v55  ;;  %v6197_v26 = vmul.f32 -1.442695, %v8788_v43  ;;  %v8915_v25 = vld [vmem:[%s9629_s19 + $0x68] sm:$0xff]  ;;  %v4034_v55 = vsel %vm498_vm4, %v8745_v3, %v8721_v47  ;;  %v4035_v47 = vsel %vm498_vm4, %v8769_v30, %v8696_v54  ;;  %v9019_v3 = vld [vmem:[%s9629_s19 + $0x18] sm:$0xff] }
0x41ea   :  { %7367 = vtanh.f32 %v8788_v43  ;;  %4109 = vmatpush1.msra.mxu1 %v4050_v15  ;;  %v4031_v43 = vsel %vm498_vm4, %v8671_v0, %v8781_v34  ;;  %v9006_v15 = vld [vmem:[%s9629_s19 + $0x20] sm:$0xff] }
0x41eb   :  { %4110 = vmatprep.subr.mxu1 %v4049_v39  ;;  %v9048_v39 = vld [vmem:[%s9629_s19] sm:$0xff] }
0x41ec   :  { %4111 = vmatpush1.msra.mxu1 %v4048_v50 }
0x41ed   :  { %4112 = vmatprep.subr.mxu1 %v4047_v24 }
0x41ee   :  { %4113 = vmatpush1.msra.mxu1 %v4046_v57 }
0x41ef   :  { %4114 = vmatprep.subr.mxu1 %v4045_v42 }
0x41f0   :  { %4115 = vmatpush1.msra.mxu1 %v4044_v40 }
0x41f1   :  { %4116 = vmatprep.subr.mxu1 %v4043_v58 }
0x41f2   :  { %4117 = vmatpush1.msra.mxu1 %v4042_v28 }
0x41f3   :  { %4118 = vmatprep.subr.mxu1 %v4041_v20 }
0x41f4   :  { %4119 = vmatpush1.msra.mxu1 %v4040_v37 }
0x41f5   :  { %4120 = vmatprep.subr.mxu1 %v4039_v31 }
0x41f6   :  { %v7366_v5 = vpop.eup %7365  ;;  %4121 = vmatpush1.msra.mxu1 %v4038_v60 }
0x41f7   :  { %v4003_v2 = vadd.f32 1.0, %v7366_v5  ;;  %v7368_v45 = vpop.eup %7367  ;;  %4368 = vmatprep.subr.mxu1 %v8897_v29  ;;  %v8935_v5 = vld [vmem:[%s9629_s19 + $0x58] sm:$0xff] }
0x41f9   :  { %7369 = vrcp.f32 %v4003_v2  ;;  %v8943_v2 = vld [vmem:[%s9629_s19 + $0x50] sm:$0xff] }
0x41fa   :  { %7371 = vpow2.f32 %v6197_v26 }
0x4206   :  { %v8791_v48 = vpop.eup %7369 }
0x4207   :  { %v4011_v27 = vmul.f32 %v8791_v48, %v7368_v45  ;;  %v7372_v23 = vpop.eup %7371  ;;  %v4010_v46 = vmul.f32 %v8791_v48, %v8777_v12  ;;  %v4032_v45 = vsel %vm498_vm4, %v8696_v54, %v8769_v30  ;;  %v8956_v48 = vld [vmem:[%s9629_s19 + $0x48] sm:$0xff]  ;;  %v4036_v54 = vsel %vm498_vm4, %v8781_v34, %v8671_v0 }
0x4208   :  { %v4004_v4 = vadd.f32 1.0, %v7372_v23  ;;  %v9040_v30 = vld [vmem:[%s9629_s19 + $0x8] sm:$0xff] }
0x4209   :  { %4013 = vrot.lane.b32.xlu0 %v4011_v27, %s7478_s25  ;;  %v8964_v27 = vld [vmem:[%s9629_s19 + $0x40] sm:$0xff] }
0x420a   :  { %7373 = vrcp.f32 %v4004_v4 }
0x4217   :  { %v7374_v35 = vpop.eup %7373 }
0x427b   :  { %v4014_v11 = vpop.permute.xlu0 %4013 }
0x427c   :  { %v4016_v41 = vadd.f32 %v4014_v11, %v4010_v46 }
0x427e   :  { %7375 = vtanh.f32 %v4016_v41 }
0x428b   :  { %v7376_v12 = vpop.eup %7375 }
0x428c   :  { %v4018_v33 = vmul.f32 %v7376_v12, %v7374_v35 }
0x428e   :  { %4020 = vrot.lane.b32.xlu1 %v4018_v33, %s7478_s25 }
0x4300   :  { %v8902_v1 = vpop.permute.xlu1 %4020 }
0x4301   :  { %v4030_v9 = vsel %vm498_vm4, %v8646_v18, %v8902_v1  ;;  %v4037_v0 = vsel %vm498_vm4, %v8902_v1, %v8646_v18  ;;  %v4054_v18 = vld [vmem:[%s9630_s20] sm:$0x3] }
0x4302   :  { %6198 = vmatmul.mubr.msk.f32.vlgmr.msra.gmra.mxu1 %vm3202_vm6, %v4030_v9  ;;  %6206 = vmatmul.mubr.msk.f32.vlgmr.msra.gmra.mxu0 %vm3202_vm6, %v4030_v9  ;;  %v4059_v24 = vrot.slane %v4054_v18, %v2911_v22  ;;  %v4063_v57 = vrot.slane %v4054_v18, %v2915_v13 }
0x4303   :  { %4369 = vmatpush1.msra.mxu1 %v8907_v32  ;;  %4160 = vmatprep.mubr.f32.mxu1 %v7475_v6 }
0x4304   :  { %4289 = vmatprep.mubr.f32.mxu0 %v7475_v6  ;;  %4370 = vmatprep.subr.mxu1 %v8915_v25 }
0x4305   :  { %4371 = vmatpush1.msra.mxu1 %v8922_v61  ;;  %4471 = vmatpush1.msra.mxu0 %v8907_v32 }
0x4306   :  { %6199 = vmatmul.mubr.msk.f32.gmra.mxu1 %vm3202_vm6, %v4031_v43  ;;  %6207 = vmatmul.mubr.msk.f32.gmra.mxu0 %vm3202_vm6, %v4031_v43 }
0x4307   :  { %4166 = vmatprep.mubr.f32.mxu1 %v7475_v6  ;;  %4295 = vmatprep.mubr.f32.mxu0 %v7475_v6 }
0x4308   :  { %4372 = vmatprep.subr.mxu1 %v8935_v5  ;;  %4472 = vmatprep.subr.mxu0 %v8915_v25 }
0x4309   :  { %4373 = vmatpush1.msra.mxu1 %v8943_v2  ;;  %4473 = vmatpush1.msra.mxu0 %v8922_v61 }
0x430a   :  { %6200 = vmatmul.mubr.msk.f32.gmra.mxu1 %vm3202_vm6, %v4032_v45  ;;  %6208 = vmatmul.mubr.msk.f32.gmra.mxu0 %vm3202_vm6, %v4032_v45 }
0x430b   :  { %4172 = vmatprep.mubr.f32.mxu1 %v7475_v6  ;;  %4301 = vmatprep.mubr.f32.mxu0 %v7475_v6 }
0x430c   :  { %4374 = vmatprep.subr.mxu1 %v8956_v48  ;;  %4474 = vmatprep.subr.mxu0 %v8935_v5 }
0x430d   :  { %4375 = vmatpush1.msra.mxu1 %v8964_v27  ;;  %4475 = vmatpush1.msra.mxu0 %v8943_v2 }
0x430e   :  { %6201 = vmatmul.mubr.msk.f32.gmra.mxu1 %vm3202_vm6, %v4033_v36  ;;  %6209 = vmatmul.mubr.msk.f32.gmra.mxu0 %vm3202_vm6, %v4033_v36 }
0x430f   :  { %4178 = vmatprep.mubr.f32.mxu1 %v7475_v6  ;;  %4307 = vmatprep.mubr.f32.mxu0 %v7475_v6 }
0x4310   :  { %4376 = vmatprep.subr.mxu1 %v8977_v53  ;;  %4476 = vmatprep.subr.mxu0 %v8956_v48 }
0x4311   :  { %4377 = vmatpush1.msra.mxu1 %v8985_v21  ;;  %4477 = vmatpush1.msra.mxu0 %v8964_v27 }
0x4312   :  { %6202 = vmatmul.mubr.msk.f32.gmra.mxu1 %vm3202_vm6, %v4034_v55  ;;  %6210 = vmatmul.mubr.msk.f32.gmra.mxu0 %vm3202_vm6, %v4034_v55 }
0x4313   :  { %4184 = vmatprep.mubr.f32.mxu1 %v7475_v6  ;;  %4313 = vmatprep.mubr.f32.mxu0 %v7475_v6 }
0x4314   :  { %4378 = vmatprep.subr.mxu1 %v8998_v38  ;;  %4478 = vmatprep.subr.mxu0 %v8977_v53 }
0x4315   :  { %4379 = vmatpush1.msra.mxu1 %v9006_v15  ;;  %4479 = vmatpush1.msra.mxu0 %v8985_v21 }
0x4316   :  { %6203 = vmatmul.mubr.msk.f32.gmra.mxu1 %vm3202_vm6, %v4035_v47  ;;  %6211 = vmatmul.mubr.msk.f32.gmra.mxu0 %vm3202_vm6, %v4035_v47 }
0x4317   :  { %4190 = vmatprep.mubr.f32.mxu1 %v7475_v6  ;;  %4319 = vmatprep.mubr.f32.mxu0 %v7475_v6 }
0x4318   :  { %4380 = vmatprep.subr.mxu1 %v9019_v3  ;;  %4480 = vmatprep.subr.mxu0 %v8998_v38 }
0x4319   :  { %4381 = vmatpush1.msra.mxu1 %v9027_v49  ;;  %4481 = vmatpush1.msra.mxu0 %v9006_v15 }
0x431a   :  { %6204 = vmatmul.mubr.msk.f32.gmra.mxu1 %vm3202_vm6, %v4036_v54  ;;  %6212 = vmatmul.mubr.msk.f32.gmra.mxu0 %vm3202_vm6, %v4036_v54 }
0x431b   :  { %4196 = vmatprep.mubr.f32.mxu1 %v7475_v6  ;;  %4325 = vmatprep.mubr.f32.mxu0 %v7475_v6 }
0x431c   :  { %4382 = vmatprep.subr.mxu1 %v9040_v30  ;;  %4482 = vmatprep.subr.mxu0 %v9019_v3 }
0x431d   :  { %4383 = vmatpush1.msra.mxu1 %v9048_v39  ;;  %4483 = vmatpush1.msra.mxu0 %v9027_v49 }
0x431e   :  { %6205 = vmatmul.mubr.msk.f32.gmra.mxu1 %vm3202_vm6, %v4037_v0  ;;  %6213 = vmatmul.mubr.msk.f32.gmra.mxu0 %vm3202_vm6, %v4037_v0 }
0x431f   :  { %4416 = vmatprep.mubr.f32.mxu1 %v7475_v6  ;;  %4484 = vmatprep.subr.mxu0 %v9040_v30 }
0x4320   :  { %4485 = vmatpush1.msra.mxu0 %v9048_v39  ;;  %4518 = vmatprep.mubr.f32.mxu0 %v7475_v6 }
0x4321   :  { %4572 = vmatprep.subr.mxu1 %v8897_v29  ;;  %4674 = vmatprep.subr.mxu0 %v8897_v29 }
0x4322   :  { %4417 = vmatmul.mubr.f32.vlgmr.msra.gmra.mxu1 %v7475_v6 }
0x4323   :  { %4573 = vmatpush1.msra.mxu1 %v8907_v32  ;;  %4620 = vmatprep.mubr.f32.mxu1 %v7475_v6 }
0x4324   :  { %4574 = vmatprep.subr.mxu1 %v8915_v25 }
0x4325   :  { %4575 = vmatpush1.msra.mxu1 %v8922_v61 }
0x4326   :  { %4576 = vmatprep.subr.mxu1 %v8935_v5 }
0x4327   :  { %4577 = vmatpush1.msra.mxu1 %v8943_v2 }
0x4328   :  { %4578 = vmatprep.subr.mxu1 %v8956_v48 }
0x4329   :  { %4579 = vmatpush1.msra.mxu1 %v8964_v27 }
0x432a   :  { %4580 = vmatprep.subr.mxu1 %v8977_v53 }
0x432b   :  { %4581 = vmatpush1.msra.mxu1 %v8985_v21 }
0x432c   :  { %4582 = vmatprep.subr.mxu1 %v8998_v38 }
0x432d   :  { %4583 = vmatpush1.msra.mxu1 %v9006_v15 }
0x432e   :  { %4584 = vmatprep.subr.mxu1 %v9019_v3 }
0x432f   :  { %4585 = vmatpush1.msra.mxu1 %v9027_v49 }
0x4330   :  { %4586 = vmatprep.subr.mxu1 %v9040_v30 }
0x4331   :  { %4587 = vmatpush1.msra.mxu1 %v9048_v39 }
0x4332   :  { %4776 = vmatprep.subr.mxu1 %v8897_v29 }
0x43c2   :  { %v4156_v34 = vpop.f32.mrf.mxu1  ;;  %v4285_v44 = vpop.f32.mrf.mxu0 }
0x43c4   :  { %v9088_v50 = vpop.f32.mrf.mxu1  ;;  %v4287_v51 = vpop.f32.mrf.mxu0 }
0x43c6   :  { %v4162_v52 = vpop.f32.mrf.mxu1  ;;  %v4291_v56 = vpop.f32.mrf.mxu0 }
0x43c7   :  { %v4163_v14 = vadd.f32 %v4162_v52, %v4059_v24 }
0x43c8   :  { %v4164_v42 = vpop.f32.mrf.mxu1  ;;  %v4293_v19 = vpop.f32.mrf.mxu0 }
0x43c9   :  { %v4165_v40 = vadd.f32 %v4164_v42, %v4063_v57 }
0x43ca   :  { %v4168_v7 = vpop.f32.mrf.mxu1  ;;  %v4297_v58 = vpop.f32.mrf.mxu0 }
0x43cb   :  { %v4169_v62 = vadd.f32 %v4168_v7, %v4059_v24 }
0x43cc   :  { %v4170_v28 = vpop.f32.mrf.mxu1  ;;  %v4299_v63 = vpop.f32.mrf.mxu0 }
0x43cd   :  { %v4171_v20 = vadd.f32 %v4170_v28, %v4063_v57 }
0x43ce   :  { %v4174_v59 = vpop.f32.mrf.mxu1  ;;  %v4303_v37 = vpop.f32.mrf.mxu0 }
0x43cf   :  { %v4175_v16 = vadd.f32 %v4174_v59, %v4059_v24 }
0x43d0   :  { %v4176_v31 = vpop.f32.mrf.mxu1  ;;  %v4305_v22 = vpop.f32.mrf.mxu0 }
0x43d1   :  { %v4177_v10 = vadd.f32 %v4176_v31, %v4063_v57 }
0x43d2   :  { %v4180_v60 = vpop.f32.mrf.mxu1  ;;  %v4309_v26 = vpop.f32.mrf.mxu0 }
0x43d3   :  { %v4181_v8 = vadd.f32 %v4180_v60, %v4059_v24  ;;  %v9094_v13 = vadd.f32 %v4309_v26, %v4175_v16 }
0x43d4   :  { %v4182_v23 = vpop.f32.mrf.mxu1  ;;  %v4311_v4 = vpop.f32.mrf.mxu0 }
0x43d5   :  { %v4183_v46 = vadd.f32 %v4182_v23, %v4063_v57  ;;  %v9096_v11 = vadd.f32 %v4311_v4, %v4177_v10  ;;  %v9098_v41 = vadd.f32 %v4303_v37, %v4181_v8 }
0x43d6   :  { %v4186_v17 = vpop.f32.mrf.mxu1  ;;  %v4315_v35 = vpop.f32.mrf.mxu0 }
0x43d7   :  { %v4187_v12 = vadd.f32 %v4186_v17, %v4059_v24  ;;  %v9100_v33 = vadd.f32 %v4315_v35, %v4169_v62  ;;  %v9102_v1 = vadd.f32 %v4305_v22, %v4183_v46 }
0x43d8   :  { %v4188_v9 = vpop.f32.mrf.mxu1  ;;  %v4317_v43 = vpop.f32.mrf.mxu0 }
0x43d9   :  { %v4189_v45 = vadd.f32 %v4188_v9, %v4063_v57  ;;  %v9104_v36 = vadd.f32 %v4317_v43, %v4171_v20  ;;  %v9106_v55 = vadd.f32 %v4297_v58, %v4187_v12  ;;  %v4157_v20 = vadd.f32 %v4156_v34, %v4059_v24 }
0x43da   :  { %v4192_v47 = vpop.f32.mrf.mxu1  ;;  %v4321_v54 = vpop.f32.mrf.mxu0 }
0x43db   :  { %v4193_v0 = vadd.f32 %v4192_v47, %v4059_v24  ;;  %v9108_v18 = vadd.f32 %v4321_v54, %v4163_v14  ;;  %v9110_v52 = vadd.f32 %v4299_v63, %v4189_v45 }
0x43dc   :  { %v4194_v42 = vpop.f32.mrf.mxu1  ;;  %v4323_v7 = vpop.f32.mrf.mxu0 }
0x43dd   :  { %v4195_v62 = vadd.f32 %v4194_v42, %v4063_v57  ;;  %v9112_v28 = vadd.f32 %v4323_v7, %v4165_v40  ;;  %v9114_v59 = vadd.f32 %v4291_v56, %v4193_v0  ;;  %v4159_v56 = vadd.f32 %v9088_v50, %v4063_v57 }
0x43de   :  { %v4198_v37 = vpop.f32.mrf.mxu1  ;;  %v4327_v16 = vpop.f32.mrf.mxu0 }
0x43df   :  { %v4199_v31 = vadd.f32 %v4198_v37, %v4059_v24  ;;  %v9116_v58 = vadd.f32 %v4293_v19, %v4195_v62  ;;  %v4348_v10 = vadd.f32 %v4327_v16, %v4157_v20 }
0x43e0   :  { %v4200_v22 = vpop.f32.mrf.mxu1  ;;  %v4329_v40 = vpop.f32.mrf.mxu0 }
0x43e1   :  { %v4201_v60 = vadd.f32 %v4200_v22, %v4063_v57  ;;  %v9118_v14 = vadd.f32 %v4285_v44, %v4199_v31  ;;  %v4349_v46 = vadd.f32 %v4329_v40, %v4159_v56 }
0x43e2   :  { %v4418_v63 = vpop.f32.mrf.mxu1 }
0x43e3   :  { %v4423_v26 = vadd.f32 %v4418_v63, %v4348_v10  ;;  %v9120_v8 = vadd.f32 %v4287_v51, %v4201_v60 }
0x43e4   :  { %v4420_v4 = vpop.f32.mrf.mxu1 }
0x43e5   :  { %v6214_v23 = vmul.f32 -1.442695, %v4423_v26  ;;  %v4424_v34 = vadd.f32 %v4420_v4, %v4349_v46 }
0x43e7   :  { %7377 = vpow2.f32 %v6214_v23  ;;  %v6215_v12 = vmul.f32 -1.442695, %v4424_v34 }
0x43e8   :  { %7379 = vtanh.f32 %v4424_v34 }
0x43f4   :  { %v7378_v24 = vpop.eup %7377 }
0x43f5   :  { %v4431_v19 = vadd.f32 1.0, %v7378_v24  ;;  %v7380_v17 = vpop.eup %7379 }
0x43f7   :  { %7381 = vrcp.f32 %v4431_v19 }
0x43f8   :  { %7383 = vpow2.f32 %v6215_v12 }
0x4404   :  { %v7382_v35 = vpop.eup %7381 }
0x4405   :  { %v4439_v44 = vmul.f32 %v7382_v35, %v7380_v17  ;;  %v7384_v51 = vpop.eup %7383  ;;  %v4438_v43 = vmul.f32 0.0, %v7382_v35 }
0x4406   :  { %v4432_v9 = vadd.f32 1.0, %v7384_v51 }
0x4407   :  { %4441 = vrot.lane.b32.xlu0 %v4439_v44, %s7478_s25 }
0x4408   :  { %7385 = vrcp.f32 %v4432_v9 }
0x4415   :  { %v7386_v50 = vpop.eup %7385 }
0x4479   :  { %v4442_v45 = vpop.permute.xlu0 %4441 }
0x447a   :  { %v4444_v47 = vadd.f32 %v4442_v45, %v4438_v43 }
0x447c   :  { %7387 = vtanh.f32 %v4444_v47 }
0x4489   :  { %v7388_v57 = vpop.eup %7387 }
0x448a   :  { %v4446_v54 = vmul.f32 %v7388_v57, %v7386_v50 }
0x448c   :  { %4450 = vrot.lane.b32.xlu1 %v4446_v54, %s7478_s25 }
0x44fe   :  { %v9125_v0 = vpop.permute.xlu1 %4450 }
0x44ff   :  { %6216 = vmatmul.mubr.msk.f32.vlgmr.msra.gmra.mxu0 %vm3202_vm6, %v9125_v0 }
0x4500   :  { %4675 = vmatpush1.msra.mxu0 %v8907_v32  ;;  %4722 = vmatprep.mubr.f32.mxu0 %v7475_v6 }
0x4501   :  { %4676 = vmatprep.subr.mxu0 %v8915_v25 }
0x4502   :  { %4677 = vmatpush1.msra.mxu0 %v8922_v61 }
0x4503   :  { %4678 = vmatprep.subr.mxu0 %v8935_v5 }
0x4504   :  { %4679 = vmatpush1.msra.mxu0 %v8943_v2 }
0x4505   :  { %4680 = vmatprep.subr.mxu0 %v8956_v48 }
0x4506   :  { %4681 = vmatpush1.msra.mxu0 %v8964_v27 }
0x4507   :  { %4682 = vmatprep.subr.mxu0 %v8977_v53 }
0x4508   :  { %4683 = vmatpush1.msra.mxu0 %v8985_v21 }
0x4509   :  { %4684 = vmatprep.subr.mxu0 %v8998_v38 }
0x450a   :  { %4685 = vmatpush1.msra.mxu0 %v9006_v15 }
0x450b   :  { %4686 = vmatprep.subr.mxu0 %v9019_v3 }
0x450c   :  { %4687 = vmatpush1.msra.mxu0 %v9027_v49 }
0x450d   :  { %4688 = vmatprep.subr.mxu0 %v9040_v30 }
0x450e   :  { %4689 = vmatpush1.msra.mxu0 %v9048_v39 }
0x450f   :  { %4878 = vmatprep.subr.mxu0 %v8897_v29 }
0x45bf   :  { %v4520_v42 = vpop.f32.mrf.mxu0 }
0x45c0   :  { %v4525_v7 = vadd.f32 %v4520_v42, %v9108_v18 }
0x45c1   :  { %v4522_v37 = vpop.f32.mrf.mxu0 }
0x45c2   :  { %v6217_v62 = vmul.f32 -1.442695, %v4525_v7  ;;  %v4526_v16 = vadd.f32 %v4522_v37, %v9112_v28 }
0x45c4   :  { %7389 = vpow2.f32 %v6217_v62  ;;  %v6218_v63 = vmul.f32 -1.442695, %v4526_v16 }
0x45c5   :  { %7391 = vtanh.f32 %v4526_v16 }
0x45d1   :  { %v7390_v20 = vpop.eup %7389 }
0x45d2   :  { %v4533_v31 = vadd.f32 1.0, %v7390_v20  ;;  %v7392_v22 = vpop.eup %7391 }
0x45d4   :  { %7393 = vrcp.f32 %v4533_v31 }
0x45d5   :  { %7395 = vpow2.f32 %v6218_v63 }
0x45e1   :  { %v7394_v10 = vpop.eup %7393 }
0x45e2   :  { %v4541_v60 = vmul.f32 %v7394_v10, %v7392_v22  ;;  %v7396_v26 = vpop.eup %7395  ;;  %v4540_v40 = vmul.f32 %v7394_v10, %v4444_v47 }
0x45e3   :  { %v4534_v23 = vadd.f32 1.0, %v7396_v26 }
0x45e4   :  { %4543 = vrot.lane.b32.xlu0 %v4541_v60, %s7478_s25 }
0x45e5   :  { %7397 = vrcp.f32 %v4534_v23 }
0x45f2   :  { %v7398_v4 = vpop.eup %7397 }
0x4656   :  { %v4544_v18 = vpop.permute.xlu0 %4543 }
0x4657   :  { %v4546_v56 = vadd.f32 %v4544_v18, %v4540_v40 }
0x4659   :  { %7399 = vtanh.f32 %v4546_v56 }
0x4666   :  { %v7400_v28 = vpop.eup %7399 }
0x4667   :  { %v4548_v46 = vmul.f32 %v7400_v28, %v7398_v4 }
0x4669   :  { %4552 = vrot.lane.b32.xlu1 %v4548_v46, %s7478_s25 }
0x46db   :  { %v9150_v34 = vpop.permute.xlu1 %4552 }
0x46dc   :  { %6219 = vmatmul.mubr.msk.f32.vlgmr.msra.gmra.mxu1 %vm3202_vm6, %v9150_v34 }
0x46dd   :  { %4777 = vmatpush1.msra.mxu1 %v8907_v32  ;;  %4824 = vmatprep.mubr.f32.mxu1 %v7475_v6 }
0x46de   :  { %4778 = vmatprep.subr.mxu1 %v8915_v25 }
0x46df   :  { %4779 = vmatpush1.msra.mxu1 %v8922_v61 }
0x46e0   :  { %4780 = vmatprep.subr.mxu1 %v8935_v5 }
0x46e1   :  { %4781 = vmatpush1.msra.mxu1 %v8943_v2 }
0x46e2   :  { %4782 = vmatprep.subr.mxu1 %v8956_v48 }
0x46e3   :  { %4783 = vmatpush1.msra.mxu1 %v8964_v27 }
0x46e4   :  { %4784 = vmatprep.subr.mxu1 %v8977_v53 }
0x46e5   :  { %4785 = vmatpush1.msra.mxu1 %v8985_v21 }
0x46e6   :  { %4786 = vmatprep.subr.mxu1 %v8998_v38 }
0x46e7   :  { %4787 = vmatpush1.msra.mxu1 %v9006_v15 }
0x46e8   :  { %4788 = vmatprep.subr.mxu1 %v9019_v3 }
0x46e9   :  { %4789 = vmatpush1.msra.mxu1 %v9027_v49 }
0x46ea   :  { %4790 = vmatprep.subr.mxu1 %v9040_v30 }
0x46eb   :  { %4791 = vmatpush1.msra.mxu1 %v9048_v39 }
0x46ec   :  { %4980 = vmatprep.subr.mxu1 %v8897_v29 }
0x479c   :  { %v4622_v24 = vpop.f32.mrf.mxu1 }
0x479d   :  { %v4627_v19 = vadd.f32 %v4622_v24, %v9100_v33 }
0x479e   :  { %v4624_v35 = vpop.f32.mrf.mxu1 }
0x479f   :  { %v6220_v17 = vmul.f32 -1.442695, %v4627_v19  ;;  %v4628_v44 = vadd.f32 %v4624_v35, %v9104_v36 }
0x47a1   :  { %7401 = vpow2.f32 %v6220_v17  ;;  %v6221_v47 = vmul.f32 -1.442695, %v4628_v44 }
0x47a2   :  { %7403 = vtanh.f32 %v4628_v44 }
0x47ae   :  { %v7402_v12 = vpop.eup %7401 }
0x47af   :  { %v4635_v51 = vadd.f32 1.0, %v7402_v12  ;;  %v7404_v9 = vpop.eup %7403 }
0x47b1   :  { %7405 = vrcp.f32 %v4635_v51 }
0x47b2   :  { %7407 = vpow2.f32 %v6221_v47 }
0x47be   :  { %v7406_v43 = vpop.eup %7405 }
0x47bf   :  { %v4643_v45 = vmul.f32 %v7406_v43, %v7404_v9  ;;  %v7408_v50 = vpop.eup %7407  ;;  %v4642_v54 = vmul.f32 %v7406_v43, %v4546_v56 }
0x47c0   :  { %v4636_v57 = vadd.f32 1.0, %v7408_v50 }
0x47c1   :  { %4645 = vrot.lane.b32.xlu0 %v4643_v45, %s7478_s25 }
0x47c2   :  { %7409 = vrcp.f32 %v4636_v57 }
0x47cf   :  { %v7410_v7 = vpop.eup %7409 }
0x4833   :  { %v4646_v33 = vpop.permute.xlu0 %4645 }
0x4834   :  { %v4648_v42 = vadd.f32 %v4646_v33, %v4642_v54 }
0x4836   :  { %7411 = vtanh.f32 %v4648_v42 }
0x4843   :  { %v7412_v36 = vpop.eup %7411 }
0x4844   :  { %v4650_v62 = vmul.f32 %v7412_v36, %v7410_v7 }
0x4846   :  { %4654 = vrot.lane.b32.xlu1 %v4650_v62, %s7478_s25 }
0x48b8   :  { %v9175_v37 = vpop.permute.xlu1 %4654 }
0x48b9   :  { %6222 = vmatmul.mubr.msk.f32.vlgmr.msra.gmra.mxu0 %vm3202_vm6, %v9175_v37 }
0x48ba   :  { %4879 = vmatpush1.msra.mxu0 %v8907_v32  ;;  %4926 = vmatprep.mubr.f32.mxu0 %v7475_v6 }
0x48bb   :  { %4880 = vmatprep.subr.mxu0 %v8915_v25 }
0x48bc   :  { %4881 = vmatpush1.msra.mxu0 %v8922_v61 }
0x48bd   :  { %4882 = vmatprep.subr.mxu0 %v8935_v5 }
0x48be   :  { %4883 = vmatpush1.msra.mxu0 %v8943_v2 }
0x48bf   :  { %4884 = vmatprep.subr.mxu0 %v8956_v48 }
0x48c0   :  { %4885 = vmatpush1.msra.mxu0 %v8964_v27 }
0x48c1   :  { %4886 = vmatprep.subr.mxu0 %v8977_v53 }
0x48c2   :  { %4887 = vmatpush1.msra.mxu0 %v8985_v21 }
0x48c3   :  { %4888 = vmatprep.subr.mxu0 %v8998_v38 }
0x48c4   :  { %4889 = vmatpush1.msra.mxu0 %v9006_v15 }
0x48c5   :  { %4890 = vmatprep.subr.mxu0 %v9019_v3 }
0x48c6   :  { %4891 = vmatpush1.msra.mxu0 %v9027_v49 }
0x48c7   :  { %4892 = vmatprep.subr.mxu0 %v9040_v30 }
0x48c8   :  { %4893 = vmatpush1.msra.mxu0 %v9048_v39 }
0x48c9   :  { %5082 = vmatprep.subr.mxu0 %v8897_v29 }
0x4979   :  { %v4724_v16 = vpop.f32.mrf.mxu0 }
0x497a   :  { %v4729_v20 = vadd.f32 %v4724_v16, %v9094_v13 }
0x497b   :  { %v4726_v22 = vpop.f32.mrf.mxu0 }
0x497c   :  { %v6223_v31 = vmul.f32 -1.442695, %v4729_v20  ;;  %v4730_v10 = vadd.f32 %v4726_v22, %v9096_v11 }
0x497e   :  { %7413 = vpow2.f32 %v6223_v31  ;;  %v6224_v18 = vmul.f32 -1.442695, %v4730_v10 }
0x497f   :  { %7415 = vtanh.f32 %v4730_v10 }
0x498b   :  { %v7414_v60 = vpop.eup %7413 }
0x498c   :  { %v4737_v63 = vadd.f32 1.0, %v7414_v60  ;;  %v7416_v26 = vpop.eup %7415 }
0x498e   :  { %7417 = vrcp.f32 %v4737_v63 }
0x498f   :  { %7419 = vpow2.f32 %v6224_v18 }
0x499b   :  { %v7418_v23 = vpop.eup %7417 }
0x499c   :  { %v4745_v40 = vmul.f32 %v7418_v23, %v7416_v26  ;;  %v7420_v29 = vpop.eup %7419  ;;  %v4744_v4 = vmul.f32 %v7418_v23, %v4648_v42 }
0x499d   :  { %v4738_v56 = vadd.f32 1.0, %v7420_v29 }
0x499e   :  { %4747 = vrot.lane.b32.xlu0 %v4745_v40, %s7478_s25 }
0x499f   :  { %7421 = vrcp.f32 %v4738_v56 }
0x49ac   :  { %v7422_v46 = vpop.eup %7421 }
0x4a10   :  { %v4748_v13 = vpop.permute.xlu0 %4747 }
0x4a11   :  { %v4750_v28 = vadd.f32 %v4748_v13, %v4744_v4 }
0x4a13   :  { %7423 = vtanh.f32 %v4750_v28 }
0x4a20   :  { %v7424_v11 = vpop.eup %7423 }
0x4a21   :  { %v4752_v24 = vmul.f32 %v7424_v11, %v7422_v46 }
0x4a23   :  { %4756 = vrot.lane.b32.xlu1 %v4752_v24, %s7478_s25 }
0x4a95   :  { %v9200_v19 = vpop.permute.xlu1 %4756 }
0x4a96   :  { %6225 = vmatmul.mubr.msk.f32.vlgmr.msra.gmra.mxu1 %vm3202_vm6, %v9200_v19 }
0x4a97   :  { %4981 = vmatpush1.msra.mxu1 %v8907_v32  ;;  %5028 = vmatprep.mubr.f32.mxu1 %v7475_v6 }
0x4a98   :  { %4982 = vmatprep.subr.mxu1 %v8915_v25 }
0x4a99   :  { %4983 = vmatpush1.msra.mxu1 %v8922_v61 }
0x4a9a   :  { %4984 = vmatprep.subr.mxu1 %v8935_v5 }
0x4a9b   :  { %4985 = vmatpush1.msra.mxu1 %v8943_v2 }
0x4a9c   :  { %4986 = vmatprep.subr.mxu1 %v8956_v48 }
0x4a9d   :  { %4987 = vmatpush1.msra.mxu1 %v8964_v27 }
0x4a9e   :  { %4988 = vmatprep.subr.mxu1 %v8977_v53 }
0x4a9f   :  { %4989 = vmatpush1.msra.mxu1 %v8985_v21 }
0x4aa0   :  { %4990 = vmatprep.subr.mxu1 %v8998_v38 }
0x4aa1   :  { %4991 = vmatpush1.msra.mxu1 %v9006_v15 }
0x4aa2   :  { %4992 = vmatprep.subr.mxu1 %v9019_v3 }
0x4aa3   :  { %4993 = vmatpush1.msra.mxu1 %v9027_v49 }
0x4aa4   :  { %4994 = vmatprep.subr.mxu1 %v9040_v30 }
0x4aa5   :  { %4995 = vmatpush1.msra.mxu1 %v9048_v39 }
0x4b56   :  { %v4826_v17 = vpop.f32.mrf.mxu1 }
0x4b57   :  { %v4831_v35 = vadd.f32 %v4826_v17, %v9098_v41 }
0x4b58   :  { %v4828_v12 = vpop.f32.mrf.mxu1 }
0x4b59   :  { %v6226_v44 = vmul.f32 -1.442695, %v4831_v35  ;;  %v4832_v51 = vadd.f32 %v4828_v12, %v9102_v1 }
0x4b5b   :  { %7425 = vpow2.f32 %v6226_v44  ;;  %v6227_v57 = vmul.f32 -1.442695, %v4832_v51 }
0x4b5c   :  { %7427 = vtanh.f32 %v4832_v51 }
0x4b68   :  { %v7426_v9 = vpop.eup %7425 }
0x4b69   :  { %v4839_v43 = vadd.f32 1.0, %v7426_v9  ;;  %v7428_v45 = vpop.eup %7427 }
0x4b6b   :  { %7429 = vrcp.f32 %v4839_v43 }
0x4b6c   :  { %7431 = vpow2.f32 %v6227_v57 }
0x4b78   :  { %v7430_v47 = vpop.eup %7429 }
0x4b79   :  { %v4847_v50 = vmul.f32 %v7430_v47, %v7428_v45  ;;  %v7432_v54 = vpop.eup %7431  ;;  %v4846_v42 = vmul.f32 %v7430_v47, %v4750_v28 }
0x4b7a   :  { %v4840_v33 = vadd.f32 1.0, %v7432_v54 }
0x4b7b   :  { %4849 = vrot.lane.b32.xlu0 %v4847_v50, %s7478_s25 }
0x4b7c   :  { %7433 = vrcp.f32 %v4840_v33 }
0x4b89   :  { %v7434_v36 = vpop.eup %7433 }
0x4bed   :  { %v4850_v41 = vpop.permute.xlu0 %4849 }
0x4bee   :  { %v4852_v7 = vadd.f32 %v4850_v41, %v4846_v42  ;;  %v5194_v42 = vld [vmem:[%s9631_s21 + $0x70] sm:$0xff] }
0x4bef   :  { %v5186_v41 = vld [vmem:[%s9631_s21 + $0x30] sm:$0xff] }
0x4bf0   :  { %7435 = vtanh.f32 %v4852_v7 }
0x4bfd   :  { %v7436_v1 = vpop.eup %7435 }
0x4bfe   :  { %v4854_v62 = vmul.f32 %v7436_v1, %v7434_v36  ;;  %v5185_v36 = vld [vmem:[%s9631_s21 + $0x28] sm:$0xff]  ;;  %v5192_v1 = vld [vmem:[%s9631_s21 + $0x60] sm:$0xff] }
0x4c00   :  { %4858 = vrot.lane.b32.xlu1 %v4854_v62, %s7478_s25  ;;  %v5184_v62 = vld [vmem:[%s9631_s21 + $0x20] sm:$0xff] }
0x4c72   :  { %v9224_v16 = vpop.permute.xlu1 %4858 }
0x4c73   :  { %6228 = vmatmul.mubr.msk.f32.vlgmr.msra.gmra.mxu0 %vm3202_vm6, %v9224_v16 }
0x4c74   :  { %5083 = vmatpush1.msra.mxu0 %v8907_v32  ;;  %5130 = vmatprep.mubr.f32.mxu0 %v7475_v6 }
0x4c75   :  { %5084 = vmatprep.subr.mxu0 %v8915_v25 }
0x4c76   :  { %5085 = vmatpush1.msra.mxu0 %v8922_v61 }
0x4c77   :  { %5086 = vmatprep.subr.mxu0 %v8935_v5 }
0x4c78   :  { %5087 = vmatpush1.msra.mxu0 %v8943_v2 }
0x4c79   :  { %5088 = vmatprep.subr.mxu0 %v8956_v48 }
0x4c7a   :  { %5089 = vmatpush1.msra.mxu0 %v8964_v27 }
0x4c7b   :  { %5090 = vmatprep.subr.mxu0 %v8977_v53 }
0x4c7c   :  { %5091 = vmatpush1.msra.mxu0 %v8985_v21 }
0x4c7d   :  { %5092 = vmatprep.subr.mxu0 %v8998_v38 }
0x4c7e   :  { %5093 = vmatpush1.msra.mxu0 %v9006_v15 }
0x4c7f   :  { %5094 = vmatprep.subr.mxu0 %v9019_v3 }
0x4c80   :  { %5095 = vmatpush1.msra.mxu0 %v9027_v49 }
0x4c81   :  { %5096 = vmatprep.subr.mxu0 %v9040_v30 }
0x4c82   :  { %5097 = vmatpush1.msra.mxu0 %v9048_v39 }
0x4d33   :  { %v4928_v32 = vpop.f32.mrf.mxu0 }
0x4d34   :  { %v4933_v25 = vadd.f32 %v4928_v32, %v9106_v55  ;;  %v5191_v32 = vld [vmem:[%s9631_s21 + $0x58] sm:$0xff] }
0x4d35   :  { %v4930_v5 = vpop.f32.mrf.mxu0 }
0x4d36   :  { %v6229_v61 = vmul.f32 -1.442695, %v4933_v25  ;;  %v4934_v2 = vadd.f32 %v4930_v5, %v9110_v52  ;;  %v5183_v25 = vld [vmem:[%s9631_s21 + $0x18] sm:$0xff]  ;;  %v5182_v5 = vld [vmem:[%s9631_s21 + $0x10] sm:$0xff] }
0x4d38   :  { %7437 = vpow2.f32 %v6229_v61  ;;  %v6230_v15 = vmul.f32 -1.442695, %v4934_v2  ;;  %v5190_v61 = vld [vmem:[%s9631_s21 + $0x50] sm:$0xff] }
0x4d39   :  { %7439 = vtanh.f32 %v4934_v2  ;;  %v5189_v2 = vld [vmem:[%s9631_s21 + $0x48] sm:$0xff] }
0x4d45   :  { %v7438_v48 = vpop.eup %7437 }
0x4d46   :  { %v4941_v27 = vadd.f32 1.0, %v7438_v48  ;;  %v7440_v53 = vpop.eup %7439  ;;  %v5181_v48 = vld [vmem:[%s9631_s21 + $0x8] sm:$0xff] }
0x4d48   :  { %7441 = vrcp.f32 %v4941_v27  ;;  %v5188_v27 = vld [vmem:[%s9631_s21 + $0x40] sm:$0xff] }
0x4d49   :  { %7443 = vpow2.f32 %v6230_v15  ;;  %v5430_v15 = vld [vmem:[%s9631_s21 + $0xb0] sm:$0xff] }
0x4d55   :  { %v7442_v21 = vpop.eup %7441 }
0x4d56   :  { %v4949_v38 = vmul.f32 %v7442_v21, %v7440_v53  ;;  %v7444_v3 = vpop.eup %7443  ;;  %v4948_v30 = vmul.f32 %v7442_v21, %v4852_v7  ;;  %v5193_v7 = vld [vmem:[%s9631_s21 + $0x68] sm:$0xff]  ;;  %v5180_v53 = vld [vmem:[%s9631_s21] sm:$0xff]  ;;  %v5431_v21 = vld [vmem:[%s9631_s21 + $0xb8] sm:$0xff] }
0x4d57   :  { %v4942_v49 = vadd.f32 1.0, %v7444_v3  ;;  %v5554_v3 = vld [vmem:[%s9631_s21 + $0xf0] sm:$0xff] }
0x4d58   :  { %4951 = vrot.lane.b32.xlu0 %v4949_v38, %s7478_s25  ;;  %v5555_v38 = vld [vmem:[%s9631_s21 + $0xf8] sm:$0xff] }
0x4d59   :  { %7445 = vrcp.f32 %v4942_v49 }
0x4d66   :  { %v7446_v20 = vpop.eup %7445 }
0x4dca   :  { %v4952_v39 = vpop.permute.xlu0 %4951 }
0x4dcb   :  { %v4954_v55 = vadd.f32 %v4952_v39, %v4948_v30 }
0x4dcd   :  { %7447 = vtanh.f32 %v4954_v55 }
0x4dda   :  { %v7448_v52 = vpop.eup %7447 }
0x4ddb   :  { %v4956_v31 = vmul.f32 %v7448_v52, %v7446_v20 }
0x4ddd   :  { %4960 = vrot.lane.b32.xlu1 %v4956_v31, %s7478_s25  ;;  %v5429_v31 = vld [vmem:[%s9631_s21 + $0xa8] sm:$0xff] }
0x4e4f   :  { %v9248_v22 = vpop.permute.xlu1 %4960 }
0x4e50   :  { %6231 = vmatmul.mubr.msk.f32.vlgmr.msra.gmra.mxu1 %vm3202_vm6, %v9248_v22 }
0x4e51   :  { %6897 = vmatprep.mubr.f32.mxu1 %v7475_v6 }
0x4f10   :  { %v5030_v10 = vpop.f32.mrf.mxu1 }
0x4f11   :  { %v5035_v60 = vadd.f32 %v5030_v10, %v9114_v59  ;;  %v5553_v10 = vld [vmem:[%s9631_s21 + $0xe8] sm:$0xff] }
0x4f12   :  { %v5032_v26 = vpop.f32.mrf.mxu1 }
0x4f13   :  { %v6232_v63 = vmul.f32 -1.442695, %v5035_v60  ;;  %v5036_v23 = vadd.f32 %v5032_v26, %v9116_v58  ;;  %v5428_v60 = vld [vmem:[%s9631_s21 + $0xa0] sm:$0xff]  ;;  %v5427_v26 = vld [vmem:[%s9631_s21 + $0x98] sm:$0xff] }
0x4f15   :  { %7449 = vpow2.f32 %v6232_v63  ;;  %v6233_v13 = vmul.f32 -1.442695, %v5036_v23  ;;  %v5552_v63 = vld [vmem:[%s9631_s21 + $0xe0] sm:$0xff] }
0x4f16   :  { %7451 = vtanh.f32 %v5036_v23  ;;  %v5551_v23 = vld [vmem:[%s9631_s21 + $0xd8] sm:$0xff] }
0x4f22   :  { %v7450_v40 = vpop.eup %7449 }
0x4f23   :  { %v5043_v18 = vadd.f32 1.0, %v7450_v40  ;;  %v7452_v29 = vpop.eup %7451  ;;  %v5426_v40 = vld [vmem:[%s9631_s21 + $0x90] sm:$0xff] }
0x4f25   :  { %7453 = vrcp.f32 %v5043_v18  ;;  %v5550_v18 = vld [vmem:[%s9631_s21 + $0xd0] sm:$0xff] }
0x4f26   :  { %7455 = vpow2.f32 %v6233_v13 }
0x4f32   :  { %v7454_v56 = vpop.eup %7453 }
0x4f33   :  { %v5051_v4 = vmul.f32 %v7454_v56, %v7452_v29  ;;  %v7456_v28 = vpop.eup %7455  ;;  %v5050_v11 = vmul.f32 %v7454_v56, %v4954_v55  ;;  %v5425_v56 = vld [vmem:[%s9631_s21 + $0x88] sm:$0xff] }
0x4f34   :  { %v5044_v46 = vadd.f32 1.0, %v7456_v28  ;;  %v5424_v28 = vld [vmem:[%s9631_s21 + $0x80] sm:$0xff] }
0x4f35   :  { %5053 = vrot.lane.b32.xlu0 %v5051_v4, %s7478_s25  ;;  %v5549_v4 = vld [vmem:[%s9631_s21 + $0xc8] sm:$0xff] }
0x4f36   :  { %7457 = vrcp.f32 %v5044_v46  ;;  %v5548_v46 = vld [vmem:[%s9631_s21 + $0xc0] sm:$0xff] }
0x4f43   :  { %v7458_v58 = vpop.eup %7457 }
0x4fa7   :  { %v5054_v59 = vpop.permute.xlu0 %5053 }
0x4fa8   :  { %v9256_v24 = vadd.f32 %v5054_v59, %v5050_v11  ;;  %v5679_v59 = vld [vmem:[%s9631_s21 + $0x138] sm:$0xff] }
0x4faa   :  { %7459 = vtanh.f32 %v9256_v24 }
0x4fb7   :  { %v7460_v17 = vpop.eup %7459 }
0x4fb8   :  { %v5058_v35 = vmul.f32 %v7460_v17, %v7458_v58 }
0x4fba   :  { %5062 = vrot.lane.b32.xlu1 %v5058_v35, %s7478_s25 }
0x502c   :  { %v9260_v44 = vpop.permute.xlu1 %5062 }
0x502d   :  { %6234 = vmatmul.mubr.msk.f32.vlgmr.msra.gmra.mxu0 %vm3202_vm6, %v9260_v44  ;;  %v9391_v35 = vsel %vm498_vm4, %v9150_v34, %v9260_v44 }
0x502e   :  { %6925 = vmatprep.mubr.f32.mxu0 %v7475_v6 }
0x50ed   :  { %v5132_v12 = vpop.f32.mrf.mxu0 }
0x50ee   :  { %v5137_v51 = vadd.f32 %v5132_v12, %v9118_v14  ;;  %v5195_v14 = vld [vmem:[%s9631_s21 + $0x78] sm:$0xff]  ;;  %v9398_v12 = vsel %vm498_vm4, %v9175_v37, %v9248_v22 }
0x50ef   :  { %v5134_v43 = vpop.f32.mrf.mxu0  ;;  %6881 = vmatprep.subr.mxu1 %v5195_v14 }
0x50f0   :  { %v6235_v9 = vmul.f32 -1.442695, %v5137_v51  ;;  %v9267_v45 = vadd.f32 %v5134_v43, %v9120_v8  ;;  %v5187_v8 = vld [vmem:[%s9631_s21 + $0x38] sm:$0xff]  ;;  %6882 = vmatpush3.msra.mxu1 %v5195_v14  ;;  %v9409_v51 = vsel %vm498_vm4, %v9200_v19, %v9224_v16  ;;  %v9427_v43 = vsel %vm498_vm4, %v9248_v22, %v9175_v37  ;;  %v5799_v37 = vld [vmem:[%s9631_s21 + $0x170] sm:$0xff]  ;;  %v5798_v22 = vld [vmem:[%s9631_s21 + $0x168] sm:$0xff] }
0x50f1   :  { %6909 = vmatprep.subr.mxu0 %v5187_v8  ;;  %6883 = vmatprep.subr.mxu1 %v5194_v42  ;;  %v5795_v14 = vld [vmem:[%s9631_s21 + $0x150] sm:$0xff] }
0x50f2   :  { %7461 = vpow2.f32 %v6235_v9  ;;  %6910 = vmatpush3.msra.mxu0 %v5187_v8  ;;  %6884 = vmatpush3.msra.mxu1 %v5194_v42  ;;  %v6236_v49 = vmul.f32 -1.442695, %v9267_v45  ;;  %v9416_v9 = vsel %vm498_vm4, %v9224_v16, %v9200_v19  ;;  %v5678_v19 = vld [vmem:[%s9631_s21 + $0x130] sm:$0xff]  ;;  %v5677_v16 = vld [vmem:[%s9631_s21 + $0x128] sm:$0xff]  ;;  %v5672_v42 = vld [vmem:[%s9631_s21 + $0x100] sm:$0xff] }
0x50f3   :  { %7463 = vtanh.f32 %v9267_v45  ;;  %6911 = vmatprep.subr.mxu0 %v5186_v41  ;;  %6885 = vmatprep.subr.mxu1 %v5193_v7  ;;  %v5676_v45 = vld [vmem:[%s9631_s21 + $0x120] sm:$0xff] }
0x50f4   :  { %6912 = vmatpush3.msra.mxu0 %v5186_v41  ;;  %6886 = vmatpush3.msra.mxu1 %v5193_v7  ;;  %v5793_v41 = vld [vmem:[%s9631_s21 + $0x140] sm:$0xff]  ;;  %v5920_v7 = vld [vmem:[%s9631_s21 + $0x1b0] sm:$0xff] }
0x50f5   :  { %6913 = vmatprep.subr.mxu0 %v5185_v36  ;;  %6887 = vmatprep.subr.mxu1 %v5192_v1 }
0x50f6   :  { %6914 = vmatpush3.msra.mxu0 %v5185_v36  ;;  %6888 = vmatpush3.msra.mxu1 %v5192_v1  ;;  %v5919_v36 = vld [vmem:[%s9631_s21 + $0x1a8] sm:$0xff]  ;;  %v5918_v1 = vld [vmem:[%s9631_s21 + $0x1a0] sm:$0xff] }
0x50f7   :  { %6915 = vmatprep.subr.mxu0 %v5184_v62  ;;  %6889 = vmatprep.subr.mxu1 %v5191_v32 }
0x50f8   :  { %6916 = vmatpush3.msra.mxu0 %v5184_v62  ;;  %6890 = vmatpush3.msra.mxu1 %v5191_v32  ;;  %v5917_v62 = vld [vmem:[%s9631_s21 + $0x198] sm:$0xff]  ;;  %v5916_v32 = vld [vmem:[%s9631_s21 + $0x190] sm:$0xff] }
0x50f9   :  { %6917 = vmatprep.subr.mxu0 %v5183_v25  ;;  %6891 = vmatprep.subr.mxu1 %v5190_v61 }
0x50fa   :  { %6918 = vmatpush3.msra.mxu0 %v5183_v25  ;;  %6892 = vmatpush3.msra.mxu1 %v5190_v61  ;;  %v5915_v25 = vld [vmem:[%s9631_s21 + $0x188] sm:$0xff]  ;;  %v5914_v61 = vld [vmem:[%s9631_s21 + $0x180] sm:$0xff] }
0x50fb   :  { %6919 = vmatprep.subr.mxu0 %v5182_v5  ;;  %6893 = vmatprep.subr.mxu1 %v5189_v2 }
0x50fc   :  { %6920 = vmatpush3.msra.mxu0 %v5182_v5  ;;  %6894 = vmatpush3.msra.mxu1 %v5189_v2 }
0x50fd   :  { %6921 = vmatprep.subr.mxu0 %v5181_v48  ;;  %6895 = vmatprep.subr.mxu1 %v5188_v27 }
0x50fe   :  { %6922 = vmatpush3.msra.mxu0 %v5181_v48  ;;  %6896 = vmatpush3.msra.mxu1 %v5188_v27 }
0x50ff   :  { %v7462_v47 = vpop.eup %7461  ;;  %6923 = vmatprep.subr.mxu0 %v5180_v53  ;;  %6898 = vmatmul.mubr.f32.vlgmr.msra.gmra.mxu1 %v7475_v6 }
0x5100   :  { %v5145_v50 = vadd.f32 1.0, %v7462_v47  ;;  %v7464_v57 = vpop.eup %7463  ;;  %6924 = vmatpush3.msra.mxu0 %v5180_v53  ;;  %6937 = vmatprep.subr.mxu1 %v5431_v21  ;;  %v5797_v47 = vld [vmem:[%s9631_s21 + $0x160] sm:$0xff] }
0x5101   :  { %6926 = vmatmul.mubr.f32.vlgmr.msra.gmra.mxu0 %v7475_v6  ;;  %6965 = vmatprep.subr.mxu0 %v5555_v38 }
0x5102   :  { %7465 = vrcp.f32 %v5145_v50  ;;  %6938 = vmatpush3.msra.mxu1 %v5431_v21  ;;  %6966 = vmatpush3.msra.mxu0 %v5555_v38  ;;  %v5675_v50 = vld [vmem:[%s9631_s21 + $0x118] sm:$0xff] }
0x5103   :  { %6939 = vmatprep.subr.mxu1 %v5430_v15  ;;  %6967 = vmatprep.subr.mxu0 %v5554_v3  ;;  %7467 = vpow2.f32 %v6236_v49 }
0x5104   :  { %6928 = vmatprep.mubr.f32.mxu0 %v7475_v6  ;;  %6940 = vmatpush3.msra.mxu1 %v5430_v15 }
0x5105   :  { %6968 = vmatpush3.msra.mxu0 %v5554_v3  ;;  %6941 = vmatprep.subr.mxu1 %v5429_v31 }
0x5106   :  { %6969 = vmatprep.subr.mxu0 %v5553_v10  ;;  %6942 = vmatpush3.msra.mxu1 %v5429_v31 }
0x5107   :  { %6970 = vmatpush3.msra.mxu0 %v5553_v10  ;;  %6943 = vmatprep.subr.mxu1 %v5428_v60 }
0x5108   :  { %6971 = vmatprep.subr.mxu0 %v5552_v63  ;;  %6944 = vmatpush3.msra.mxu1 %v5428_v60 }
0x5109   :  { %6972 = vmatpush3.msra.mxu0 %v5552_v63  ;;  %6945 = vmatprep.subr.mxu1 %v5427_v26 }
0x510a   :  { %6973 = vmatprep.subr.mxu0 %v5551_v23  ;;  %6946 = vmatpush3.msra.mxu1 %v5427_v26 }
0x510b   :  { %6974 = vmatpush3.msra.mxu0 %v5551_v23  ;;  %6947 = vmatprep.subr.mxu1 %v5426_v40 }
0x510c   :  { %6975 = vmatprep.subr.mxu0 %v5550_v18  ;;  %6948 = vmatpush3.msra.mxu1 %v5426_v40 }
0x510d   :  { %6976 = vmatpush3.msra.mxu0 %v5550_v18  ;;  %6949 = vmatprep.subr.mxu1 %v5425_v56 }
0x510e   :  { %6977 = vmatprep.subr.mxu0 %v5549_v4  ;;  %6950 = vmatpush3.msra.mxu1 %v5425_v56 }
0x510f   :  { %v9270_v54 = vpop.eup %7465  ;;  %6978 = vmatpush3.msra.mxu0 %v5549_v4  ;;  %6951 = vmatprep.subr.mxu1 %v5424_v28 }
0x5110   :  { %v5153_v33 = vmul.f32 %v9270_v54, %v7464_v57  ;;  %v7468_v30 = vpop.eup %7467  ;;  %v5152_v55 = vmul.f32 %v9270_v54, %v9256_v24  ;;  %6979 = vmatprep.subr.mxu0 %v5548_v46  ;;  %6952 = vmatpush3.msra.mxu1 %v5424_v28  ;;  %v5800_v24 = vld [vmem:[%s9631_s21 + $0x178] sm:$0xff]  ;;  %v9477_v54 = vsel %vm498_vm4, %v9260_v44, %v9150_v34  ;;  %v5673_v34 = vld [vmem:[%s9631_s21 + $0x108] sm:$0xff] }
0x5111   :  { %v5146_v39 = vadd.f32 1.0, %v7468_v30  ;;  %6980 = vmatpush3.msra.mxu0 %v5548_v46  ;;  %6993 = vmatprep.subr.mxu1 %v5679_v59  ;;  %v5796_v57 = vld [vmem:[%s9631_s21 + $0x158] sm:$0xff]  ;;  %v5794_v44 = vld [vmem:[%s9631_s21 + $0x148] sm:$0xff] }
0x5112   :  { %5155 = vrot.lane.b32.xlu0 %v5153_v33, %s7478_s25  ;;  %7021 = vmatprep.subr.mxu0 %v5800_v24  ;;  %v5674_v33 = vld [vmem:[%s9631_s21 + $0x110] sm:$0xff] }
0x5113   :  { %7469 = vrcp.f32 %v5146_v39 }
0x5120   :  { %v7470_v29 = vpop.eup %7469 }
0x5184   :  { %v5156_v20 = vpop.permute.xlu0 %5155 }
0x5185   :  { %v5158_v52 = vadd.f32 %v5156_v20, %v5152_v55 }
0x5187   :  { %7471 = vtanh.f32 %v5158_v52 }
0x5194   :  { %v7472_v13 = vpop.eup %7471 }
0x5195   :  { %v5160_v11 = vmul.f32 %v7472_v13, %v7470_v29 }
0x5197   :  { %5162 = vrot.lane.b32.xlu1 %v5160_v11, %s7478_s25 }
0x51bf   :  { %v6899_v2 = vpop.f32.mrf.mxu1 }
0x51c1   :  { %v6927_v5 = vpop.f32.mrf.mxu0  ;;  %v5280_v27 = vpop.f32.mrf.mxu1 }
0x51c3   :  { %v5385_v48 = vpop.f32.mrf.mxu0 }
0x5209   :  { %v9383_v58 = vpop.permute.xlu1 %5162 }
0x520a   :  { %v5172_v17 = vsel %vm498_vm4, %v9125_v0, %v9383_v58  ;;  %v5179_v8 = vsel %vm498_vm4, %v9383_v58, %v9125_v0  ;;  %v5921_v0 = vld [vmem:[%s9631_s21 + $0x1b8] sm:$0xff] }
0x520b   :  { %6900 = vmatprep.mubr.msk.f32.mxu1 %vm3202_vm6, %v5172_v17  ;;  %6929 = vmatmul.mubr.msk.f32.gmra.mxu0 %vm3202_vm6, %v5172_v17 }
0x520c   :  { %6901 = vmatmul.mubr.msk.f32.gmra.mxu1 %vm3202_vm6, %v9391_v35  ;;  %6931 = vmatprep.mubr.msk.f32.mxu0 %vm3202_vm6, %v9391_v35 }
0x520d   :  { %6903 = vmatprep.mubr.msk.f32.mxu1 %vm3202_vm6, %v9398_v12 }
0x520f   :  { %6932 = vmatmul.mubr.msk.f32.gmra.mxu0 %vm3202_vm6, %v9398_v12 }
0x5210   :  { %6904 = vmatmul.mubr.msk.f32.gmra.mxu1 %vm3202_vm6, %v9409_v51  ;;  %6934 = vmatprep.mubr.msk.f32.mxu0 %vm3202_vm6, %v9409_v51 }
0x5211   :  { %6906 = vmatprep.mubr.msk.f32.mxu1 %vm3202_vm6, %v9416_v9 }
0x5213   :  { %6935 = vmatmul.mubr.msk.f32.gmra.mxu0 %vm3202_vm6, %v9416_v9 }
0x5214   :  { %6907 = vmatmul.mubr.msk.f32.gmra.mxu1 %vm3202_vm6, %v9427_v43  ;;  %6981 = vmatprep.mubr.msk.f32.mxu0 %vm3202_vm6, %v5172_v17 }
0x5215   :  { %6953 = vmatprep.mubr.f32.mxu1 %v7475_v6 }
0x5217   :  { %6982 = vmatmul.mubr.msk.f32.vlgmr.msra.gmra.mxu0 %vm3202_vm6, %v9391_v35 }
0x5218   :  { %6954 = vmatmul.mubr.msk.f32.vlgmr.msra.gmra.mxu1 %vm3202_vm6, %v5172_v17  ;;  %6984 = vmatprep.mubr.msk.f32.mxu0 %vm3202_vm6, %v9398_v12 }
0x5219   :  { %6994 = vmatpush3.msra.mxu1 %v5679_v59  ;;  %7022 = vmatpush3.msra.mxu0 %v5800_v24 }
0x521a   :  { %6956 = vmatprep.mubr.msk.f32.mxu1 %vm3202_vm6, %v9391_v35  ;;  %6995 = vmatprep.subr.mxu1 %v5678_v19 }
0x521b   :  { %7023 = vmatprep.subr.mxu0 %v5799_v37  ;;  %6996 = vmatpush3.msra.mxu1 %v5678_v19 }
0x521c   :  { %7024 = vmatpush3.msra.mxu0 %v5799_v37  ;;  %6997 = vmatprep.subr.mxu1 %v5677_v16 }
0x521d   :  { %6985 = vmatmul.mubr.msk.f32.gmra.mxu0 %vm3202_vm6, %v9409_v51  ;;  %7025 = vmatprep.subr.mxu0 %v5798_v22 }
0x521e   :  { %6957 = vmatmul.mubr.msk.f32.gmra.mxu1 %vm3202_vm6, %v9398_v12  ;;  %6987 = vmatprep.mubr.msk.f32.mxu0 %vm3202_vm6, %v9416_v9 }
0x521f   :  { %6998 = vmatpush3.msra.mxu1 %v5677_v16  ;;  %7026 = vmatpush3.msra.mxu0 %v5798_v22 }
0x5220   :  { %6959 = vmatprep.mubr.msk.f32.mxu1 %vm3202_vm6, %v9409_v51  ;;  %6999 = vmatprep.subr.mxu1 %v5676_v45 }
0x5221   :  { %7027 = vmatprep.subr.mxu0 %v5797_v47  ;;  %7000 = vmatpush3.msra.mxu1 %v5676_v45 }
0x5222   :  { %7028 = vmatpush3.msra.mxu0 %v5797_v47  ;;  %7001 = vmatprep.subr.mxu1 %v5675_v50 }
0x5223   :  { %6988 = vmatmul.mubr.msk.f32.gmra.mxu0 %vm3202_vm6, %v9427_v43  ;;  %7029 = vmatprep.subr.mxu0 %v5796_v57 }
0x5224   :  { %6960 = vmatmul.mubr.msk.f32.gmra.mxu1 %vm3202_vm6, %v9416_v9  ;;  %6990 = vmatprep.mubr.msk.f32.mxu0 %vm3202_vm6, %v9477_v54 }
0x5225   :  { %7002 = vmatpush3.msra.mxu1 %v5675_v50  ;;  %7030 = vmatpush3.msra.mxu0 %v5796_v57 }
0x5226   :  { %6962 = vmatprep.mubr.msk.f32.mxu1 %vm3202_vm6, %v9427_v43  ;;  %7003 = vmatprep.subr.mxu1 %v5674_v33 }
0x5227   :  { %7031 = vmatprep.subr.mxu0 %v5795_v14  ;;  %7004 = vmatpush3.msra.mxu1 %v5674_v33 }
0x5228   :  { %7032 = vmatpush3.msra.mxu0 %v5795_v14  ;;  %7005 = vmatprep.subr.mxu1 %v5673_v34 }
0x5229   :  { %6991 = vmatmul.mubr.msk.f32.gmra.mxu0 %vm3202_vm6, %v5179_v8  ;;  %7033 = vmatprep.subr.mxu0 %v5794_v44 }
0x522a   :  { %6963 = vmatmul.mubr.msk.f32.gmra.mxu1 %vm3202_vm6, %v9477_v54  ;;  %7034 = vmatpush3.msra.mxu0 %v5794_v44 }
0x522b   :  { %7006 = vmatpush3.msra.mxu1 %v5673_v34  ;;  %7037 = vmatprep.mubr.msk.f32.mxu0 %vm3202_vm6, %v9398_v12 }
0x522c   :  { %7007 = vmatprep.subr.mxu1 %v5672_v42  ;;  %7009 = vmatprep.mubr.msk.f32.mxu1 %vm3202_vm6, %v9391_v35  ;;  %v5391_v35 = vadd.f32 %v6927_v5, %v6899_v2 }
0x522d   :  { %7035 = vmatprep.subr.mxu0 %v5793_v41  ;;  %7008 = vmatpush3.msra.mxu1 %v5672_v42 }
0x522e   :  { %7036 = vmatpush3.msra.mxu0 %v5793_v41  ;;  %7049 = vmatprep.subr.mxu1 %v5921_v0 }
0x522f   :  { %7038 = vmatmul.mubr.msk.f32.vlgmr.msra.gmra.mxu0 %vm3202_vm6, %v9409_v51  ;;  %7010 = vmatmul.mubr.msk.f32.vlgmr.msra.gmra.mxu1 %vm3202_vm6, %v9398_v12 }
0x5230   :  { %7040 = vmatprep.mubr.msk.f32.mxu0 %vm3202_vm6, %v9416_v9  ;;  %7050 = vmatpush3.msra.mxu1 %v5921_v0 }
0x5231   :  { %7012 = vmatprep.mubr.msk.f32.mxu1 %vm3202_vm6, %v9409_v51  ;;  %7051 = vmatprep.subr.mxu1 %v5920_v7 }
0x5232   :  { %7052 = vmatpush3.msra.mxu1 %v5920_v7 }
0x5233   :  { %7041 = vmatmul.mubr.msk.f32.gmra.mxu0 %vm3202_vm6, %v9427_v43  ;;  %7053 = vmatprep.subr.mxu1 %v5919_v36 }
0x5234   :  { %7013 = vmatmul.mubr.msk.f32.gmra.mxu1 %vm3202_vm6, %v9416_v9  ;;  %7043 = vmatprep.mubr.msk.f32.mxu0 %vm3202_vm6, %v9477_v54 }
0x5235   :  { %7054 = vmatpush3.msra.mxu1 %v5919_v36  ;;  %7015 = vmatprep.mubr.msk.f32.mxu1 %vm3202_vm6, %v9427_v43 }
0x5236   :  { %7055 = vmatprep.subr.mxu1 %v5918_v1 }
0x5237   :  { %7056 = vmatpush3.msra.mxu1 %v5918_v1  ;;  %7044 = vmatmul.mubr.msk.f32.gmra.mxu0 %vm3202_vm6, %v5179_v8 }
0x5238   :  { %7057 = vmatprep.subr.mxu1 %v5917_v62  ;;  %7016 = vmatmul.mubr.msk.f32.gmra.mxu1 %vm3202_vm6, %v9477_v54 }
0x5239   :  { %7058 = vmatpush3.msra.mxu1 %v5917_v62  ;;  %7018 = vmatprep.mubr.msk.f32.mxu1 %vm3202_vm6, %v5179_v8 }
0x523a   :  { %7059 = vmatprep.subr.mxu1 %v5916_v32  ;;  %7046 = vmatprep.mubr.f32.mxu0 %v7475_v6 }
0x523b   :  { %7060 = vmatpush3.msra.mxu1 %v5916_v32  ;;  %7047 = vmatmul.mubr.f32.gmra.mxu0 %v7475_v6 }
0x523c   :  { %7061 = vmatprep.subr.mxu1 %v5915_v25  ;;  %7019 = vmatmul.mubr.f32.gmra.mxu1 %v7475_v6 }
0x523d   :  { %7062 = vmatpush3.msra.mxu1 %v5915_v25  ;;  %7065 = vmatprep.mubr.msk.f32.mxu1 %vm3202_vm6, %v9409_v51 }
0x523e   :  { %7063 = vmatprep.subr.mxu1 %v5914_v61 }
0x523f   :  { %7064 = vmatpush3.msra.mxu1 %v5914_v61 }
0x5240   :  { %7066 = vmatmul.mubr.msk.f32.vlgmr.msra.gmra.mxu1 %vm3202_vm6, %v9416_v9  ;;  %v5386_v9 = vadd.f32 %v5385_v48, %v5280_v27 }
0x5241   :  { %7068 = vmatprep.mubr.msk.f32.mxu1 %vm3202_vm6, %v9427_v43 }
0x5244   :  { %7069 = vmatmul.mubr.msk.f32.gmra.mxu1 %vm3202_vm6, %v9477_v54 }
0x5245   :  { %7071 = vmatprep.mubr.msk.f32.mxu1 %vm3202_vm6, %v5179_v8 }
0x5248   :  { %7072 = vmatmul.mubr.f32.gmra.mxu1 %v7475_v6 }
0x5249   :  { %7074 = vmatprep.mubr.f32.mxu1 %v7475_v6 }
0x524c   :  { %7075 = vmatmul.mubr.f32.gmra.mxu1 %v7475_v6 }
0x52cb   :  { %v6930_v53 = vpop.f32.mrf.mxu0 }
0x52cc   :  { %v6902_v21 = vpop.f32.mrf.mxu1 }
0x52cd   :  { %v5395_v38 = vpop.f32.mrf.mxu0  ;;  %v5401_v37 = vadd.f32 %v6930_v53, %v6902_v21  ;;  %v6281_v21 = vld [vmem:[%s9632_s22] ss:$0 sm:$0xff] }
0x52ce   :  { %v5290_v15 = vpop.f32.mrf.mxu1 }
0x52cf   :  { %v6933_v3 = vpop.f32.mrf.mxu0  ;;  %v5396_v47 = vadd.f32 %v5395_v38, %v5290_v15 }
0x52d0   :  { %v6905_v49 = vpop.f32.mrf.mxu1 }
0x52d1   :  { %v5405_v30 = vpop.f32.mrf.mxu0  ;;  %v5411_v33 = vadd.f32 %v6933_v3, %v6905_v49 }
0x52d2   :  { %v5300_v39 = vpop.f32.mrf.mxu1 }
0x52d3   :  { %v6936_v55 = vpop.f32.mrf.mxu0  ;;  %v5406_v8 = vadd.f32 %v5405_v30, %v5300_v39 }
0x52d4   :  { %v6908_v20 = vpop.f32.mrf.mxu1 }
0x52d5   :  { %v5415_v52 = vpop.f32.mrf.mxu0  ;;  %v5421_v1 = vadd.f32 %v6936_v55, %v6908_v20 }
0x52d6   :  { %v5310_v31 = vpop.f32.mrf.mxu1 }
0x52d7   :  { %v6983_v10 = vpop.f32.mrf.mxu0  ;;  %v5416_v2 = vadd.f32 %v5415_v52, %v5310_v31 }
0x52d8   :  { %v6955_v60 = vpop.f32.mrf.mxu1 }
0x52d9   :  { %v5625_v63 = vpop.f32.mrf.mxu0  ;;  %v5541_v43 = vadd.f32 %v6955_v60, %v5391_v35 }
0x52da   :  { %v5501_v6 = vpop.f32.mrf.mxu1 }
0x52db   :  { %v5540_v16 = vadd.f32 %v5501_v6, %v5386_v9  ;;  %v5665_v57 = vadd.f32 %v6983_v10, %v5541_v43 }
0x52dd   :  { %v6986_v26 = vpop.f32.mrf.mxu0  ;;  %v5664_v44 = vadd.f32 %v5625_v63, %v5540_v16 }
0x52de   :  { %v6958_v23 = vpop.f32.mrf.mxu1 }
0x52df   :  { %v5635_v40 = vpop.f32.mrf.mxu0  ;;  %v5543_v50 = vadd.f32 %v6958_v23, %v5401_v37 }
0x52e0   :  { %v5511_v18 = vpop.f32.mrf.mxu1 }
0x52e1   :  { %v5542_v14 = vadd.f32 %v5511_v18, %v5396_v47  ;;  %v5667_v36 = vadd.f32 %v6986_v26, %v5543_v50 }
0x52e3   :  { %v6989_v29 = vpop.f32.mrf.mxu0  ;;  %v5666_v61 = vadd.f32 %v5635_v40, %v5542_v14 }
0x52e4   :  { %v6961_v56 = vpop.f32.mrf.mxu1 }
0x52e5   :  { %v5645_v4 = vpop.f32.mrf.mxu0  ;;  %v5545_v0 = vadd.f32 %v6961_v56, %v5411_v33 }
0x52e6   :  { %v5521_v13 = vpop.f32.mrf.mxu1 }
0x52e7   :  { %v5544_v62 = vadd.f32 %v5521_v13, %v5406_v8  ;;  %v5669_v15 = vadd.f32 %v6989_v29, %v5545_v0 }
0x52e9   :  { %v6992_v28 = vpop.f32.mrf.mxu0  ;;  %v5668_v39 = vadd.f32 %v5645_v4, %v5544_v62 }
0x52ea   :  { %v6964_v46 = vpop.f32.mrf.mxu1 }
0x52eb   :  { %v5655_v11 = vpop.f32.mrf.mxu0  ;;  %v5547_v48 = vadd.f32 %v6964_v46, %v5421_v1 }
0x52ec   :  { %v5531_v59 = vpop.f32.mrf.mxu1 }
0x52ed   :  { %v5546_v30 = vadd.f32 %v5531_v59, %v5416_v2  ;;  %v5671_v52 = vadd.f32 %v6992_v28, %v5547_v48 }
0x52ef   :  { %v7011_v24 = vpop.f32.mrf.mxu1  ;;  %v7039_v58 = vpop.f32.mrf.mxu0  ;;  %v5670_v29 = vadd.f32 %v5655_v11, %v5546_v30 }
0x52f0   :  { %v5786_v34 = vadd.f32 %v7011_v24, %v5665_v57 }
0x52f1   :  { %v5746_v17 = vpop.f32.mrf.mxu1  ;;  %v5867_v12 = vpop.f32.mrf.mxu0 }
0x52f2   :  { %v5785_v7 = vadd.f32 %v5746_v17, %v5664_v44  ;;  %v5907_v5 = vadd.f32 %v7039_v58, %v5786_v34 }
0x52f3   :  { %v7042_v22 = vpop.f32.mrf.mxu0 }
0x52f4   :  { %v7014_v51 = vpop.f32.mrf.mxu1  ;;  %v5906_v49 = vadd.f32 %v5867_v12, %v5785_v7 }
0x52f5   :  { %v5877_v42 = vpop.f32.mrf.mxu0  ;;  %v5788_v25 = vadd.f32 %v7014_v51, %v5667_v36 }
0x52f6   :  { %v5756_v19 = vpop.f32.mrf.mxu1 }
0x52f7   :  { %v7045_v27 = vpop.f32.mrf.mxu0  ;;  %v5787_v38 = vadd.f32 %v5756_v19, %v5666_v61  ;;  %v5909_v63 = vadd.f32 %v7042_v22, %v5788_v25 }
0x52f8   :  { %v7017_v45 = vpop.f32.mrf.mxu1 }
0x52f9   :  { %v5790_v20 = vadd.f32 %v7017_v45, %v5669_v15  ;;  %v5887_v6 = vpop.f32.mrf.mxu0  ;;  %v5908_v18 = vadd.f32 %v5877_v42, %v5787_v38 }
0x52fa   :  { %v5766_v54 = vpop.f32.mrf.mxu1 }
0x52fb   :  { %v5789_v26 = vadd.f32 %v5766_v54, %v5668_v39  ;;  %v7048_v56 = vpop.f32.mrf.mxu0  ;;  %v5911_v59 = vadd.f32 %v7045_v27, %v5790_v20 }
0x52fc   :  { %v7020_v41 = vpop.f32.mrf.mxu1 }
0x52fd   :  { %v5792_v13 = vadd.f32 %v7020_v41, %v5671_v52  ;;  %v5910_v35 = vadd.f32 %v5887_v6, %v5789_v26  ;;  %v5897_v12 = vpop.f32.mrf.mxu0 }
0x52fe   :  { %v5776_v32 = vpop.f32.mrf.mxu1 }
0x52ff   :  { %v5791_v58 = vadd.f32 %v5776_v32, %v5670_v29  ;;  %v5913_v9 = vadd.f32 %v7048_v56, %v5792_v13 }
0x5300   :  { %v7067_v53 = vpop.f32.mrf.mxu1 }
0x5301   :  { %v6028_v3 = vadd.f32 %v7067_v53, %v5907_v5  ;;  %v5912_v16 = vadd.f32 %v5897_v12, %v5791_v58 }
0x5302   :  { %v5988_v55 = vpop.f32.mrf.mxu1 }
0x5303   :  { %v6043_v10 = vadd.f32 %v6281_v21, %v6028_v3  ;;  %v6027_v60 = vadd.f32 %v5988_v55, %v5906_v49 }
0x5304   :  { %v7070_v31 = vpop.f32.mrf.mxu1 }
0x5305   :  { %6051 = vst.msk [vmem:[%s9633_s24 + $0x8] sm:$0xff] %vm2748_vm5, %v6043_v10  ;;  %v6042_v23 = vadd.f32 %v6281_v21, %v6027_v60  ;;  %v6030_v40 = vadd.f32 %v7070_v31, %v5909_v63 }
0x5306   :  { %v5998_v4 = vpop.f32.mrf.mxu1 }
0x5307   :  { %6050 = vst.msk [vmem:[%s9633_s24] sm:$0xff] %vm2748_vm5, %v6042_v23  ;;  %v6045_v28 = vadd.f32 %v6281_v21, %v6030_v40  ;;  %v6029_v46 = vadd.f32 %v5998_v4, %v5908_v18 }
0x5308   :  { %v7073_v24 = vpop.f32.mrf.mxu1 }
0x5309   :  { %6053 = vst.msk [vmem:[%s9633_s24 + $0x18] sm:$0xff] %vm2748_vm5, %v6045_v28  ;;  %v6044_v17 = vadd.f32 %v6281_v21, %v6029_v46  ;;  %v6032_v11 = vadd.f32 %v7073_v24, %v5911_v59 }
0x530a   :  { %v6008_v51 = vpop.f32.mrf.mxu1 }
0x530b   :  { %6052 = vst.msk [vmem:[%s9633_s24 + $0x10] sm:$0xff] %vm2748_vm5, %v6044_v17  ;;  %v6047_v43 = vadd.f32 %v6281_v21, %v6032_v11  ;;  %v6031_v19 = vadd.f32 %v6008_v51, %v5910_v35 }
0x530c   :  { %v7076_v37 = vpop.f32.mrf.mxu1 }
0x530d   :  { %6055 = vst.msk [vmem:[%s9633_s24 + $0x28] sm:$0xff] %vm2748_vm5, %v6047_v43  ;;  %v6046_v22 = vadd.f32 %v6281_v21, %v6031_v19  ;;  %v6034_v45 = vadd.f32 %v7076_v37, %v5913_v9 }
0x530e   :  { %v6018_v47 = vpop.f32.mrf.mxu1 }
0x530f   :  { %6054 = vst.msk [vmem:[%s9633_s24 + $0x20] sm:$0xff] %vm2748_vm5, %v6046_v22  ;;  %v6049_v50 = vadd.f32 %v6281_v21, %v6034_v45  ;;  %v6033_v57 = vadd.f32 %v6018_v47, %v5912_v16 }
0x5311   :  { %6057 = vst.msk [vmem:[%s9633_s24 + $0x38] sm:$0xff] %vm2748_vm5, %v6049_v50  ;;  %v6048_v54 = vadd.f32 %v6281_v21, %v6033_v57 }
0x5313   :  { %6056 = vst.msk [vmem:[%s9633_s24 + $0x30] sm:$0xff] %vm2748_vm5, %v6048_v54 }

</bundles_post_ra>
